<compile_context>
chip_gen: v7x
topology: tpu7x:2x2x1
jax: 0.10.0
libtpu: 0.0.40
codegen_flags: <defaults>
</compile_context>

<pallas_src>
import jax
import jax.numpy as jnp
from jax.experimental import pallas as pl
from jax.experimental.pallas import tpu as pltpu

IN_DIM = 2048
H1 = 524
H2 = 10
H3 = 10
OUT_DIM = 2

OUT_PAD = 128          # lane-dense padded output width (real outputs in [:, :2])
MAX_BATCH_TILE = 256   # rows per grid step for real workloads


def _round_up(a, b):
    return (a + b - 1) // b * b


def _qsar_mlp_kernel(x_ref,
                     w1_ref, b1_ref,
                     w2_ref, b2_ref,
                     w3_ref, b3_ref,
                     w4_ref, b4_ref,
                     o_ref):
    """Whole 4-layer MLP for one batch tile; all compute stays on-chip."""
    x = x_ref[...]                                                    # (TB, 2048)

    h1 = jnp.dot(x, w1_ref[...], preferred_element_type=jnp.float32)
    h1 = jnp.maximum(h1 + b1_ref[...], 0.0)                           # (TB, 524)

    h2 = jnp.dot(h1, w2_ref[...], preferred_element_type=jnp.float32)
    h2 = jnp.maximum(h2 + b2_ref[...], 0.0)                           # (TB, 10)

    h3 = jnp.dot(h2, w3_ref[...], preferred_element_type=jnp.float32)
    h3 = jnp.maximum(h3 + b3_ref[...], 0.0)                           # (TB, 10)

    # fc4 is zero-padded to 128 output columns -> full lane-dense store.
    z = jnp.dot(h3, w4_ref[...], preferred_element_type=jnp.float32)
    z = z + b4_ref[...]                                               # (TB, 128)

    # sigmoid (exp goes to the EUP)
    o_ref[...] = 1.0 / (1.0 + jnp.exp(-z))


@jax.jit
def qsar_mlp_forward(x, params):
    """x: (..., 2048) f32. Returns (N, 2) f32 with N = prod(leading dims)."""
    w1, b1, w2, b2, w3, b3, w4, b4 = params

    # x.view(-1, 2048)
    x2d = x.reshape(-1, IN_DIM).astype(jnp.float32)
    n = x2d.shape[0]

    # Adaptive batch tile: 256 for real workloads, smaller (multiple of 8) for
    # tiny batches so the test doesn't pay for 256 padded rows.
    tb = min(MAX_BATCH_TILE, _round_up(n, 8))
    n_pad = _round_up(n, tb)
    if n_pad != n:
        x2d = jnp.pad(x2d, ((0, n_pad - n), (0, 0)))

    # Lane-dense output: pad fc4 to 128 output columns with zeros.
    w4p = jnp.pad(w4, ((0, 0), (0, OUT_PAD - OUT_DIM)))
    b4p = jnp.pad(b4, ((0, 0), (0, OUT_PAD - OUT_DIM)))

    grid = (n_pad // tb,)

    # Weights/biases: constant index_map (resident across the batch grid) and
    # single-buffered so they don't burn double-buffer VMEM.
    def resident(shape):
        return pl.BlockSpec(shape, lambda i: (0, 0), pipeline_mode=pl.Buffered(1))

    out = pl.pallas_call(
        _qsar_mlp_kernel,
        out_shape=jax.ShapeDtypeStruct((n_pad, OUT_PAD), jnp.float32),
        grid=grid,
        in_specs=[
            pl.BlockSpec((tb, IN_DIM), lambda i: (i, 0)),   # x tile (pipelined)
            resident((IN_DIM, H1)),  resident((1, H1)),
            resident((H1, H2)),      resident((1, H2)),
            resident((H2, H3)),      resident((1, H3)),
            resident((H3, OUT_PAD)), resident((1, OUT_PAD)),
        ],
        out_specs=pl.BlockSpec((tb, OUT_PAD), lambda i: (i, 0)),
        compiler_params=pltpu.CompilerParams(
            dimension_semantics=("parallel",),
            vmem_limit_bytes=32 * 1024 * 1024),
    )(x2d, w1, b1, w2, b2, w3, b3, w4p, b4p)

    return out[:n, :OUT_DIM]


def init_params(key):
    """Deterministic init mimicking nn.Linear default (U[-1/sqrt(fan_in), +])."""
    dims = [(IN_DIM, H1), (H1, H2), (H2, H3), (H3, OUT_DIM)]
    params = []
    keys = jax.random.split(key, 2 * len(dims))
    for li, (fan_in, fan_out) in enumerate(dims):
        bound = 1.0 / jnp.sqrt(float(fan_in))
        w = jax.random.uniform(keys[2 * li], (fan_in, fan_out),
                               minval=-bound, maxval=bound, dtype=jnp.float32)
        b = jax.random.uniform(keys[2 * li + 1], (1, fan_out),
                               minval=-bound, maxval=bound, dtype=jnp.float32)
        params += [w, b]
    return tuple(params)


def reference_forward(x, params):
    """Pure-JAX reference for correctness check."""
    w1, b1, w2, b2, w3, b3, w4, b4 = params
    h = x.reshape(-1, IN_DIM).astype(jnp.float32)
    h = jnp.maximum(h @ w1 + b1, 0.0)
    h = jnp.maximum(h @ w2 + b2, 0.0)
    h = jnp.maximum(h @ w3 + b3, 0.0)
    return jax.nn.sigmoid(h @ w4 + b4)


if __name__ == "__main__":
    key = jax.random.PRNGKey(0)
    kp, kx = jax.random.split(key)

    params = init_params(kp)
    # Small batch of QSAR fingerprint vectors (any leading shape flattens to -1, 2048).
    x = jax.random.normal(kx, (4, IN_DIM), dtype=jnp.float32)

    out = qsar_mlp_forward(x, params)
    out = jax.block_until_ready(out)

    ref = reference_forward(x, params)
    assert out.shape == (4, OUT_DIM), out.shape
    assert jnp.allclose(out, ref, atol=1e-5, rtol=1e-5), "mismatch vs reference"

    print("KERNEL_OK")
</pallas_src>

<mosaic_0001>
module attributes {stable_mosaic.version = 11 : i64} {
  func.func @_qsar_mlp_kernel(%arg0: i32, %arg1: memref<8x2048xf32, #tpu.memory_space<vmem>>, %arg2: memref<2048x524xf32, #tpu.memory_space<vmem>>, %arg3: memref<1x524xf32, #tpu.memory_space<vmem>>, %arg4: memref<524x10xf32, #tpu.memory_space<vmem>>, %arg5: memref<1x10xf32, #tpu.memory_space<vmem>>, %arg6: memref<10x10xf32, #tpu.memory_space<vmem>>, %arg7: memref<1x10xf32, #tpu.memory_space<vmem>>, %arg8: memref<10x128xf32, #tpu.memory_space<vmem>>, %arg9: memref<1x128xf32, #tpu.memory_space<vmem>>, %arg10: memref<8x128xf32, #tpu.memory_space<vmem>>) attributes {dimension_semantics = [#tpu.dimension_semantics<parallel>], iteration_bounds = array<i64: 1>, scalar_prefetch = 0 : i64, scratch_operands = 0 : i64, tpu.core_type = #tpu.core_type<tc>, window_params = [{transform_indices = @transform_0, window_bounds = array<i64: 8, 2048>}, {pipeline_mode = #tpu.pipeline_mode<synchronous>, transform_indices = @transform_1, window_bounds = array<i64: 2048, 524>}, {pipeline_mode = #tpu.pipeline_mode<synchronous>, transform_indices = @transform_2, window_bounds = array<i64: 1, 524>}, {pipeline_mode = #tpu.pipeline_mode<synchronous>, transform_indices = @transform_3, window_bounds = array<i64: 524, 10>}, {pipeline_mode = #tpu.pipeline_mode<synchronous>, transform_indices = @transform_4, window_bounds = array<i64: 1, 10>}, {pipeline_mode = #tpu.pipeline_mode<synchronous>, transform_indices = @transform_5, window_bounds = array<i64: 10, 10>}, {pipeline_mode = #tpu.pipeline_mode<synchronous>, transform_indices = @transform_6, window_bounds = array<i64: 1, 10>}, {pipeline_mode = #tpu.pipeline_mode<synchronous>, transform_indices = @transform_7, window_bounds = array<i64: 10, 128>}, {pipeline_mode = #tpu.pipeline_mode<synchronous>, transform_indices = @transform_8, window_bounds = array<i64: 1, 128>}, {transform_indices = @transform_9, window_bounds = array<i64: 8, 128>}]} {
    %c0 = arith.constant 0 : index
    %c0_0 = arith.constant 0 : index
    %0 = vector.load %arg1[%c0, %c0_0] : memref<8x2048xf32, #tpu.memory_space<vmem>>, vector<8x2048xf32>
    %c0_1 = arith.constant 0 : index
    %c0_2 = arith.constant 0 : index
    %1 = vector.load %arg2[%c0_1, %c0_2] : memref<2048x524xf32, #tpu.memory_space<vmem>>, vector<2048x524xf32>
    %cst = arith.constant dense<0.000000e+00> : vector<8x524xf32>
    %2 = tpu.matmul %0, %1, %cst {dimension_numbers = #tpu.dot_dimension_numbers<[1], [0], [0], [1], [0, 0, 1, 1], [], []>} : vector<8x2048xf32>, vector<2048x524xf32>, vector<8x524xf32> -> vector<8x524xf32>
    %c0_3 = arith.constant 0 : index
    %c0_4 = arith.constant 0 : index
    %3 = vector.load %arg3[%c0_3, %c0_4] : memref<1x524xf32, #tpu.memory_space<vmem>>, vector<1x524xf32>
    %4 = vector.broadcast %3 : vector<1x524xf32> to vector<8x524xf32>
    %5 = arith.addf %2, %4 : vector<8x524xf32>
    %cst_5 = arith.constant 0.000000e+00 : f32
    %6 = vector.broadcast %cst_5 : f32 to vector<8x524xf32>
    %7 = arith.maximumf %5, %6 : vector<8x524xf32>
    %c0_6 = arith.constant 0 : index
    %c0_7 = arith.constant 0 : index
    %8 = vector.load %arg4[%c0_6, %c0_7] : memref<524x10xf32, #tpu.memory_space<vmem>>, vector<524x10xf32>
    %cst_8 = arith.constant dense<0.000000e+00> : vector<8x10xf32>
    %9 = tpu.matmul %7, %8, %cst_8 {dimension_numbers = #tpu.dot_dimension_numbers<[1], [0], [0], [1], [0, 0, 1, 1], [], []>} : vector<8x524xf32>, vector<524x10xf32>, vector<8x10xf32> -> vector<8x10xf32>
    %c0_9 = arith.constant 0 : index
    %c0_10 = arith.constant 0 : index
    %10 = vector.load %arg5[%c0_9, %c0_10] : memref<1x10xf32, #tpu.memory_space<vmem>>, vector<1x10xf32>
    %11 = vector.broadcast %10 : vector<1x10xf32> to vector<8x10xf32>
    %12 = arith.addf %9, %11 : vector<8x10xf32>
    %cst_11 = arith.constant 0.000000e+00 : f32
    %13 = vector.broadcast %cst_11 : f32 to vector<8x10xf32>
    %14 = arith.maximumf %12, %13 : vector<8x10xf32>
    %c0_12 = arith.constant 0 : index
    %c0_13 = arith.constant 0 : index
    %15 = vector.load %arg6[%c0_12, %c0_13] : memref<10x10xf32, #tpu.memory_space<vmem>>, vector<10x10xf32>
    %cst_14 = arith.constant dense<0.000000e+00> : vector<8x10xf32>
    %16 = tpu.matmul %14, %15, %cst_14 {dimension_numbers = #tpu.dot_dimension_numbers<[1], [0], [0], [1], [0, 0, 1, 1], [], []>} : vector<8x10xf32>, vector<10x10xf32>, vector<8x10xf32> -> vector<8x10xf32>
    %c0_15 = arith.constant 0 : index
    %c0_16 = arith.constant 0 : index
    %17 = vector.load %arg7[%c0_15, %c0_16] : memref<1x10xf32, #tpu.memory_space<vmem>>, vector<1x10xf32>
    %18 = vector.broadcast %17 : vector<1x10xf32> to vector<8x10xf32>
    %19 = arith.addf %16, %18 : vector<8x10xf32>
    %cst_17 = arith.constant 0.000000e+00 : f32
    %20 = vector.broadcast %cst_17 : f32 to vector<8x10xf32>
    %21 = arith.maximumf %19, %20 : vector<8x10xf32>
    %c0_18 = arith.constant 0 : index
    %c0_19 = arith.constant 0 : index
    %22 = vector.load %arg8[%c0_18, %c0_19] : memref<10x128xf32, #tpu.memory_space<vmem>>, vector<10x128xf32>
    %cst_20 = arith.constant dense<0.000000e+00> : vector<8x128xf32>
    %23 = tpu.matmul %21, %22, %cst_20 {dimension_numbers = #tpu.dot_dimension_numbers<[1], [0], [0], [1], [0, 0, 1, 1], [], []>} : vector<8x10xf32>, vector<10x128xf32>, vector<8x128xf32> -> vector<8x128xf32>
    %c0_21 = arith.constant 0 : index
    %c0_22 = arith.constant 0 : index
    %24 = vector.load %arg9[%c0_21, %c0_22] : memref<1x128xf32, #tpu.memory_space<vmem>>, vector<1x128xf32>
    %25 = vector.broadcast %24 : vector<1x128xf32> to vector<8x128xf32>
    %26 = arith.addf %23, %25 : vector<8x128xf32>
    %cst_23 = arith.constant 0.000000e+00 : f32
    %27 = vector.broadcast %cst_23 : f32 to vector<8x128xf32>
    %28 = arith.subf %27, %26 : vector<8x128xf32>
    %29 = math.exp %28 : vector<8x128xf32>
    %cst_24 = arith.constant 1.000000e+00 : f32
    %30 = vector.broadcast %cst_24 : f32 to vector<8x128xf32>
    %31 = arith.addf %30, %29 : vector<8x128xf32>
    %cst_25 = arith.constant 1.000000e+00 : f32
    %32 = vector.broadcast %cst_25 : f32 to vector<8x128xf32>
    %33 = arith.divf %32, %31 : vector<8x128xf32>
    %c0_26 = arith.constant 0 : index
    %c0_27 = arith.constant 0 : index
    %34 = vector.load %arg10[%c0_26, %c0_27] : memref<8x128xf32, #tpu.memory_space<vmem>>, vector<8x128xf32>
    tpu.vector_store %arg10[%c0_26, %c0_27], %33 {strides = array<i32>} : memref<8x128xf32, #tpu.memory_space<vmem>>, vector<8x128xf32>,
    return
  }
  func.func @transform_0(%arg0: i32) -> (i32, i32) {
    %c0_i32 = arith.constant 0 : i32
    %c0_i32_0 = arith.constant 0 : i32
    return %arg0, %c0_i32 : i32, i32
  }
  func.func @transform_1(%arg0: i32) -> (i32, i32) {
    %c0_i32 = arith.constant 0 : i32
    %c0_i32_0 = arith.constant 0 : i32
    %c0_i32_1 = arith.constant 0 : i32
    return %c0_i32, %c0_i32_0 : i32, i32
  }
  func.func @transform_2(%arg0: i32) -> (i32, i32) {
    %c0_i32 = arith.constant 0 : i32
    %c0_i32_0 = arith.constant 0 : i32
    %c0_i32_1 = arith.constant 0 : i32
    return %c0_i32, %c0_i32_0 : i32, i32
  }
  func.func @transform_3(%arg0: i32) -> (i32, i32) {
    %c0_i32 = arith.constant 0 : i32
    %c0_i32_0 = arith.constant 0 : i32
    %c0_i32_1 = arith.constant 0 : i32
    return %c0_i32, %c0_i32_0 : i32, i32
  }
  func.func @transform_4(%arg0: i32) -> (i32, i32) {
    %c0_i32 = arith.constant 0 : i32
    %c0_i32_0 = arith.constant 0 : i32
    %c0_i32_1 = arith.constant 0 : i32
    return %c0_i32, %c0_i32_0 : i32, i32
  }
  func.func @transform_5(%arg0: i32) -> (i32, i32) {
    %c0_i32 = arith.constant 0 : i32
    %c0_i32_0 = arith.constant 0 : i32
    %c0_i32_1 = arith.constant 0 : i32
    return %c0_i32, %c0_i32_0 : i32, i32
  }
  func.func @transform_6(%arg0: i32) -> (i32, i32) {
    %c0_i32 = arith.constant 0 : i32
    %c0_i32_0 = arith.constant 0 : i32
    %c0_i32_1 = arith.constant 0 : i32
    return %c0_i32, %c0_i32_0 : i32, i32
  }
  func.func @transform_7(%arg0: i32) -> (i32, i32) {
    %c0_i32 = arith.constant 0 : i32
    %c0_i32_0 = arith.constant 0 : i32
    %c0_i32_1 = arith.constant 0 : i32
    return %c0_i32, %c0_i32_0 : i32, i32
  }
  func.func @transform_8(%arg0: i32) -> (i32, i32) {
    %c0_i32 = arith.constant 0 : i32
    %c0_i32_0 = arith.constant 0 : i32
    %c0_i32_1 = arith.constant 0 : i32
    return %c0_i32, %c0_i32_0 : i32, i32
  }
  func.func @transform_9(%arg0: i32) -> (i32, i32) {
    %c0_i32 = arith.constant 0 : i32
    %c0_i32_0 = arith.constant 0 : i32
    return %arg0, %c0_i32 : i32, i32
  }
}

</mosaic_0001>

<bundles_post_ra>
// kernel: qsar_mlp_forward.1
= control target key start
LH: loop header
LB: loop body
LE: loop exit
PB: predicated region body
PF: predicated region fallthrough
CT: control target
= control target key end

     0   :  { %vm3133_vm0 = vcmask 1043456   ;;  %vm5333_vm1 = vmmov 1   ;;  %vm5335_vm3 = vmmov 0   ;;  %vm3129_vm4 = vcmask 97280   ;;  %s9553_s1 = inlined_call_operand.vmem [shape: f32[2048,524], index: 1, kind: input, shape index: {}]   ;;  %s9554_s0 = inlined_call_operand.vmem [shape: f32[8,2048], index: 0, kind: input, shape index: {}]   ;;  %s9555_s3 = inlined_call_operand.vmem [shape: f32[524,10], index: 3, kind: input, shape index: {}]   ;;  %s9556_s2 = inlined_call_operand.vmem [shape: f32[1,524], index: 2, kind: input, shape index: {}]   ;;  %s9557_s4 = inlined_call_operand.vmem [shape: f32[1,10], index: 4, kind: input, shape index: {}]   ;;  %s9558_s5 = inlined_call_operand.vmem [shape: f32[10,10], index: 5, kind: input, shape index: {}]   ;;  %s9559_s7 = inlined_call_operand.vmem [shape: f32[10,128], index: 7, kind: input, shape index: {}]   ;;  %s9560_s6 = inlined_call_operand.vmem [shape: f32[1,10], index: 6, kind: input, shape index: {}]   ;;  %s9561_s8 = inlined_call_operand.vmem [shape: f32[1,128], index: 8, kind: input, shape index: {}]   ;;  %s9562_s9 = inlined_call_operand.vmem [shape: f32[8,128], index: 9, kind: output, shape index: {}]  }
   0x1   :  { %v49_v0 = vld [vmem:[%s9553_s1 + $0x8] sm:$0xff]  ;;  %v54_v1 = vld [vmem:[%s9553_s1 + $0x30] sm:$0xff]  ;;  %v51_v2 = vld [vmem:[%s9553_s1 + $0x18] sm:$0xff]  ;;  %vm3361_vm5 = vcmask 1041408   ;;  %vm3357_vm7 = vcmask 80896  }
   0x2   :  { %v3921_v3 = vpack.c.bf16 %v54_v1, %v49_v0  ;;  %v56_v4 = vld [vmem:[%s9553_s1 + $0x40] sm:$0xff]  ;;  %v53_v6 = vld [vmem:[%s9553_s1 + $0x28] sm:$0xff]  ;;  %v50_v9 = vld [vmem:[%s9553_s1 + $0x10] sm:$0xff] }
   0x3   :  { %v48_v5 = vld [vmem:[%s9553_s1] sm:$0xff]  ;;  %v4433_v7 = vpack.c.bf16 %v56_v4, %v51_v2  ;;  %v55_v10 = vld [vmem:[%s9553_s1 + $0x38] sm:$0xff]  ;;  %v61_v14 = vld [vmem:[%s9553_s1 + $0x68] sm:$0xff] }
   0x4   :  { %v3923_v8 = vpack.c.bf16 %v53_v6, %v48_v5  ;;  %v59_v11 = vld [vmem:[%s9553_s1 + $0x58] sm:$0xff]  ;;  %3922 = vmatprep.subr.bf16.mxu0 %v3921_v3  ;;  %v4435_v12 = vpack.c.bf16 %v55_v10, %v50_v9  ;;  %v64_v13 = vld [vmem:[%s9553_s1 + $0x80] sm:$0xff]  ;;  %v66_v15 = vld [vmem:[%s9553_s1 + $0x90] sm:$0xff] }
   0x5   :  { %4434 = vmatprep.subr.bf16.mxu1 %v4433_v7  ;;  %v3925_v16 = vpack.c.bf16 %v64_v13, %v59_v11  ;;  %v4437_v17 = vpack.c.bf16 %v66_v15, %v61_v14  ;;  %v58_v18 = vld [vmem:[%s9553_s1 + $0x50] sm:$0xff]  ;;  %v63_v19 = vld [vmem:[%s9553_s1 + $0x78] sm:$0xff]  ;;  %v60_v20 = vld [vmem:[%s9553_s1 + $0x60] sm:$0xff] }
   0x6   :  { %3924 = vmatpush1.bf16.msra.mxu0 %v3923_v8  ;;  %4436 = vmatpush1.bf16.msra.mxu1 %v4435_v12  ;;  %v3927_v21 = vpack.c.bf16 %v63_v19, %v58_v18  ;;  %v65_v22 = vld [vmem:[%s9553_s1 + $0x88] sm:$0xff]  ;;  %v74_v24 = vld [vmem:[%s9553_s1 + $0xd0] sm:$0xff]  ;;  %v71_v27 = vld [vmem:[%s9553_s1 + $0xb8] sm:$0xff] }
   0x7   :  { %v69_v23 = vld [vmem:[%s9553_s1 + $0xa8] sm:$0xff]  ;;  %3926 = vmatprep.subr.bf16.mxu0 %v3925_v16  ;;  %4438 = vmatprep.subr.bf16.mxu1 %v4437_v17  ;;  %v4439_v25 = vpack.c.bf16 %v65_v22, %v60_v20  ;;  %v76_v28 = vld [vmem:[%s9553_s1 + $0xe0] sm:$0xff]  ;;  %v70_v32 = vld [vmem:[%s9553_s1 + $0xb0] sm:$0xff] }
   0x8   :  { %v3929_v26 = vpack.c.bf16 %v74_v24, %v69_v23  ;;  %v68_v29 = vld [vmem:[%s9553_s1 + $0xa0] sm:$0xff]  ;;  %v4441_v30 = vpack.c.bf16 %v76_v28, %v71_v27  ;;  %v73_v31 = vld [vmem:[%s9553_s1 + $0xc8] sm:$0xff]  ;;  %v75_v33 = vld [vmem:[%s9553_s1 + $0xd8] sm:$0xff] }
   0x9   :  { %v3931_v34 = vpack.c.bf16 %v73_v31, %v68_v29  ;;  %v79_v35 = vld [vmem:[%s9553_s1 + $0xf8] sm:$0xff]  ;;  %v84_v36 = vld [vmem:[%s9553_s1 + $0x120] sm:$0xff]  ;;  %v81_v37 = vld [vmem:[%s9553_s1 + $0x108] sm:$0xff]  ;;  %v4443_v38 = vpack.c.bf16 %v75_v33, %v70_v32 }
   0xa   :  { %3928 = vmatpush1.bf16.msra.mxu0 %v3927_v21  ;;  %4440 = vmatpush1.bf16.msra.mxu1 %v4439_v25  ;;  %v3933_v39 = vpack.c.bf16 %v84_v36, %v79_v35  ;;  %v86_v40 = vld [vmem:[%s9553_s1 + $0x130] sm:$0xff]  ;;  %v83_v42 = vld [vmem:[%s9553_s1 + $0x118] sm:$0xff]  ;;  %v80_v44 = vld [vmem:[%s9553_s1 + $0x100] sm:$0xff] }
   0xb   :  { %3930 = vmatprep.subr.bf16.mxu0 %v3929_v26  ;;  %v78_v41 = vld [vmem:[%s9553_s1 + $0xf0] sm:$0xff]  ;;  %4442 = vmatprep.subr.bf16.mxu1 %v4441_v30  ;;  %v4445_v43 = vpack.c.bf16 %v86_v40, %v81_v37  ;;  %v85_v45 = vld [vmem:[%s9553_s1 + $0x128] sm:$0xff]  ;;  %v91_v48 = vld [vmem:[%s9553_s1 + $0x158] sm:$0xff] }
   0xc   :  { %v89_v46 = vld [vmem:[%s9553_s1 + $0x148] sm:$0xff]  ;;  %v94_v47 = vld [vmem:[%s9553_s1 + $0x170] sm:$0xff]  ;;  %v96_v49 = vld [vmem:[%s9553_s1 + $0x180] sm:$0xff]  ;;  %v3935_v50 = vpack.c.bf16 %v83_v42, %v78_v41  ;;  %v4447_v51 = vpack.c.bf16 %v85_v45, %v80_v44 }
   0xd   :  { %v3937_v52 = vpack.c.bf16 %v94_v47, %v89_v46  ;;  %v88_v53 = vld [vmem:[%s9553_s1 + $0x140] sm:$0xff]  ;;  %v93_v54 = vld [vmem:[%s9553_s1 + $0x168] sm:$0xff]  ;;  %v90_v55 = vld [vmem:[%s9553_s1 + $0x150] sm:$0xff]  ;;  %v4449_v56 = vpack.c.bf16 %v96_v49, %v91_v48 }
   0xe   :  { %3932 = vmatpush1.bf16.msra.mxu0 %v3931_v34  ;;  %4444 = vmatpush1.bf16.msra.mxu1 %v4443_v38  ;;  %v95_v57 = vld [vmem:[%s9553_s1 + $0x178] sm:$0xff]  ;;  %v104_v59 = vld [vmem:[%s9553_s1 + $0x1c0] sm:$0xff]  ;;  %v101_v60 = vld [vmem:[%s9553_s1 + $0x1a8] sm:$0xff]  ;;  %v3939_v62 = vpack.c.bf16 %v93_v54, %v88_v53 }
   0xf   :  { %3934 = vmatprep.subr.bf16.mxu0 %v3933_v39  ;;  %4446 = vmatprep.subr.bf16.mxu1 %v4445_v43  ;;  %v99_v58 = vld [vmem:[%s9553_s1 + $0x198] sm:$0xff]  ;;  %v106_v61 = vld [vmem:[%s9553_s1 + $0x1d0] sm:$0xff]  ;;  %v4451_v63 = vpack.c.bf16 %v95_v57, %v90_v55  ;;  %v100_v3 = vld [vmem:[%s9553_s1 + $0x1a0] sm:$0xff] }
  0x10   :  { %v3941_v0 = vpack.c.bf16 %v104_v59, %v99_v58  ;;  %v98_v1 = vld [vmem:[%s9553_s1 + $0x190] sm:$0xff]  ;;  %v103_v2 = vld [vmem:[%s9553_s1 + $0x1b8] sm:$0xff]  ;;  %v4453_v4 = vpack.c.bf16 %v106_v61, %v101_v60  ;;  %v105_v5 = vld [vmem:[%s9553_s1 + $0x1c8] sm:$0xff] }
  0x11   :  { %v109_v6 = vld [vmem:[%s9553_s1 + $0x1e8] sm:$0xff]  ;;  %v114_v7 = vld [vmem:[%s9553_s1 + $0x210] sm:$0xff]  ;;  %v111_v8 = vld [vmem:[%s9553_s1 + $0x1f8] sm:$0xff]  ;;  %v3943_v10 = vpack.c.bf16 %v103_v2, %v98_v1  ;;  %v4455_v11 = vpack.c.bf16 %v105_v5, %v100_v3 }
  0x12   :  { %3936 = vmatpush1.bf16.msra.mxu0 %v3935_v50  ;;  %4448 = vmatpush1.bf16.msra.mxu1 %v4447_v51  ;;  %v116_v9 = vld [vmem:[%s9553_s1 + $0x220] sm:$0xff]  ;;  %v3945_v12 = vpack.c.bf16 %v114_v7, %v109_v6  ;;  %v113_v14 = vld [vmem:[%s9553_s1 + $0x208] sm:$0xff]  ;;  %v110_v15 = vld [vmem:[%s9553_s1 + $0x1f0] sm:$0xff] }
  0x13   :  { %3938 = vmatprep.subr.bf16.mxu0 %v3937_v52  ;;  %4450 = vmatprep.subr.bf16.mxu1 %v4449_v56  ;;  %v108_v13 = vld [vmem:[%s9553_s1 + $0x1e0] sm:$0xff]  ;;  %v4457_v16 = vpack.c.bf16 %v116_v9, %v111_v8  ;;  %v115_v17 = vld [vmem:[%s9553_s1 + $0x218] sm:$0xff]  ;;  %v121_v20 = vld [vmem:[%s9553_s1 + $0x248] sm:$0xff] }
  0x14   :  { %v119_v18 = vld [vmem:[%s9553_s1 + $0x238] sm:$0xff]  ;;  %v124_v19 = vld [vmem:[%s9553_s1 + $0x260] sm:$0xff]  ;;  %v126_v21 = vld [vmem:[%s9553_s1 + $0x270] sm:$0xff]  ;;  %v3947_v22 = vpack.c.bf16 %v113_v14, %v108_v13  ;;  %v4459_v23 = vpack.c.bf16 %v115_v17, %v110_v15 }
  0x15   :  { %v3949_v24 = vpack.c.bf16 %v124_v19, %v119_v18  ;;  %v118_v25 = vld [vmem:[%s9553_s1 + $0x230] sm:$0xff]  ;;  %v123_v26 = vld [vmem:[%s9553_s1 + $0x258] sm:$0xff]  ;;  %v120_v27 = vld [vmem:[%s9553_s1 + $0x240] sm:$0xff]  ;;  %v4461_v28 = vpack.c.bf16 %v126_v21, %v121_v20 }
  0x16   :  { %3940 = vmatpush1.bf16.msra.mxu0 %v3939_v62  ;;  %4452 = vmatpush1.bf16.msra.mxu1 %v4451_v63  ;;  %v125_v29 = vld [vmem:[%s9553_s1 + $0x268] sm:$0xff]  ;;  %v134_v31 = vld [vmem:[%s9553_s1 + $0x2b0] sm:$0xff]  ;;  %v131_v32 = vld [vmem:[%s9553_s1 + $0x298] sm:$0xff]  ;;  %v3951_v34 = vpack.c.bf16 %v123_v26, %v118_v25 }
  0x17   :  { %3942 = vmatprep.subr.bf16.mxu0 %v3941_v0  ;;  %4454 = vmatprep.subr.bf16.mxu1 %v4453_v4  ;;  %v129_v30 = vld [vmem:[%s9553_s1 + $0x288] sm:$0xff]  ;;  %v136_v33 = vld [vmem:[%s9553_s1 + $0x2c0] sm:$0xff]  ;;  %v4463_v35 = vpack.c.bf16 %v125_v29, %v120_v27  ;;  %v130_v39 = vld [vmem:[%s9553_s1 + $0x290] sm:$0xff] }
  0x18   :  { %v3953_v36 = vpack.c.bf16 %v134_v31, %v129_v30  ;;  %v128_v37 = vld [vmem:[%s9553_s1 + $0x280] sm:$0xff]  ;;  %v133_v38 = vld [vmem:[%s9553_s1 + $0x2a8] sm:$0xff]  ;;  %v4465_v40 = vpack.c.bf16 %v136_v33, %v131_v32  ;;  %v135_v41 = vld [vmem:[%s9553_s1 + $0x2b8] sm:$0xff] }
  0x19   :  { %v139_v42 = vld [vmem:[%s9553_s1 + $0x2d8] sm:$0xff]  ;;  %v144_v43 = vld [vmem:[%s9553_s1 + $0x300] sm:$0xff]  ;;  %v141_v44 = vld [vmem:[%s9553_s1 + $0x2e8] sm:$0xff]  ;;  %v3955_v46 = vpack.c.bf16 %v133_v38, %v128_v37  ;;  %v4467_v47 = vpack.c.bf16 %v135_v41, %v130_v39 }
  0x1a   :  { %3944 = vmatpush1.bf16.msra.mxu0 %v3943_v10  ;;  %4456 = vmatpush1.bf16.msra.mxu1 %v4455_v11  ;;  %v146_v45 = vld [vmem:[%s9553_s1 + $0x310] sm:$0xff]  ;;  %v3957_v48 = vpack.c.bf16 %v144_v43, %v139_v42  ;;  %v143_v50 = vld [vmem:[%s9553_s1 + $0x2f8] sm:$0xff]  ;;  %v140_v51 = vld [vmem:[%s9553_s1 + $0x2e0] sm:$0xff] }
  0x1b   :  { %3946 = vmatprep.subr.bf16.mxu0 %v3945_v12  ;;  %4458 = vmatprep.subr.bf16.mxu1 %v4457_v16  ;;  %v138_v49 = vld [vmem:[%s9553_s1 + $0x2d0] sm:$0xff]  ;;  %v4469_v52 = vpack.c.bf16 %v146_v45, %v141_v44  ;;  %v145_v53 = vld [vmem:[%s9553_s1 + $0x308] sm:$0xff]  ;;  %v151_v56 = vld [vmem:[%s9553_s1 + $0x338] sm:$0xff] }
  0x1c   :  { %v149_v54 = vld [vmem:[%s9553_s1 + $0x328] sm:$0xff]  ;;  %v154_v55 = vld [vmem:[%s9553_s1 + $0x350] sm:$0xff]  ;;  %v156_v57 = vld [vmem:[%s9553_s1 + $0x360] sm:$0xff]  ;;  %v3959_v58 = vpack.c.bf16 %v143_v50, %v138_v49  ;;  %v4471_v59 = vpack.c.bf16 %v145_v53, %v140_v51 }
  0x1d   :  { %v3961_v60 = vpack.c.bf16 %v154_v55, %v149_v54  ;;  %v148_v61 = vld [vmem:[%s9553_s1 + $0x320] sm:$0xff]  ;;  %v153_v62 = vld [vmem:[%s9553_s1 + $0x348] sm:$0xff]  ;;  %v150_v63 = vld [vmem:[%s9553_s1 + $0x330] sm:$0xff]  ;;  %v4473_v0 = vpack.c.bf16 %v156_v57, %v151_v56 }
  0x1e   :  { %3948 = vmatpush1.bf16.msra.mxu0 %v3947_v22  ;;  %4460 = vmatpush1.bf16.msra.mxu1 %v4459_v23  ;;  %v155_v1 = vld [vmem:[%s9553_s1 + $0x358] sm:$0xff]  ;;  %v164_v3 = vld [vmem:[%s9553_s1 + $0x3a0] sm:$0xff]  ;;  %v161_v4 = vld [vmem:[%s9553_s1 + $0x388] sm:$0xff]  ;;  %v3963_v6 = vpack.c.bf16 %v153_v62, %v148_v61 }
  0x1f   :  { %3950 = vmatprep.subr.bf16.mxu0 %v3949_v24  ;;  %4462 = vmatprep.subr.bf16.mxu1 %v4461_v28  ;;  %v159_v2 = vld [vmem:[%s9553_s1 + $0x378] sm:$0xff]  ;;  %v166_v5 = vld [vmem:[%s9553_s1 + $0x3b0] sm:$0xff]  ;;  %v4475_v8 = vpack.c.bf16 %v155_v1, %v150_v63  ;;  %v160_v11 = vld [vmem:[%s9553_s1 + $0x380] sm:$0xff] }
  0x20   :  { %v158_v7 = vld [vmem:[%s9553_s1 + $0x370] sm:$0xff]  ;;  %v3965_v9 = vpack.c.bf16 %v164_v3, %v159_v2  ;;  %v163_v10 = vld [vmem:[%s9553_s1 + $0x398] sm:$0xff]  ;;  %v165_v12 = vld [vmem:[%s9553_s1 + $0x3a8] sm:$0xff]  ;;  %v4477_v13 = vpack.c.bf16 %v166_v5, %v161_v4 }
  0x21   :  { %v169_v14 = vld [vmem:[%s9553_s1 + $0x3c8] sm:$0xff]  ;;  %v174_v15 = vld [vmem:[%s9553_s1 + $0x3f0] sm:$0xff]  ;;  %v171_v17 = vld [vmem:[%s9553_s1 + $0x3d8] sm:$0xff]  ;;  %v3967_v19 = vpack.c.bf16 %v163_v10, %v158_v7  ;;  %v4479_v20 = vpack.c.bf16 %v165_v12, %v160_v11 }
  0x22   :  { %3952 = vmatpush1.bf16.msra.mxu0 %v3951_v34  ;;  %4464 = vmatpush1.bf16.msra.mxu1 %v4463_v35  ;;  %v33_v16 = vld [vmem:[%s9554_s0 + $0x8] sm:$0xff]  ;;  %v176_v18 = vld [vmem:[%s9553_s1 + $0x400] sm:$0xff]  ;;  %v3969_v21 = vpack.c.bf16 %v174_v15, %v169_v14  ;;  %v170_v24 = vld [vmem:[%s9553_s1 + $0x3d0] sm:$0xff] }
  0x23   :  { %3954 = vmatprep.subr.bf16.mxu0 %v3953_v36  ;;  %4466 = vmatprep.subr.bf16.mxu1 %v4465_v40  ;;  %v168_v22 = vld [vmem:[%s9553_s1 + $0x3c0] sm:$0xff]  ;;  %v173_v23 = vld [vmem:[%s9553_s1 + $0x3e8] sm:$0xff]  ;;  %v4481_v25 = vpack.c.bf16 %v176_v18, %v171_v17  ;;  %v175_v26 = vld [vmem:[%s9553_s1 + $0x3f8] sm:$0xff] }
  0x24   :  { %1419 = vmatprep.mubr.f32.mxu0 %v33_v16  ;;  %1987 = vmatprep.mubr.f32.mxu1 %v33_v16  ;;  %v179_v27 = vld [vmem:[%s9553_s1 + $0x418] sm:$0xff]  ;;  %v184_v28 = vld [vmem:[%s9553_s1 + $0x440] sm:$0xff]  ;;  %v181_v29 = vld [vmem:[%s9553_s1 + $0x428] sm:$0xff]  ;;  %v3971_v31 = vpack.c.bf16 %v173_v23, %v168_v22  ;;  %v4483_v32 = vpack.c.bf16 %v175_v26, %v170_v24 }
  0x25   :  { %v186_v30 = vld [vmem:[%s9553_s1 + $0x450] sm:$0xff]  ;;  %v3973_v33 = vpack.c.bf16 %v184_v28, %v179_v27  ;;  %v183_v35 = vld [vmem:[%s9553_s1 + $0x438] sm:$0xff]  ;;  %v180_v36 = vld [vmem:[%s9553_s1 + $0x420] sm:$0xff] }
  0x26   :  { %3956 = vmatpush1.bf16.msra.mxu0 %v3955_v46  ;;  %4468 = vmatpush1.bf16.msra.mxu1 %v4467_v47  ;;  %v178_v34 = vld [vmem:[%s9553_s1 + $0x410] sm:$0xff]  ;;  %v4485_v37 = vpack.c.bf16 %v186_v30, %v181_v29  ;;  %v185_v38 = vld [vmem:[%s9553_s1 + $0x448] sm:$0xff]  ;;  %v191_v41 = vld [vmem:[%s9553_s1 + $0x478] sm:$0xff] }
  0x27   :  { %3958 = vmatprep.subr.bf16.mxu0 %v3957_v48  ;;  %4470 = vmatprep.subr.bf16.mxu1 %v4469_v52  ;;  %v189_v39 = vld [vmem:[%s9553_s1 + $0x468] sm:$0xff]  ;;  %v194_v40 = vld [vmem:[%s9553_s1 + $0x490] sm:$0xff]  ;;  %v196_v42 = vld [vmem:[%s9553_s1 + $0x4a0] sm:$0xff]  ;;  %v3975_v43 = vpack.c.bf16 %v183_v35, %v178_v34  ;;  %v4487_v44 = vpack.c.bf16 %v185_v38, %v180_v36 }
  0x28   :  { %v3977_v45 = vpack.c.bf16 %v194_v40, %v189_v39  ;;  %v188_v46 = vld [vmem:[%s9553_s1 + $0x460] sm:$0xff]  ;;  %v193_v47 = vld [vmem:[%s9553_s1 + $0x488] sm:$0xff]  ;;  %v190_v48 = vld [vmem:[%s9553_s1 + $0x470] sm:$0xff]  ;;  %v4489_v49 = vpack.c.bf16 %v196_v42, %v191_v41 }
  0x29   :  { %v195_v50 = vld [vmem:[%s9553_s1 + $0x498] sm:$0xff]  ;;  %v204_v52 = vld [vmem:[%s9553_s1 + $0x4e0] sm:$0xff]  ;;  %v201_v53 = vld [vmem:[%s9553_s1 + $0x4c8] sm:$0xff]  ;;  %v3979_v55 = vpack.c.bf16 %v193_v47, %v188_v46 }
  0x2a   :  { %3960 = vmatpush1.bf16.msra.mxu0 %v3959_v58  ;;  %4472 = vmatpush1.bf16.msra.mxu1 %v4471_v59  ;;  %v199_v51 = vld [vmem:[%s9553_s1 + $0x4b8] sm:$0xff]  ;;  %v206_v54 = vld [vmem:[%s9553_s1 + $0x4f0] sm:$0xff]  ;;  %v4491_v56 = vpack.c.bf16 %v195_v50, %v190_v48  ;;  %v205_v62 = vld [vmem:[%s9553_s1 + $0x4e8] sm:$0xff] }
  0x2b   :  { %3962 = vmatprep.subr.bf16.mxu0 %v3961_v60  ;;  %4474 = vmatprep.subr.bf16.mxu1 %v4473_v0  ;;  %v3981_v57 = vpack.c.bf16 %v204_v52, %v199_v51  ;;  %v198_v58 = vld [vmem:[%s9553_s1 + $0x4b0] sm:$0xff]  ;;  %v203_v59 = vld [vmem:[%s9553_s1 + $0x4d8] sm:$0xff]  ;;  %v200_v60 = vld [vmem:[%s9553_s1 + $0x4c0] sm:$0xff]  ;;  %v4493_v61 = vpack.c.bf16 %v206_v54, %v201_v53 }
  0x2c   :  { %v209_v63 = vld [vmem:[%s9553_s1 + $0x508] sm:$0xff]  ;;  %v214_v0 = vld [vmem:[%s9553_s1 + $0x530] sm:$0xff]  ;;  %v211_v1 = vld [vmem:[%s9553_s1 + $0x518] sm:$0xff]  ;;  %v3983_v3 = vpack.c.bf16 %v203_v59, %v198_v58  ;;  %v4495_v4 = vpack.c.bf16 %v205_v62, %v200_v60 }
  0x2d   :  { %v216_v2 = vld [vmem:[%s9553_s1 + $0x540] sm:$0xff]  ;;  %v3985_v5 = vpack.c.bf16 %v214_v0, %v209_v63  ;;  %v213_v7 = vld [vmem:[%s9553_s1 + $0x528] sm:$0xff]  ;;  %v215_v10 = vld [vmem:[%s9553_s1 + $0x538] sm:$0xff] }
  0x2e   :  { %3964 = vmatpush1.bf16.msra.mxu0 %v3963_v6  ;;  %4476 = vmatpush1.bf16.msra.mxu1 %v4475_v8  ;;  %v208_v6 = vld [vmem:[%s9553_s1 + $0x500] sm:$0xff]  ;;  %v210_v8 = vld [vmem:[%s9553_s1 + $0x510] sm:$0xff]  ;;  %v219_v11 = vld [vmem:[%s9553_s1 + $0x558] sm:$0xff] }
  0x2f   :  { %3966 = vmatprep.subr.bf16.mxu0 %v3965_v9  ;;  %4478 = vmatprep.subr.bf16.mxu1 %v4477_v13  ;;  %v4497_v9 = vpack.c.bf16 %v216_v2, %v211_v1  ;;  %v224_v12 = vld [vmem:[%s9553_s1 + $0x580] sm:$0xff]  ;;  %v221_v13 = vld [vmem:[%s9553_s1 + $0x568] sm:$0xff]  ;;  %v226_v14 = vld [vmem:[%s9553_s1 + $0x590] sm:$0xff]  ;;  %v3987_v16 = vpack.c.bf16 %v213_v7, %v208_v6  ;;  %v4499_v17 = vpack.c.bf16 %v215_v10, %v210_v8 }
  0x30   :  { %v32_v15 = vld [vmem:[%s9554_s0] sm:$0xff]  ;;  %v3989_v18 = vpack.c.bf16 %v224_v12, %v219_v11  ;;  %v4501_v22 = vpack.c.bf16 %v226_v14, %v221_v13  ;;  %v225_v23 = vld [vmem:[%s9553_s1 + $0x588] sm:$0xff]  ;;  %v231_v26 = vld [vmem:[%s9553_s1 + $0x5b8] sm:$0xff] }
  0x31   :  { %v229_v24 = vld [vmem:[%s9553_s1 + $0x5a8] sm:$0xff]  ;;  %v236_v27 = vld [vmem:[%s9553_s1 + $0x5e0] sm:$0xff]  ;;  %v235_v35 = vld [vmem:[%s9553_s1 + $0x5d8] sm:$0xff] }
  0x32   :  { %3968 = vmatpush1.bf16.msra.mxu0 %v3967_v19  ;;  %4480 = vmatpush1.bf16.msra.mxu1 %v4479_v20  ;;  %v218_v19 = vld [vmem:[%s9553_s1 + $0x550] sm:$0xff]  ;;  %v223_v20 = vld [vmem:[%s9553_s1 + $0x578] sm:$0xff]  ;;  %v4505_v34 = vpack.c.bf16 %v236_v27, %v231_v26  ;;  %v241_v38 = vld [vmem:[%s9553_s1 + $0x608] sm:$0xff] }
  0x33   :  { %3970 = vmatprep.subr.bf16.mxu0 %v3969_v21  ;;  %4482 = vmatprep.subr.bf16.mxu1 %v4481_v25  ;;  %v220_v21 = vld [vmem:[%s9553_s1 + $0x560] sm:$0xff]  ;;  %v234_v25 = vld [vmem:[%s9553_s1 + $0x5d0] sm:$0xff]  ;;  %v3991_v28 = vpack.c.bf16 %v223_v20, %v218_v19  ;;  %v239_v36 = vld [vmem:[%s9553_s1 + $0x5f8] sm:$0xff] }
  0x34   :  { %v4503_v29 = vpack.c.bf16 %v225_v23, %v220_v21  ;;  %v3993_v30 = vpack.c.bf16 %v234_v25, %v229_v24  ;;  %v246_v39 = vld [vmem:[%s9553_s1 + $0x630] sm:$0xff]  ;;  %v245_v47 = vld [vmem:[%s9553_s1 + $0x628] sm:$0xff]  ;;  %v251_v50 = vld [vmem:[%s9553_s1 + $0x658] sm:$0xff] }
  0x35   :  { %v4509_v46 = vpack.c.bf16 %v246_v39, %v241_v38  ;;  %v249_v48 = vld [vmem:[%s9553_s1 + $0x648] sm:$0xff]  ;;  %v256_v51 = vld [vmem:[%s9553_s1 + $0x680] sm:$0xff]  ;;  %v255_v59 = vld [vmem:[%s9553_s1 + $0x678] sm:$0xff] }
  0x36   :  { %3972 = vmatpush1.bf16.msra.mxu0 %v3971_v31  ;;  %4484 = vmatpush1.bf16.msra.mxu1 %v4483_v32  ;;  %v228_v31 = vld [vmem:[%s9553_s1 + $0x5a0] sm:$0xff]  ;;  %v233_v32 = vld [vmem:[%s9553_s1 + $0x5c8] sm:$0xff]  ;;  %v4513_v58 = vpack.c.bf16 %v256_v51, %v251_v50  ;;  %v259_v60 = vld [vmem:[%s9553_s1 + $0x698] sm:$0xff] }
  0x37   :  { %3974 = vmatprep.subr.bf16.mxu0 %v3973_v33  ;;  %4486 = vmatprep.subr.bf16.mxu1 %v4485_v37  ;;  %v230_v33 = vld [vmem:[%s9553_s1 + $0x5b0] sm:$0xff]  ;;  %v244_v37 = vld [vmem:[%s9553_s1 + $0x620] sm:$0xff]  ;;  %v3995_v40 = vpack.c.bf16 %v233_v32, %v228_v31  ;;  %v261_v62 = vld [vmem:[%s9553_s1 + $0x6a8] sm:$0xff] }
  0x38   :  { %v4507_v41 = vpack.c.bf16 %v235_v35, %v230_v33  ;;  %v3997_v42 = vpack.c.bf16 %v244_v37, %v239_v36  ;;  %v266_v63 = vld [vmem:[%s9553_s1 + $0x6d0] sm:$0xff]  ;;  %v265_v7 = vld [vmem:[%s9553_s1 + $0x6c8] sm:$0xff]  ;;  %v271_v10 = vld [vmem:[%s9553_s1 + $0x6f8] sm:$0xff] }
  0x39   :  { %v4517_v6 = vpack.c.bf16 %v266_v63, %v261_v62  ;;  %v269_v8 = vld [vmem:[%s9553_s1 + $0x6e8] sm:$0xff]  ;;  %v276_v11 = vld [vmem:[%s9553_s1 + $0x720] sm:$0xff]  ;;  %v279_v20 = vld [vmem:[%s9553_s1 + $0x738] sm:$0xff] }
  0x3a   :  { %3976 = vmatpush1.bf16.msra.mxu0 %v3975_v43  ;;  %4488 = vmatpush1.bf16.msra.mxu1 %v4487_v44  ;;  %v238_v43 = vld [vmem:[%s9553_s1 + $0x5f0] sm:$0xff]  ;;  %v243_v44 = vld [vmem:[%s9553_s1 + $0x618] sm:$0xff]  ;;  %v268_v13 = vld [vmem:[%s9553_s1 + $0x6e0] sm:$0xff]  ;;  %v4521_v19 = vpack.c.bf16 %v276_v11, %v271_v10 }
  0x3b   :  { %3978 = vmatprep.subr.bf16.mxu0 %v3977_v45  ;;  %4490 = vmatprep.subr.bf16.mxu1 %v4489_v49  ;;  %v240_v45 = vld [vmem:[%s9553_s1 + $0x600] sm:$0xff]  ;;  %v254_v49 = vld [vmem:[%s9553_s1 + $0x670] sm:$0xff]  ;;  %v3999_v52 = vpack.c.bf16 %v243_v44, %v238_v43  ;;  %v281_v23 = vld [vmem:[%s9553_s1 + $0x748] sm:$0xff] }
  0x3c   :  { %v4511_v53 = vpack.c.bf16 %v245_v47, %v240_v45  ;;  %v4001_v54 = vpack.c.bf16 %v254_v49, %v249_v48  ;;  %v284_v21 = vld [vmem:[%s9553_s1 + $0x760] sm:$0xff]  ;;  %v286_v24 = vld [vmem:[%s9553_s1 + $0x770] sm:$0xff]  ;;  %v285_v32 = vld [vmem:[%s9553_s1 + $0x768] sm:$0xff] }
  0x3d   :  { %v4013_v27 = vpack.c.bf16 %v284_v21, %v279_v20  ;;  %v4525_v31 = vpack.c.bf16 %v286_v24, %v281_v23  ;;  %v289_v33 = vld [vmem:[%s9553_s1 + $0x788] sm:$0xff]  ;;  %v291_v35 = vld [vmem:[%s9553_s1 + $0x798] sm:$0xff]  ;;  %v296_v36 = vld [vmem:[%s9553_s1 + $0x7c0] sm:$0xff] }
  0x3e   :  { %3980 = vmatpush1.bf16.msra.mxu0 %v3979_v55  ;;  %4492 = vmatpush1.bf16.msra.mxu1 %v4491_v56  ;;  %v248_v55 = vld [vmem:[%s9553_s1 + $0x640] sm:$0xff]  ;;  %v253_v56 = vld [vmem:[%s9553_s1 + $0x668] sm:$0xff]  ;;  %v4529_v43 = vpack.c.bf16 %v296_v36, %v291_v35  ;;  %v295_v44 = vld [vmem:[%s9553_s1 + $0x7b8] sm:$0xff] }
  0x3f   :  { %3982 = vmatprep.subr.bf16.mxu0 %v3981_v57  ;;  %4494 = vmatprep.subr.bf16.mxu1 %v4493_v61  ;;  %v250_v57 = vld [vmem:[%s9553_s1 + $0x650] sm:$0xff]  ;;  %v264_v61 = vld [vmem:[%s9553_s1 + $0x6c0] sm:$0xff]  ;;  %v4003_v0 = vpack.c.bf16 %v253_v56, %v248_v55  ;;  %v299_v45 = vld [vmem:[%s9553_s1 + $0x7d8] sm:$0xff] }
  0x40   :  { %v4515_v1 = vpack.c.bf16 %v255_v59, %v250_v57  ;;  %v4005_v2 = vpack.c.bf16 %v264_v61, %v259_v60  ;;  %v301_v47 = vld [vmem:[%s9553_s1 + $0x7e8] sm:$0xff]  ;;  %v306_v48 = vld [vmem:[%s9553_s1 + $0x810] sm:$0xff]  ;;  %v311_v59 = vld [vmem:[%s9553_s1 + $0x838] sm:$0xff] }
  0x41   :  { %v4533_v55 = vpack.c.bf16 %v306_v48, %v301_v47  ;;  %v305_v56 = vld [vmem:[%s9553_s1 + $0x808] sm:$0xff]  ;;  %v316_v60 = vld [vmem:[%s9553_s1 + $0x860] sm:$0xff]  ;;  %v338_v36 = vld [vmem:[%s9553_s1 + $0x910] sm:$0xff] }
  0x42   :  { %3984 = vmatpush1.bf16.msra.mxu0 %v3983_v3  ;;  %4496 = vmatpush1.bf16.msra.mxu1 %v4495_v4  ;;  %v258_v3 = vld [vmem:[%s9553_s1 + $0x690] sm:$0xff]  ;;  %v263_v4 = vld [vmem:[%s9553_s1 + $0x6b8] sm:$0xff]  ;;  %v309_v57 = vld [vmem:[%s9553_s1 + $0x828] sm:$0xff] }
  0x43   :  { %3986 = vmatprep.subr.bf16.mxu0 %v3985_v5  ;;  %4498 = vmatprep.subr.bf16.mxu1 %v4497_v9  ;;  %v260_v5 = vld [vmem:[%s9553_s1 + $0x6a0] sm:$0xff]  ;;  %v274_v9 = vld [vmem:[%s9553_s1 + $0x710] sm:$0xff]  ;;  %v4007_v12 = vpack.c.bf16 %v263_v4, %v258_v3  ;;  %v4537_v3 = vpack.c.bf16 %v316_v60, %v311_v59  ;;  %v315_v4 = vld [vmem:[%s9553_s1 + $0x858] sm:$0xff] }
  0x44   :  { %v4519_v14 = vpack.c.bf16 %v265_v7, %v260_v5  ;;  %v319_v5 = vld [vmem:[%s9553_s1 + $0x878] sm:$0xff]  ;;  %v321_v7 = vld [vmem:[%s9553_s1 + $0x888] sm:$0xff]  ;;  %v336_v20 = vld [vmem:[%s9553_s1 + $0x900] sm:$0xff] }
  0x45   :  { %1420 = vmatmul.mubr.f32.vlgmr.msra.gmra.mrb[0].mxu0 %v32_v15  ;;  %1988 = vmatmul.mubr.f32.vlgmr.msra.gmra.mrb[0].mxu1 %v32_v15  ;;  %v4009_v15 = vpack.c.bf16 %v274_v9, %v269_v8  ;;  %v326_v8 = vld [vmem:[%s9553_s1 + $0x8b0] sm:$0xff]  ;;  %v328_v24 = vld [vmem:[%s9553_s1 + $0x8c0] sm:$0xff]  ;;  %vm5267_vm2 = vmpackc.low %vm3133_vm0, %vm5333_vm1 }
  0x46   :  { %3988 = vmatpush1.bf16.msra.mxu0 %v3987_v16  ;;  %4500 = vmatpush1.bf16.msra.mxu1 %v4499_v17  ;;  %v273_v16 = vld [vmem:[%s9553_s1 + $0x708] sm:$0xff]  ;;  %v270_v17 = vld [vmem:[%s9553_s1 + $0x6f0] sm:$0xff]  ;;  %v348_v48 = vld [vmem:[%s9553_s1 + $0x960] sm:$0xff] }
  0x47   :  { %3990 = vmatprep.subr.bf16.mxu0 %v3989_v18  ;;  %4502 = vmatprep.subr.bf16.mxu1 %v4501_v22  ;;  %v275_v18 = vld [vmem:[%s9553_s1 + $0x718] sm:$0xff]  ;;  %v4011_v25 = vpack.c.bf16 %v273_v16, %v268_v13  ;;  %v325_v16 = vld [vmem:[%s9553_s1 + $0x8a8] sm:$0xff]  ;;  %v358_v60 = vld [vmem:[%s9553_s1 + $0x9b0] sm:$0xff] }
  0x48   :  { %v35_v22 = vld [vmem:[%s9554_s0 + $0x18] sm:$0xff]  ;;  %v4523_v26 = vpack.c.bf16 %v275_v18, %v270_v17  ;;  %v329_v17 = vld [vmem:[%s9553_s1 + $0x8c8] sm:$0xff]  ;;  %v334_v18 = vld [vmem:[%s9553_s1 + $0x8f0] sm:$0xff] }
  0x49   :  { %1490 = vmatprep.mubr.f32.mxu0 %v35_v22  ;;  %2058 = vmatprep.mubr.f32.mxu1 %v35_v22  ;;  %v323_v13 = vld [vmem:[%s9553_s1 + $0x898] sm:$0xff]  ;;  %v4033_v23 = vpack.c.bf16 %v334_v18, %v329_v17  ;;  %v34_v17 = vld [vmem:[%s9554_s0 + $0x10] sm:$0xff]  ;;  %vm5271_vm6 = vmpackc.low %vm3361_vm5, %vm5333_vm1 }
  0x4a   :  { %3992 = vmatpush1.bf16.msra.mxu0 %v3991_v28  ;;  %4504 = vmatpush1.bf16.msra.mxu1 %v4503_v29  ;;  %v278_v28 = vld [vmem:[%s9553_s1 + $0x730] sm:$0xff]  ;;  %v283_v29 = vld [vmem:[%s9553_s1 + $0x758] sm:$0xff] }
  0x4b   :  { %3994 = vmatprep.subr.bf16.mxu0 %v3993_v30  ;;  %4506 = vmatprep.subr.bf16.mxu1 %v4505_v34  ;;  %v280_v30 = vld [vmem:[%s9553_s1 + $0x740] sm:$0xff]  ;;  %v294_v34 = vld [vmem:[%s9553_s1 + $0x7b0] sm:$0xff]  ;;  %v4015_v37 = vpack.c.bf16 %v283_v29, %v278_v28  ;;  %v335_v28 = vld [vmem:[%s9553_s1 + $0x8f8] sm:$0xff] }
  0x4c   :  { %v4527_v38 = vpack.c.bf16 %v285_v32, %v280_v30  ;;  %v4017_v39 = vpack.c.bf16 %v294_v34, %v289_v33  ;;  %v339_v29 = vld [vmem:[%s9553_s1 + $0x918] sm:$0xff]  ;;  %v344_v30 = vld [vmem:[%s9553_s1 + $0x940] sm:$0xff]  ;;  %v346_v32 = vld [vmem:[%s9553_s1 + $0x950] sm:$0xff] }
  0x4d   :  { %v4037_v35 = vpack.c.bf16 %v344_v30, %v339_v29  ;;  %v396_v29 = vld [vmem:[%s9553_s1 + $0xae0] sm:$0xff]  ;;  %v37_v30 = vld [vmem:[%s9554_s0 + $0x28] sm:$0xff] }
  0x4e   :  { %3996 = vmatpush1.bf16.msra.mxu0 %v3995_v40  ;;  %4508 = vmatpush1.bf16.msra.mxu1 %v4507_v41  ;;  %v288_v40 = vld [vmem:[%s9553_s1 + $0x780] sm:$0xff]  ;;  %v293_v41 = vld [vmem:[%s9553_s1 + $0x7a8] sm:$0xff] }
  0x4f   :  { %3998 = vmatprep.subr.bf16.mxu0 %v3997_v42  ;;  %4510 = vmatprep.subr.bf16.mxu1 %v4509_v46  ;;  %v290_v42 = vld [vmem:[%s9553_s1 + $0x790] sm:$0xff]  ;;  %v304_v46 = vld [vmem:[%s9553_s1 + $0x800] sm:$0xff]  ;;  %v4019_v49 = vpack.c.bf16 %v293_v41, %v288_v40  ;;  %v345_v40 = vld [vmem:[%s9553_s1 + $0x948] sm:$0xff] }
  0x50   :  { %v4531_v50 = vpack.c.bf16 %v295_v44, %v290_v42  ;;  %v4021_v51 = vpack.c.bf16 %v304_v46, %v299_v45  ;;  %v349_v41 = vld [vmem:[%s9553_s1 + $0x968] sm:$0xff]  ;;  %v354_v42 = vld [vmem:[%s9553_s1 + $0x990] sm:$0xff]  ;;  %v356_v44 = vld [vmem:[%s9553_s1 + $0x9a0] sm:$0xff] }
  0x51   :  { %v4041_v47 = vpack.c.bf16 %v354_v42, %v349_v41  ;;  %v401_v41 = vld [vmem:[%s9553_s1 + $0xb08] sm:$0xff]  ;;  %v406_v42 = vld [vmem:[%s9553_s1 + $0xb30] sm:$0xff] }
  0x52   :  { %4000 = vmatpush1.bf16.msra.mxu0 %v3999_v52  ;;  %4512 = vmatpush1.bf16.msra.mxu1 %v4511_v53  ;;  %v298_v52 = vld [vmem:[%s9553_s1 + $0x7d0] sm:$0xff]  ;;  %v303_v53 = vld [vmem:[%s9553_s1 + $0x7f8] sm:$0xff] }
  0x53   :  { %4002 = vmatprep.subr.bf16.mxu0 %v4001_v54  ;;  %4514 = vmatprep.subr.bf16.mxu1 %v4513_v58  ;;  %v300_v54 = vld [vmem:[%s9553_s1 + $0x7e0] sm:$0xff]  ;;  %v314_v58 = vld [vmem:[%s9553_s1 + $0x850] sm:$0xff]  ;;  %v4023_v61 = vpack.c.bf16 %v303_v53, %v298_v52  ;;  %v355_v52 = vld [vmem:[%s9553_s1 + $0x998] sm:$0xff] }
  0x54   :  { %v4535_v62 = vpack.c.bf16 %v305_v56, %v300_v54  ;;  %v4025_v63 = vpack.c.bf16 %v314_v58, %v309_v57  ;;  %v359_v53 = vld [vmem:[%s9553_s1 + $0x9b8] sm:$0xff]  ;;  %v364_v54 = vld [vmem:[%s9553_s1 + $0x9e0] sm:$0xff]  ;;  %v366_v56 = vld [vmem:[%s9553_s1 + $0x9f0] sm:$0xff] }
  0x55   :  { %v4045_v59 = vpack.c.bf16 %v364_v54, %v359_v53  ;;  %v411_v53 = vld [vmem:[%s9553_s1 + $0xb58] sm:$0xff]  ;;  %v416_v54 = vld [vmem:[%s9553_s1 + $0xb80] sm:$0xff] }
  0x56   :  { %4004 = vmatpush1.bf16.msra.mxu0 %v4003_v0  ;;  %4516 = vmatpush1.bf16.msra.mxu1 %v4515_v1  ;;  %v308_v0 = vld [vmem:[%s9553_s1 + $0x820] sm:$0xff]  ;;  %v313_v1 = vld [vmem:[%s9553_s1 + $0x848] sm:$0xff] }
  0x57   :  { %4006 = vmatprep.subr.bf16.mxu0 %v4005_v2  ;;  %4518 = vmatprep.subr.bf16.mxu1 %v4517_v6  ;;  %v310_v2 = vld [vmem:[%s9553_s1 + $0x830] sm:$0xff]  ;;  %v324_v6 = vld [vmem:[%s9553_s1 + $0x8a0] sm:$0xff]  ;;  %v4027_v9 = vpack.c.bf16 %v313_v1, %v308_v0  ;;  %v365_v0 = vld [vmem:[%s9553_s1 + $0x9e8] sm:$0xff] }
  0x58   :  { %v4539_v10 = vpack.c.bf16 %v315_v4, %v310_v2  ;;  %v4029_v11 = vpack.c.bf16 %v324_v6, %v319_v5  ;;  %v369_v1 = vld [vmem:[%s9553_s1 + $0xa08] sm:$0xff]  ;;  %v374_v2 = vld [vmem:[%s9553_s1 + $0xa30] sm:$0xff]  ;;  %v376_v4 = vld [vmem:[%s9553_s1 + $0xa40] sm:$0xff] }
  0x5a   :  { %4008 = vmatpush1.bf16.msra.mxu0 %v4007_v12  ;;  %4520 = vmatpush1.bf16.msra.mxu1 %v4519_v14  ;;  %v318_v12 = vld [vmem:[%s9553_s1 + $0x870] sm:$0xff]  ;;  %v320_v14 = vld [vmem:[%s9553_s1 + $0x880] sm:$0xff] }
  0x5b   :  { %4010 = vmatprep.subr.bf16.mxu0 %v4009_v15  ;;  %4522 = vmatprep.subr.bf16.mxu1 %v4521_v19  ;;  %v4541_v15 = vpack.c.bf16 %v326_v8, %v321_v7  ;;  %v331_v19 = vld [vmem:[%s9553_s1 + $0x8d8] sm:$0xff]  ;;  %v4031_v21 = vpack.c.bf16 %v323_v13, %v318_v12  ;;  %v4543_v22 = vpack.c.bf16 %v325_v16, %v320_v14  ;;  %v368_v8 = vld [vmem:[%s9553_s1 + $0xa00] sm:$0xff]  ;;  %v386_v16 = vld [vmem:[%s9553_s1 + $0xa90] sm:$0xff] }
  0x5c   :  { %v4049_v7 = vpack.c.bf16 %v374_v2, %v369_v1  ;;  %v375_v12 = vld [vmem:[%s9553_s1 + $0xa38] sm:$0xff]  ;;  %v384_v14 = vld [vmem:[%s9553_s1 + $0xa80] sm:$0xff]  ;;  %v421_v1 = vld [vmem:[%s9553_s1 + $0xba8] sm:$0xff] }
  0x5d   :  { %v379_v13 = vld [vmem:[%s9553_s1 + $0xa58] sm:$0xff]  ;;  %v426_v2 = vld [vmem:[%s9553_s1 + $0xbd0] sm:$0xff] }
  0x5e   :  { %4012 = vmatpush1.bf16.msra.mxu0 %v4011_v25  ;;  %4524 = vmatpush1.bf16.msra.mxu1 %v4523_v26  ;;  %v333_v25 = vld [vmem:[%s9553_s1 + $0x8e8] sm:$0xff]  ;;  %v330_v26 = vld [vmem:[%s9553_s1 + $0x8d0] sm:$0xff] }
  0x5f   :  { %4014 = vmatprep.subr.bf16.mxu0 %v4013_v27  ;;  %4526 = vmatprep.subr.bf16.mxu1 %v4525_v31  ;;  %v4545_v27 = vpack.c.bf16 %v336_v20, %v331_v19  ;;  %v341_v31 = vld [vmem:[%s9553_s1 + $0x928] sm:$0xff]  ;;  %v4035_v33 = vpack.c.bf16 %v333_v25, %v328_v24  ;;  %v4547_v34 = vpack.c.bf16 %v335_v28, %v330_v26  ;;  %v391_v28 = vld [vmem:[%s9553_s1 + $0xab8] sm:$0xff] }
  0x60   :  { %v4053_v20 = vpack.c.bf16 %v384_v14, %v379_v13  ;;  %v385_v25 = vld [vmem:[%s9553_s1 + $0xa88] sm:$0xff]  ;;  %v431_v13 = vld [vmem:[%s9553_s1 + $0xbf8] sm:$0xff]  ;;  %v436_v14 = vld [vmem:[%s9553_s1 + $0xc20] sm:$0xff] }
  0x61   :  { %v389_v26 = vld [vmem:[%s9553_s1 + $0xaa8] sm:$0xff] }
  0x62   :  { %4016 = vmatpush1.bf16.msra.mxu0 %v4015_v37  ;;  %4528 = vmatpush1.bf16.msra.mxu1 %v4527_v38  ;;  %v343_v37 = vld [vmem:[%s9553_s1 + $0x938] sm:$0xff]  ;;  %v340_v38 = vld [vmem:[%s9553_s1 + $0x920] sm:$0xff] }
  0x63   :  { %4018 = vmatprep.subr.bf16.mxu0 %v4017_v39  ;;  %4530 = vmatprep.subr.bf16.mxu1 %v4529_v43  ;;  %v4549_v39 = vpack.c.bf16 %v346_v32, %v341_v31  ;;  %v351_v43 = vld [vmem:[%s9553_s1 + $0x978] sm:$0xff]  ;;  %v4039_v45 = vpack.c.bf16 %v343_v37, %v338_v36  ;;  %v4551_v46 = vpack.c.bf16 %v345_v40, %v340_v38  ;;  %v390_v36 = vld [vmem:[%s9553_s1 + $0xab0] sm:$0xff]  ;;  %v404_v40 = vld [vmem:[%s9553_s1 + $0xb20] sm:$0xff] }
  0x64   :  { %v4569_v37 = vpack.c.bf16 %v396_v29, %v391_v28  ;;  %v395_v38 = vld [vmem:[%s9553_s1 + $0xad8] sm:$0xff] }
  0x66   :  { %4020 = vmatpush1.bf16.msra.mxu0 %v4019_v49  ;;  %4532 = vmatpush1.bf16.msra.mxu1 %v4531_v50  ;;  %v353_v49 = vld [vmem:[%s9553_s1 + $0x988] sm:$0xff]  ;;  %v350_v50 = vld [vmem:[%s9553_s1 + $0x970] sm:$0xff] }
  0x67   :  { %4022 = vmatprep.subr.bf16.mxu0 %v4021_v51  ;;  %4534 = vmatprep.subr.bf16.mxu1 %v4533_v55  ;;  %v4553_v51 = vpack.c.bf16 %v356_v44, %v351_v43  ;;  %v361_v55 = vld [vmem:[%s9553_s1 + $0x9c8] sm:$0xff]  ;;  %v4043_v57 = vpack.c.bf16 %v353_v49, %v348_v48  ;;  %v4555_v58 = vpack.c.bf16 %v355_v52, %v350_v50  ;;  %v400_v48 = vld [vmem:[%s9553_s1 + $0xb00] sm:$0xff]  ;;  %v414_v52 = vld [vmem:[%s9553_s1 + $0xb70] sm:$0xff] }
  0x68   :  { %v4571_v44 = vpack.c.bf16 %v395_v38, %v390_v36  ;;  %v4573_v49 = vpack.c.bf16 %v406_v42, %v401_v41  ;;  %v405_v50 = vld [vmem:[%s9553_s1 + $0xb28] sm:$0xff]  ;;  %v454_v36 = vld [vmem:[%s9553_s1 + $0xcb0] sm:$0xff]  ;;  %v456_v38 = vld [vmem:[%s9553_s1 + $0xcc0] sm:$0xff] }
  0x69   :  { %v448_v42 = vld [vmem:[%s9553_s1 + $0xc80] sm:$0xff] }
  0x6a   :  { %4024 = vmatpush1.bf16.msra.mxu0 %v4023_v61  ;;  %4536 = vmatpush1.bf16.msra.mxu1 %v4535_v62  ;;  %v363_v61 = vld [vmem:[%s9553_s1 + $0x9d8] sm:$0xff]  ;;  %v360_v62 = vld [vmem:[%s9553_s1 + $0x9c0] sm:$0xff] }
  0x6b   :  { %4026 = vmatprep.subr.bf16.mxu0 %v4025_v63  ;;  %4538 = vmatprep.subr.bf16.mxu1 %v4537_v3  ;;  %v4557_v63 = vpack.c.bf16 %v366_v56, %v361_v55  ;;  %v371_v3 = vld [vmem:[%s9553_s1 + $0xa18] sm:$0xff]  ;;  %v4047_v5 = vpack.c.bf16 %v363_v61, %v358_v60  ;;  %v4559_v6 = vpack.c.bf16 %v365_v0, %v360_v62  ;;  %v410_v60 = vld [vmem:[%s9553_s1 + $0xb50] sm:$0xff]  ;;  %v424_v0 = vld [vmem:[%s9553_s1 + $0xbc0] sm:$0xff] }
  0x6c   :  { %v4575_v56 = vpack.c.bf16 %v405_v50, %v400_v48  ;;  %v4577_v61 = vpack.c.bf16 %v416_v54, %v411_v53  ;;  %v415_v62 = vld [vmem:[%s9553_s1 + $0xb78] sm:$0xff]  ;;  %v464_v48 = vld [vmem:[%s9553_s1 + $0xd00] sm:$0xff]  ;;  %v466_v50 = vld [vmem:[%s9553_s1 + $0xd10] sm:$0xff] }
  0x6d   :  { %v458_v54 = vld [vmem:[%s9553_s1 + $0xcd0] sm:$0xff] }
  0x6e   :  { %4028 = vmatpush1.bf16.msra.mxu0 %v4027_v9  ;;  %4540 = vmatpush1.bf16.msra.mxu1 %v4539_v10  ;;  %v373_v9 = vld [vmem:[%s9553_s1 + $0xa28] sm:$0xff]  ;;  %v370_v10 = vld [vmem:[%s9553_s1 + $0xa10] sm:$0xff] }
  0x6f   :  { %4030 = vmatprep.subr.bf16.mxu0 %v4029_v11  ;;  %4542 = vmatprep.subr.bf16.mxu1 %v4541_v15  ;;  %v4561_v11 = vpack.c.bf16 %v376_v4, %v371_v3  ;;  %v381_v15 = vld [vmem:[%s9553_s1 + $0xa68] sm:$0xff]  ;;  %v4051_v18 = vpack.c.bf16 %v373_v9, %v368_v8  ;;  %v4563_v19 = vpack.c.bf16 %v375_v12, %v370_v10  ;;  %v420_v8 = vld [vmem:[%s9553_s1 + $0xba0] sm:$0xff]  ;;  %v434_v12 = vld [vmem:[%s9553_s1 + $0xc10] sm:$0xff] }
  0x70   :  { %v4565_v24 = vpack.c.bf16 %v386_v16, %v381_v15  ;;  %v4579_v4 = vpack.c.bf16 %v415_v62, %v410_v60  ;;  %v4581_v9 = vpack.c.bf16 %v426_v2, %v421_v1  ;;  %v425_v10 = vld [vmem:[%s9553_s1 + $0xbc8] sm:$0xff]  ;;  %v474_v60 = vld [vmem:[%s9553_s1 + $0xd50] sm:$0xff]  ;;  %v476_v62 = vld [vmem:[%s9553_s1 + $0xd60] sm:$0xff] }
  0x71   :  { %v4583_v16 = vpack.c.bf16 %v425_v10, %v420_v8  ;;  %v468_v2 = vld [vmem:[%s9553_s1 + $0xd20] sm:$0xff]  ;;  %v486_v10 = vld [vmem:[%s9553_s1 + $0xdb0] sm:$0xff] }
  0x72   :  { %4032 = vmatpush1.bf16.msra.mxu0 %v4031_v21  ;;  %4544 = vmatpush1.bf16.msra.mxu1 %v4543_v22  ;;  %v378_v21 = vld [vmem:[%s9553_s1 + $0xa50] sm:$0xff]  ;;  %v383_v22 = vld [vmem:[%s9553_s1 + $0xa78] sm:$0xff]  ;;  %v484_v8 = vld [vmem:[%s9553_s1 + $0xda0] sm:$0xff] }
  0x73   :  { %4034 = vmatprep.subr.bf16.mxu0 %v4033_v23  ;;  %4546 = vmatprep.subr.bf16.mxu1 %v4545_v27  ;;  %v380_v23 = vld [vmem:[%s9553_s1 + $0xa60] sm:$0xff]  ;;  %v394_v27 = vld [vmem:[%s9553_s1 + $0xad0] sm:$0xff]  ;;  %v4055_v31 = vpack.c.bf16 %v383_v22, %v378_v21  ;;  %v4585_v21 = vpack.c.bf16 %v436_v14, %v431_v13  ;;  %v435_v22 = vld [vmem:[%s9553_s1 + $0xc18] sm:$0xff] }
  0x74   :  { %v4567_v32 = vpack.c.bf16 %v385_v25, %v380_v23  ;;  %v439_v23 = vld [vmem:[%s9553_s1 + $0xc38] sm:$0xff]  ;;  %v441_v25 = vld [vmem:[%s9553_s1 + $0xc48] sm:$0xff]  ;;  %v478_v14 = vld [vmem:[%s9553_s1 + $0xd70] sm:$0xff] }
  0x76   :  { %4036 = vmatpush1.bf16.msra.mxu0 %v4035_v33  ;;  %4548 = vmatpush1.bf16.msra.mxu1 %v4547_v34  ;;  %v4057_v33 = vpack.c.bf16 %v394_v27, %v389_v26  ;;  %v388_v34 = vld [vmem:[%s9553_s1 + $0xaa0] sm:$0xff]  ;;  %v446_v26 = vld [vmem:[%s9553_s1 + $0xc70] sm:$0xff] }
  0x77   :  { %4038 = vmatprep.subr.bf16.mxu0 %v4037_v35  ;;  %4550 = vmatprep.subr.bf16.mxu1 %v4549_v39  ;;  %v393_v35 = vld [vmem:[%s9553_s1 + $0xac8] sm:$0xff]  ;;  %v399_v39 = vld [vmem:[%s9553_s1 + $0xaf8] sm:$0xff] }
  0x78   :  { %v4059_v43 = vpack.c.bf16 %v393_v35, %v388_v34  ;;  %v445_v34 = vld [vmem:[%s9553_s1 + $0xc68] sm:$0xff] }
  0x79   :  { %v449_v35 = vld [vmem:[%s9553_s1 + $0xc88] sm:$0xff] }
  0x7a   :  { %4040 = vmatpush1.bf16.msra.mxu0 %v4039_v45  ;;  %4552 = vmatpush1.bf16.msra.mxu1 %v4551_v46  ;;  %v4061_v45 = vpack.c.bf16 %v404_v40, %v399_v39  ;;  %v398_v46 = vld [vmem:[%s9553_s1 + $0xaf0] sm:$0xff]  ;;  %v4081_v41 = vpack.c.bf16 %v454_v36, %v449_v35 }
  0x7b   :  { %4042 = vmatprep.subr.bf16.mxu0 %v4041_v47  ;;  %4554 = vmatprep.subr.bf16.mxu1 %v4553_v51  ;;  %v403_v47 = vld [vmem:[%s9553_s1 + $0xb18] sm:$0xff]  ;;  %v409_v51 = vld [vmem:[%s9553_s1 + $0xb48] sm:$0xff] }
  0x7c   :  { %v4063_v55 = vpack.c.bf16 %v403_v47, %v398_v46  ;;  %v455_v46 = vld [vmem:[%s9553_s1 + $0xcb8] sm:$0xff] }
  0x7d   :  { %v459_v47 = vld [vmem:[%s9553_s1 + $0xcd8] sm:$0xff] }
  0x7e   :  { %4044 = vmatpush1.bf16.msra.mxu0 %v4043_v57  ;;  %4556 = vmatpush1.bf16.msra.mxu1 %v4555_v58  ;;  %v4065_v57 = vpack.c.bf16 %v414_v52, %v409_v51  ;;  %v408_v58 = vld [vmem:[%s9553_s1 + $0xb40] sm:$0xff]  ;;  %v4085_v53 = vpack.c.bf16 %v464_v48, %v459_v47 }
  0x7f   :  { %4046 = vmatprep.subr.bf16.mxu0 %v4045_v59  ;;  %4558 = vmatprep.subr.bf16.mxu1 %v4557_v63  ;;  %v413_v59 = vld [vmem:[%s9553_s1 + $0xb68] sm:$0xff]  ;;  %v419_v63 = vld [vmem:[%s9553_s1 + $0xb98] sm:$0xff] }
  0x80   :  { %v4067_v3 = vpack.c.bf16 %v413_v59, %v408_v58  ;;  %v465_v58 = vld [vmem:[%s9553_s1 + $0xd08] sm:$0xff] }
  0x81   :  { %v469_v59 = vld [vmem:[%s9553_s1 + $0xd28] sm:$0xff] }
  0x82   :  { %4048 = vmatpush1.bf16.msra.mxu0 %v4047_v5  ;;  %4560 = vmatpush1.bf16.msra.mxu1 %v4559_v6  ;;  %v4069_v5 = vpack.c.bf16 %v424_v0, %v419_v63  ;;  %v418_v6 = vld [vmem:[%s9553_s1 + $0xb90] sm:$0xff]  ;;  %v4089_v1 = vpack.c.bf16 %v474_v60, %v469_v59 }
  0x83   :  { %4050 = vmatprep.subr.bf16.mxu0 %v4049_v7  ;;  %4562 = vmatprep.subr.bf16.mxu1 %v4561_v11  ;;  %v423_v7 = vld [vmem:[%s9553_s1 + $0xbb8] sm:$0xff]  ;;  %v429_v11 = vld [vmem:[%s9553_s1 + $0xbe8] sm:$0xff] }
  0x84   :  { %v4071_v15 = vpack.c.bf16 %v423_v7, %v418_v6  ;;  %v475_v6 = vld [vmem:[%s9553_s1 + $0xd58] sm:$0xff] }
  0x85   :  { %1491 = vmatmul.mubr.f32.vlgmr.msra.gmra.mrb[0].mxu0 %v34_v17  ;;  %2059 = vmatmul.mubr.f32.vlgmr.msra.gmra.mrb[0].mxu1 %v34_v17  ;;  %v4073_v17 = vpack.c.bf16 %v434_v12, %v429_v11  ;;  %v479_v7 = vld [vmem:[%s9553_s1 + $0xd78] sm:$0xff] }
  0x86   :  { %4052 = vmatpush1.bf16.msra.mxu0 %v4051_v18  ;;  %4564 = vmatpush1.bf16.msra.mxu1 %v4563_v19  ;;  %v428_v18 = vld [vmem:[%s9553_s1 + $0xbe0] sm:$0xff]  ;;  %v433_v19 = vld [vmem:[%s9553_s1 + $0xc08] sm:$0xff]  ;;  %v4093_v13 = vpack.c.bf16 %v484_v8, %v479_v7 }
  0x87   :  { %4054 = vmatprep.subr.bf16.mxu0 %v4053_v20  ;;  %4566 = vmatprep.subr.bf16.mxu1 %v4565_v24  ;;  %v430_v20 = vld [vmem:[%s9553_s1 + $0xbf0] sm:$0xff]  ;;  %v444_v24 = vld [vmem:[%s9553_s1 + $0xc60] sm:$0xff]  ;;  %v4075_v27 = vpack.c.bf16 %v433_v19, %v428_v18  ;;  %v485_v18 = vld [vmem:[%s9553_s1 + $0xda8] sm:$0xff] }
  0x88   :  { %1561 = vmatprep.mubr.f32.mxu0 %v37_v30  ;;  %2129 = vmatprep.mubr.f32.mxu1 %v37_v30  ;;  %v4587_v28 = vpack.c.bf16 %v435_v22, %v430_v20  ;;  %v4077_v29 = vpack.c.bf16 %v444_v24, %v439_v23  ;;  %v438_v30 = vld [vmem:[%s9553_s1 + $0xc30] sm:$0xff]  ;;  %v489_v19 = vld [vmem:[%s9553_s1 + $0xdc8] sm:$0xff]  ;;  %v496_v22 = vld [vmem:[%s9553_s1 + $0xe00] sm:$0xff] }
  0x89   :  { %v494_v20 = vld [vmem:[%s9553_s1 + $0xdf0] sm:$0xff] }
  0x8a   :  { %4056 = vmatpush1.bf16.msra.mxu0 %v4055_v31  ;;  %4568 = vmatpush1.bf16.msra.mxu1 %v4567_v32  ;;  %v443_v31 = vld [vmem:[%s9553_s1 + $0xc58] sm:$0xff]  ;;  %v440_v32 = vld [vmem:[%s9553_s1 + $0xc40] sm:$0xff] }
  0x8b   :  { %4058 = vmatprep.subr.bf16.mxu0 %v4057_v33  ;;  %4570 = vmatprep.subr.bf16.mxu1 %v4569_v37  ;;  %v4589_v33 = vpack.c.bf16 %v446_v26, %v441_v25  ;;  %v451_v37 = vld [vmem:[%s9553_s1 + $0xc98] sm:$0xff]  ;;  %v4079_v39 = vpack.c.bf16 %v443_v31, %v438_v30  ;;  %v4591_v40 = vpack.c.bf16 %v445_v34, %v440_v32  ;;  %v488_v26 = vld [vmem:[%s9553_s1 + $0xdc0] sm:$0xff]  ;;  %v506_v34 = vld [vmem:[%s9553_s1 + $0xe50] sm:$0xff] }
  0x8c   :  { %v4097_v25 = vpack.c.bf16 %v494_v20, %v489_v19  ;;  %v495_v30 = vld [vmem:[%s9553_s1 + $0xdf8] sm:$0xff]  ;;  %v504_v32 = vld [vmem:[%s9553_s1 + $0xe40] sm:$0xff] }
  0x8d   :  { %v499_v31 = vld [vmem:[%s9553_s1 + $0xe18] sm:$0xff]  ;;  %v36_v19 = vld [vmem:[%s9554_s0 + $0x20] sm:$0xff] }
  0x8e   :  { %4060 = vmatpush1.bf16.msra.mxu0 %v4059_v43  ;;  %4572 = vmatpush1.bf16.msra.mxu1 %v4571_v44  ;;  %v453_v43 = vld [vmem:[%s9553_s1 + $0xca8] sm:$0xff]  ;;  %v450_v44 = vld [vmem:[%s9553_s1 + $0xc90] sm:$0xff] }
  0x8f   :  { %4062 = vmatprep.subr.bf16.mxu0 %v4061_v45  ;;  %4574 = vmatprep.subr.bf16.mxu1 %v4573_v49  ;;  %v4593_v45 = vpack.c.bf16 %v456_v38, %v451_v37  ;;  %v461_v49 = vld [vmem:[%s9553_s1 + $0xce8] sm:$0xff]  ;;  %v4083_v51 = vpack.c.bf16 %v453_v43, %v448_v42  ;;  %v4595_v52 = vpack.c.bf16 %v455_v46, %v450_v44  ;;  %v498_v38 = vld [vmem:[%s9553_s1 + $0xe10] sm:$0xff]  ;;  %v516_v46 = vld [vmem:[%s9553_s1 + $0xea0] sm:$0xff] }
  0x90   :  { %v4101_v37 = vpack.c.bf16 %v504_v32, %v499_v31  ;;  %v505_v42 = vld [vmem:[%s9553_s1 + $0xe48] sm:$0xff]  ;;  %v514_v44 = vld [vmem:[%s9553_s1 + $0xe90] sm:$0xff]  ;;  %v556_v31 = vld [vmem:[%s9553_s1 + $0xfe0] sm:$0xff] }
  0x91   :  { %v509_v43 = vld [vmem:[%s9553_s1 + $0xe68] sm:$0xff]  ;;  %v39_v32 = vld [vmem:[%s9554_s0 + $0x38] sm:$0xff] }
  0x92   :  { %4064 = vmatpush1.bf16.msra.mxu0 %v4063_v55  ;;  %4576 = vmatpush1.bf16.msra.mxu1 %v4575_v56  ;;  %v463_v55 = vld [vmem:[%s9553_s1 + $0xcf8] sm:$0xff]  ;;  %v460_v56 = vld [vmem:[%s9553_s1 + $0xce0] sm:$0xff] }
  0x93   :  { %4066 = vmatprep.subr.bf16.mxu0 %v4065_v57  ;;  %4578 = vmatprep.subr.bf16.mxu1 %v4577_v61  ;;  %v4597_v57 = vpack.c.bf16 %v466_v50, %v461_v49  ;;  %v471_v61 = vld [vmem:[%s9553_s1 + $0xd38] sm:$0xff]  ;;  %v4087_v63 = vpack.c.bf16 %v463_v55, %v458_v54  ;;  %v4599_v0 = vpack.c.bf16 %v465_v58, %v460_v56  ;;  %v508_v50 = vld [vmem:[%s9553_s1 + $0xe60] sm:$0xff]  ;;  %v526_v58 = vld [vmem:[%s9553_s1 + $0xef0] sm:$0xff] }
  0x94   :  { %v4105_v49 = vpack.c.bf16 %v514_v44, %v509_v43  ;;  %v515_v54 = vld [vmem:[%s9553_s1 + $0xe98] sm:$0xff]  ;;  %v524_v56 = vld [vmem:[%s9553_s1 + $0xee0] sm:$0xff]  ;;  %v561_v43 = vld [vmem:[%s9553_s1 + $0x1008] sm:$0xff] }
  0x95   :  { %v519_v55 = vld [vmem:[%s9553_s1 + $0xeb8] sm:$0xff]  ;;  %v566_v44 = vld [vmem:[%s9553_s1 + $0x1030] sm:$0xff] }
  0x96   :  { %4068 = vmatpush1.bf16.msra.mxu0 %v4067_v3  ;;  %4580 = vmatpush1.bf16.msra.mxu1 %v4579_v4  ;;  %v473_v3 = vld [vmem:[%s9553_s1 + $0xd48] sm:$0xff]  ;;  %v470_v4 = vld [vmem:[%s9553_s1 + $0xd30] sm:$0xff] }
  0x97   :  { %4070 = vmatprep.subr.bf16.mxu0 %v4069_v5  ;;  %4582 = vmatprep.subr.bf16.mxu1 %v4581_v9  ;;  %v4601_v5 = vpack.c.bf16 %v476_v62, %v471_v61  ;;  %v481_v9 = vld [vmem:[%s9553_s1 + $0xd88] sm:$0xff]  ;;  %v4091_v11 = vpack.c.bf16 %v473_v3, %v468_v2  ;;  %v4603_v12 = vpack.c.bf16 %v475_v6, %v470_v4  ;;  %v518_v62 = vld [vmem:[%s9553_s1 + $0xeb0] sm:$0xff]  ;;  %v536_v6 = vld [vmem:[%s9553_s1 + $0xf40] sm:$0xff] }
  0x98   :  { %v4109_v61 = vpack.c.bf16 %v524_v56, %v519_v55  ;;  %v525_v2 = vld [vmem:[%s9553_s1 + $0xee8] sm:$0xff]  ;;  %v534_v4 = vld [vmem:[%s9553_s1 + $0xf30] sm:$0xff]  ;;  %v571_v55 = vld [vmem:[%s9553_s1 + $0x1058] sm:$0xff] }
  0x99   :  { %v529_v3 = vld [vmem:[%s9553_s1 + $0xf08] sm:$0xff]  ;;  %v576_v56 = vld [vmem:[%s9553_s1 + $0x1080] sm:$0xff] }
  0x9a   :  { %4072 = vmatpush1.bf16.msra.mxu0 %v4071_v15  ;;  %4584 = vmatpush1.bf16.msra.mxu1 %v4583_v16  ;;  %v483_v15 = vld [vmem:[%s9553_s1 + $0xd98] sm:$0xff]  ;;  %v480_v16 = vld [vmem:[%s9553_s1 + $0xd80] sm:$0xff] }
  0x9b   :  { %4074 = vmatprep.subr.bf16.mxu0 %v4073_v17  ;;  %4586 = vmatprep.subr.bf16.mxu1 %v4585_v21  ;;  %v4605_v17 = vpack.c.bf16 %v486_v10, %v481_v9  ;;  %v491_v21 = vld [vmem:[%s9553_s1 + $0xdd8] sm:$0xff]  ;;  %v4095_v23 = vpack.c.bf16 %v483_v15, %v478_v14  ;;  %v4607_v24 = vpack.c.bf16 %v485_v18, %v480_v16  ;;  %v528_v10 = vld [vmem:[%s9553_s1 + $0xf00] sm:$0xff]  ;;  %v546_v18 = vld [vmem:[%s9553_s1 + $0xf90] sm:$0xff] }
  0x9c   :  { %v4113_v9 = vpack.c.bf16 %v534_v4, %v529_v3  ;;  %v535_v14 = vld [vmem:[%s9553_s1 + $0xf38] sm:$0xff]  ;;  %v544_v16 = vld [vmem:[%s9553_s1 + $0xf80] sm:$0xff]  ;;  %v581_v3 = vld [vmem:[%s9553_s1 + $0x10a8] sm:$0xff] }
  0x9d   :  { %v539_v15 = vld [vmem:[%s9553_s1 + $0xf58] sm:$0xff]  ;;  %v586_v4 = vld [vmem:[%s9553_s1 + $0x10d0] sm:$0xff] }
  0x9e   :  { %4076 = vmatpush1.bf16.msra.mxu0 %v4075_v27  ;;  %4588 = vmatpush1.bf16.msra.mxu1 %v4587_v28  ;;  %v493_v27 = vld [vmem:[%s9553_s1 + $0xde8] sm:$0xff]  ;;  %v490_v28 = vld [vmem:[%s9553_s1 + $0xdd0] sm:$0xff] }
  0x9f   :  { %4078 = vmatprep.subr.bf16.mxu0 %v4077_v29  ;;  %4590 = vmatprep.subr.bf16.mxu1 %v4589_v33  ;;  %v4609_v29 = vpack.c.bf16 %v496_v22, %v491_v21  ;;  %v501_v33 = vld [vmem:[%s9553_s1 + $0xe28] sm:$0xff]  ;;  %v4099_v35 = vpack.c.bf16 %v493_v27, %v488_v26  ;;  %v4611_v36 = vpack.c.bf16 %v495_v30, %v490_v28  ;;  %v551_v30 = vld [vmem:[%s9553_s1 + $0xfb8] sm:$0xff] }
  0xa0   :  { %v4117_v22 = vpack.c.bf16 %v544_v16, %v539_v15  ;;  %v545_v27 = vld [vmem:[%s9553_s1 + $0xf88] sm:$0xff]  ;;  %v591_v15 = vld [vmem:[%s9553_s1 + $0x10f8] sm:$0xff]  ;;  %v596_v16 = vld [vmem:[%s9553_s1 + $0x1120] sm:$0xff] }
  0xa1   :  { %v549_v28 = vld [vmem:[%s9553_s1 + $0xfa8] sm:$0xff] }
  0xa2   :  { %4080 = vmatpush1.bf16.msra.mxu0 %v4079_v39  ;;  %4592 = vmatpush1.bf16.msra.mxu1 %v4591_v40  ;;  %v503_v39 = vld [vmem:[%s9553_s1 + $0xe38] sm:$0xff]  ;;  %v500_v40 = vld [vmem:[%s9553_s1 + $0xe20] sm:$0xff] }
  0xa3   :  { %4082 = vmatprep.subr.bf16.mxu0 %v4081_v41  ;;  %4594 = vmatprep.subr.bf16.mxu1 %v4593_v45  ;;  %v4613_v41 = vpack.c.bf16 %v506_v34, %v501_v33  ;;  %v511_v45 = vld [vmem:[%s9553_s1 + $0xe78] sm:$0xff]  ;;  %v4103_v47 = vpack.c.bf16 %v503_v39, %v498_v38  ;;  %v4615_v48 = vpack.c.bf16 %v505_v42, %v500_v40  ;;  %v550_v38 = vld [vmem:[%s9553_s1 + $0xfb0] sm:$0xff]  ;;  %v564_v42 = vld [vmem:[%s9553_s1 + $0x1020] sm:$0xff] }
  0xa4   :  { %v4633_v39 = vpack.c.bf16 %v556_v31, %v551_v30  ;;  %v555_v40 = vld [vmem:[%s9553_s1 + $0xfd8] sm:$0xff] }
  0xa6   :  { %4084 = vmatpush1.bf16.msra.mxu0 %v4083_v51  ;;  %4596 = vmatpush1.bf16.msra.mxu1 %v4595_v52  ;;  %v513_v51 = vld [vmem:[%s9553_s1 + $0xe88] sm:$0xff]  ;;  %v510_v52 = vld [vmem:[%s9553_s1 + $0xe70] sm:$0xff] }
  0xa7   :  { %4086 = vmatprep.subr.bf16.mxu0 %v4085_v53  ;;  %4598 = vmatprep.subr.bf16.mxu1 %v4597_v57  ;;  %v4617_v53 = vpack.c.bf16 %v516_v46, %v511_v45  ;;  %v521_v57 = vld [vmem:[%s9553_s1 + $0xec8] sm:$0xff]  ;;  %v4107_v59 = vpack.c.bf16 %v513_v51, %v508_v50  ;;  %v4619_v60 = vpack.c.bf16 %v515_v54, %v510_v52  ;;  %v560_v50 = vld [vmem:[%s9553_s1 + $0x1000] sm:$0xff]  ;;  %v574_v54 = vld [vmem:[%s9553_s1 + $0x1070] sm:$0xff] }
  0xa8   :  { %v4635_v46 = vpack.c.bf16 %v555_v40, %v550_v38  ;;  %v4637_v51 = vpack.c.bf16 %v566_v44, %v561_v43  ;;  %v565_v52 = vld [vmem:[%s9553_s1 + $0x1028] sm:$0xff]  ;;  %v614_v38 = vld [vmem:[%s9553_s1 + $0x11b0] sm:$0xff]  ;;  %v616_v40 = vld [vmem:[%s9553_s1 + $0x11c0] sm:$0xff] }
  0xa9   :  { %v608_v44 = vld [vmem:[%s9553_s1 + $0x1180] sm:$0xff] }
  0xaa   :  { %4088 = vmatpush1.bf16.msra.mxu0 %v4087_v63  ;;  %4600 = vmatpush1.bf16.msra.mxu1 %v4599_v0  ;;  %v523_v63 = vld [vmem:[%s9553_s1 + $0xed8] sm:$0xff]  ;;  %v520_v0 = vld [vmem:[%s9553_s1 + $0xec0] sm:$0xff] }
  0xab   :  { %4090 = vmatprep.subr.bf16.mxu0 %v4089_v1  ;;  %4602 = vmatprep.subr.bf16.mxu1 %v4601_v5  ;;  %v4621_v1 = vpack.c.bf16 %v526_v58, %v521_v57  ;;  %v531_v5 = vld [vmem:[%s9553_s1 + $0xf18] sm:$0xff]  ;;  %v4111_v7 = vpack.c.bf16 %v523_v63, %v518_v62  ;;  %v4623_v8 = vpack.c.bf16 %v525_v2, %v520_v0  ;;  %v570_v62 = vld [vmem:[%s9553_s1 + $0x1050] sm:$0xff]  ;;  %v584_v2 = vld [vmem:[%s9553_s1 + $0x10c0] sm:$0xff] }
  0xac   :  { %v4639_v58 = vpack.c.bf16 %v565_v52, %v560_v50  ;;  %v4641_v63 = vpack.c.bf16 %v576_v56, %v571_v55  ;;  %v575_v0 = vld [vmem:[%s9553_s1 + $0x1078] sm:$0xff]  ;;  %v624_v50 = vld [vmem:[%s9553_s1 + $0x1200] sm:$0xff]  ;;  %v626_v52 = vld [vmem:[%s9553_s1 + $0x1210] sm:$0xff] }
  0xad   :  { %v618_v56 = vld [vmem:[%s9553_s1 + $0x11d0] sm:$0xff] }
  0xae   :  { %4092 = vmatpush1.bf16.msra.mxu0 %v4091_v11  ;;  %4604 = vmatpush1.bf16.msra.mxu1 %v4603_v12  ;;  %v533_v11 = vld [vmem:[%s9553_s1 + $0xf28] sm:$0xff]  ;;  %v530_v12 = vld [vmem:[%s9553_s1 + $0xf10] sm:$0xff] }
  0xaf   :  { %4094 = vmatprep.subr.bf16.mxu0 %v4093_v13  ;;  %4606 = vmatprep.subr.bf16.mxu1 %v4605_v17  ;;  %v4625_v13 = vpack.c.bf16 %v536_v6, %v531_v5  ;;  %v541_v17 = vld [vmem:[%s9553_s1 + $0xf68] sm:$0xff]  ;;  %v4115_v20 = vpack.c.bf16 %v533_v11, %v528_v10  ;;  %v4627_v21 = vpack.c.bf16 %v535_v14, %v530_v12  ;;  %v580_v10 = vld [vmem:[%s9553_s1 + $0x10a0] sm:$0xff]  ;;  %v594_v14 = vld [vmem:[%s9553_s1 + $0x1110] sm:$0xff] }
  0xb0   :  { %v4629_v26 = vpack.c.bf16 %v546_v18, %v541_v17  ;;  %v4643_v6 = vpack.c.bf16 %v575_v0, %v570_v62  ;;  %v4645_v11 = vpack.c.bf16 %v586_v4, %v581_v3  ;;  %v585_v12 = vld [vmem:[%s9553_s1 + $0x10c8] sm:$0xff]  ;;  %v634_v62 = vld [vmem:[%s9553_s1 + $0x1250] sm:$0xff]  ;;  %v636_v0 = vld [vmem:[%s9553_s1 + $0x1260] sm:$0xff] }
  0xb1   :  { %v4647_v18 = vpack.c.bf16 %v585_v12, %v580_v10  ;;  %v628_v4 = vld [vmem:[%s9553_s1 + $0x1220] sm:$0xff]  ;;  %v646_v12 = vld [vmem:[%s9553_s1 + $0x12b0] sm:$0xff] }
  0xb2   :  { %4096 = vmatpush1.bf16.msra.mxu0 %v4095_v23  ;;  %4608 = vmatpush1.bf16.msra.mxu1 %v4607_v24  ;;  %v538_v23 = vld [vmem:[%s9553_s1 + $0xf50] sm:$0xff]  ;;  %v543_v24 = vld [vmem:[%s9553_s1 + $0xf78] sm:$0xff]  ;;  %v644_v10 = vld [vmem:[%s9553_s1 + $0x12a0] sm:$0xff] }
  0xb3   :  { %4098 = vmatprep.subr.bf16.mxu0 %v4097_v25  ;;  %4610 = vmatprep.subr.bf16.mxu1 %v4609_v29  ;;  %v540_v25 = vld [vmem:[%s9553_s1 + $0xf60] sm:$0xff]  ;;  %v554_v29 = vld [vmem:[%s9553_s1 + $0xfd0] sm:$0xff]  ;;  %v4119_v33 = vpack.c.bf16 %v543_v24, %v538_v23  ;;  %v4649_v23 = vpack.c.bf16 %v596_v16, %v591_v15  ;;  %v595_v24 = vld [vmem:[%s9553_s1 + $0x1118] sm:$0xff] }
  0xb4   :  { %v4631_v34 = vpack.c.bf16 %v545_v27, %v540_v25  ;;  %v599_v25 = vld [vmem:[%s9553_s1 + $0x1138] sm:$0xff]  ;;  %v601_v27 = vld [vmem:[%s9553_s1 + $0x1148] sm:$0xff]  ;;  %v638_v16 = vld [vmem:[%s9553_s1 + $0x1270] sm:$0xff] }
  0xb6   :  { %4100 = vmatpush1.bf16.msra.mxu0 %v4099_v35  ;;  %4612 = vmatpush1.bf16.msra.mxu1 %v4611_v36  ;;  %v4121_v35 = vpack.c.bf16 %v554_v29, %v549_v28  ;;  %v548_v36 = vld [vmem:[%s9553_s1 + $0xfa0] sm:$0xff]  ;;  %v606_v28 = vld [vmem:[%s9553_s1 + $0x1170] sm:$0xff] }
  0xb7   :  { %4102 = vmatprep.subr.bf16.mxu0 %v4101_v37  ;;  %4614 = vmatprep.subr.bf16.mxu1 %v4613_v41  ;;  %v553_v37 = vld [vmem:[%s9553_s1 + $0xfc8] sm:$0xff]  ;;  %v559_v41 = vld [vmem:[%s9553_s1 + $0xff8] sm:$0xff] }
  0xb8   :  { %v4123_v45 = vpack.c.bf16 %v553_v37, %v548_v36  ;;  %v605_v36 = vld [vmem:[%s9553_s1 + $0x1168] sm:$0xff] }
  0xb9   :  { %v609_v37 = vld [vmem:[%s9553_s1 + $0x1188] sm:$0xff] }
  0xba   :  { %4104 = vmatpush1.bf16.msra.mxu0 %v4103_v47  ;;  %4616 = vmatpush1.bf16.msra.mxu1 %v4615_v48  ;;  %v4125_v47 = vpack.c.bf16 %v564_v42, %v559_v41  ;;  %v558_v48 = vld [vmem:[%s9553_s1 + $0xff0] sm:$0xff]  ;;  %v4145_v43 = vpack.c.bf16 %v614_v38, %v609_v37 }
  0xbb   :  { %4106 = vmatprep.subr.bf16.mxu0 %v4105_v49  ;;  %4618 = vmatprep.subr.bf16.mxu1 %v4617_v53  ;;  %v563_v49 = vld [vmem:[%s9553_s1 + $0x1018] sm:$0xff]  ;;  %v569_v53 = vld [vmem:[%s9553_s1 + $0x1048] sm:$0xff] }
  0xbc   :  { %v4127_v57 = vpack.c.bf16 %v563_v49, %v558_v48  ;;  %v615_v48 = vld [vmem:[%s9553_s1 + $0x11b8] sm:$0xff] }
  0xbd   :  { %v619_v49 = vld [vmem:[%s9553_s1 + $0x11d8] sm:$0xff] }
  0xbe   :  { %4108 = vmatpush1.bf16.msra.mxu0 %v4107_v59  ;;  %4620 = vmatpush1.bf16.msra.mxu1 %v4619_v60  ;;  %v4129_v59 = vpack.c.bf16 %v574_v54, %v569_v53  ;;  %v568_v60 = vld [vmem:[%s9553_s1 + $0x1040] sm:$0xff]  ;;  %v4149_v55 = vpack.c.bf16 %v624_v50, %v619_v49 }
  0xbf   :  { %4110 = vmatprep.subr.bf16.mxu0 %v4109_v61  ;;  %4622 = vmatprep.subr.bf16.mxu1 %v4621_v1  ;;  %v573_v61 = vld [vmem:[%s9553_s1 + $0x1068] sm:$0xff]  ;;  %v579_v1 = vld [vmem:[%s9553_s1 + $0x1098] sm:$0xff] }
  0xc0   :  { %v4131_v5 = vpack.c.bf16 %v573_v61, %v568_v60  ;;  %v625_v60 = vld [vmem:[%s9553_s1 + $0x1208] sm:$0xff] }
  0xc1   :  { %v629_v61 = vld [vmem:[%s9553_s1 + $0x1228] sm:$0xff] }
  0xc2   :  { %4112 = vmatpush1.bf16.msra.mxu0 %v4111_v7  ;;  %4624 = vmatpush1.bf16.msra.mxu1 %v4623_v8  ;;  %v4133_v7 = vpack.c.bf16 %v584_v2, %v579_v1  ;;  %v578_v8 = vld [vmem:[%s9553_s1 + $0x1090] sm:$0xff]  ;;  %v4153_v3 = vpack.c.bf16 %v634_v62, %v629_v61 }
  0xc3   :  { %4114 = vmatprep.subr.bf16.mxu0 %v4113_v9  ;;  %4626 = vmatprep.subr.bf16.mxu1 %v4625_v13  ;;  %v583_v9 = vld [vmem:[%s9553_s1 + $0x10b8] sm:$0xff]  ;;  %v589_v13 = vld [vmem:[%s9553_s1 + $0x10e8] sm:$0xff] }
  0xc4   :  { %v4135_v17 = vpack.c.bf16 %v583_v9, %v578_v8  ;;  %v635_v8 = vld [vmem:[%s9553_s1 + $0x1258] sm:$0xff] }
  0xc5   :  { %1562 = vmatmul.mubr.f32.vlgmr.msra.gmra.mrb[0].mxu0 %v36_v19  ;;  %2130 = vmatmul.mubr.f32.vlgmr.msra.gmra.mrb[0].mxu1 %v36_v19  ;;  %v4137_v19 = vpack.c.bf16 %v594_v14, %v589_v13  ;;  %v639_v9 = vld [vmem:[%s9553_s1 + $0x1278] sm:$0xff] }
  0xc6   :  { %4116 = vmatpush1.bf16.msra.mxu0 %v4115_v20  ;;  %4628 = vmatpush1.bf16.msra.mxu1 %v4627_v21  ;;  %v588_v20 = vld [vmem:[%s9553_s1 + $0x10e0] sm:$0xff]  ;;  %v593_v21 = vld [vmem:[%s9553_s1 + $0x1108] sm:$0xff]  ;;  %v4157_v15 = vpack.c.bf16 %v644_v10, %v639_v9 }
  0xc7   :  { %4118 = vmatprep.subr.bf16.mxu0 %v4117_v22  ;;  %4630 = vmatprep.subr.bf16.mxu1 %v4629_v26  ;;  %v590_v22 = vld [vmem:[%s9553_s1 + $0x10f0] sm:$0xff]  ;;  %v604_v26 = vld [vmem:[%s9553_s1 + $0x1160] sm:$0xff]  ;;  %v4139_v29 = vpack.c.bf16 %v593_v21, %v588_v20  ;;  %v645_v20 = vld [vmem:[%s9553_s1 + $0x12a8] sm:$0xff] }
  0xc8   :  { %1632 = vmatprep.mubr.f32.mxu0 %v39_v32  ;;  %2200 = vmatprep.mubr.f32.mxu1 %v39_v32  ;;  %v4651_v30 = vpack.c.bf16 %v595_v24, %v590_v22  ;;  %v4141_v31 = vpack.c.bf16 %v604_v26, %v599_v25  ;;  %v598_v32 = vld [vmem:[%s9553_s1 + $0x1130] sm:$0xff]  ;;  %v649_v21 = vld [vmem:[%s9553_s1 + $0x12c8] sm:$0xff]  ;;  %v656_v24 = vld [vmem:[%s9553_s1 + $0x1300] sm:$0xff] }
  0xc9   :  { %v654_v22 = vld [vmem:[%s9553_s1 + $0x12f0] sm:$0xff] }
  0xca   :  { %4120 = vmatpush1.bf16.msra.mxu0 %v4119_v33  ;;  %4632 = vmatpush1.bf16.msra.mxu1 %v4631_v34  ;;  %v603_v33 = vld [vmem:[%s9553_s1 + $0x1158] sm:$0xff]  ;;  %v600_v34 = vld [vmem:[%s9553_s1 + $0x1140] sm:$0xff] }
  0xcb   :  { %4122 = vmatprep.subr.bf16.mxu0 %v4121_v35  ;;  %4634 = vmatprep.subr.bf16.mxu1 %v4633_v39  ;;  %v4653_v35 = vpack.c.bf16 %v606_v28, %v601_v27  ;;  %v611_v39 = vld [vmem:[%s9553_s1 + $0x1198] sm:$0xff]  ;;  %v4143_v41 = vpack.c.bf16 %v603_v33, %v598_v32  ;;  %v4655_v42 = vpack.c.bf16 %v605_v36, %v600_v34  ;;  %v648_v28 = vld [vmem:[%s9553_s1 + $0x12c0] sm:$0xff]  ;;  %v666_v36 = vld [vmem:[%s9553_s1 + $0x1350] sm:$0xff] }
  0xcc   :  { %v4161_v27 = vpack.c.bf16 %v654_v22, %v649_v21  ;;  %v655_v32 = vld [vmem:[%s9553_s1 + $0x12f8] sm:$0xff]  ;;  %v664_v34 = vld [vmem:[%s9553_s1 + $0x1340] sm:$0xff]  ;;  %v38_v21 = vld [vmem:[%s9554_s0 + $0x30] sm:$0xff] }
  0xcd   :  { %v659_v33 = vld [vmem:[%s9553_s1 + $0x1318] sm:$0xff] }
  0xce   :  { %4124 = vmatpush1.bf16.msra.mxu0 %v4123_v45  ;;  %4636 = vmatpush1.bf16.msra.mxu1 %v4635_v46  ;;  %v613_v45 = vld [vmem:[%s9553_s1 + $0x11a8] sm:$0xff]  ;;  %v610_v46 = vld [vmem:[%s9553_s1 + $0x1190] sm:$0xff] }
  0xcf   :  { %4126 = vmatprep.subr.bf16.mxu0 %v4125_v47  ;;  %4638 = vmatprep.subr.bf16.mxu1 %v4637_v51  ;;  %v4657_v47 = vpack.c.bf16 %v616_v40, %v611_v39  ;;  %v621_v51 = vld [vmem:[%s9553_s1 + $0x11e8] sm:$0xff]  ;;  %v4147_v53 = vpack.c.bf16 %v613_v45, %v608_v44  ;;  %v4659_v54 = vpack.c.bf16 %v615_v48, %v610_v46  ;;  %v658_v40 = vld [vmem:[%s9553_s1 + $0x1310] sm:$0xff]  ;;  %v676_v48 = vld [vmem:[%s9553_s1 + $0x13a0] sm:$0xff] }
  0xd0   :  { %v4165_v39 = vpack.c.bf16 %v664_v34, %v659_v33  ;;  %v665_v44 = vld [vmem:[%s9553_s1 + $0x1348] sm:$0xff]  ;;  %v674_v46 = vld [vmem:[%s9553_s1 + $0x1390] sm:$0xff]  ;;  %v716_v33 = vld [vmem:[%s9553_s1 + $0x14e0] sm:$0xff] }
  0xd1   :  { %v669_v45 = vld [vmem:[%s9553_s1 + $0x1368] sm:$0xff] }
  0xd2   :  { %4128 = vmatpush1.bf16.msra.mxu0 %v4127_v57  ;;  %4640 = vmatpush1.bf16.msra.mxu1 %v4639_v58  ;;  %v623_v57 = vld [vmem:[%s9553_s1 + $0x11f8] sm:$0xff]  ;;  %v620_v58 = vld [vmem:[%s9553_s1 + $0x11e0] sm:$0xff]  ;;  %v41_v34 = vld [vmem:[%s9554_s0 + $0x48] sm:$0xff] }
  0xd3   :  { %4130 = vmatprep.subr.bf16.mxu0 %v4129_v59  ;;  %4642 = vmatprep.subr.bf16.mxu1 %v4641_v63  ;;  %v4661_v59 = vpack.c.bf16 %v626_v52, %v621_v51  ;;  %v631_v63 = vld [vmem:[%s9553_s1 + $0x1238] sm:$0xff]  ;;  %v4151_v1 = vpack.c.bf16 %v623_v57, %v618_v56  ;;  %v4663_v2 = vpack.c.bf16 %v625_v60, %v620_v58  ;;  %v668_v52 = vld [vmem:[%s9553_s1 + $0x1360] sm:$0xff]  ;;  %v686_v60 = vld [vmem:[%s9553_s1 + $0x13f0] sm:$0xff] }
  0xd4   :  { %v4169_v51 = vpack.c.bf16 %v674_v46, %v669_v45  ;;  %v675_v56 = vld [vmem:[%s9553_s1 + $0x1398] sm:$0xff]  ;;  %v684_v58 = vld [vmem:[%s9553_s1 + $0x13e0] sm:$0xff]  ;;  %v721_v45 = vld [vmem:[%s9553_s1 + $0x1508] sm:$0xff] }
  0xd5   :  { %v679_v57 = vld [vmem:[%s9553_s1 + $0x13b8] sm:$0xff]  ;;  %v726_v46 = vld [vmem:[%s9553_s1 + $0x1530] sm:$0xff] }
  0xd6   :  { %4132 = vmatpush1.bf16.msra.mxu0 %v4131_v5  ;;  %4644 = vmatpush1.bf16.msra.mxu1 %v4643_v6  ;;  %v633_v5 = vld [vmem:[%s9553_s1 + $0x1248] sm:$0xff]  ;;  %v630_v6 = vld [vmem:[%s9553_s1 + $0x1230] sm:$0xff] }
  0xd7   :  { %4134 = vmatprep.subr.bf16.mxu0 %v4133_v7  ;;  %4646 = vmatprep.subr.bf16.mxu1 %v4645_v11  ;;  %v4665_v7 = vpack.c.bf16 %v636_v0, %v631_v63  ;;  %v641_v11 = vld [vmem:[%s9553_s1 + $0x1288] sm:$0xff]  ;;  %v4155_v13 = vpack.c.bf16 %v633_v5, %v628_v4  ;;  %v4667_v14 = vpack.c.bf16 %v635_v8, %v630_v6  ;;  %v678_v0 = vld [vmem:[%s9553_s1 + $0x13b0] sm:$0xff]  ;;  %v696_v8 = vld [vmem:[%s9553_s1 + $0x1440] sm:$0xff] }
  0xd8   :  { %v4173_v63 = vpack.c.bf16 %v684_v58, %v679_v57  ;;  %v685_v4 = vld [vmem:[%s9553_s1 + $0x13e8] sm:$0xff]  ;;  %v694_v6 = vld [vmem:[%s9553_s1 + $0x1430] sm:$0xff]  ;;  %v731_v57 = vld [vmem:[%s9553_s1 + $0x1558] sm:$0xff] }
  0xd9   :  { %v689_v5 = vld [vmem:[%s9553_s1 + $0x1408] sm:$0xff]  ;;  %v736_v58 = vld [vmem:[%s9553_s1 + $0x1580] sm:$0xff] }
  0xda   :  { %4136 = vmatpush1.bf16.msra.mxu0 %v4135_v17  ;;  %4648 = vmatpush1.bf16.msra.mxu1 %v4647_v18  ;;  %v643_v17 = vld [vmem:[%s9553_s1 + $0x1298] sm:$0xff]  ;;  %v640_v18 = vld [vmem:[%s9553_s1 + $0x1280] sm:$0xff] }
  0xdb   :  { %4138 = vmatprep.subr.bf16.mxu0 %v4137_v19  ;;  %4650 = vmatprep.subr.bf16.mxu1 %v4649_v23  ;;  %v4669_v19 = vpack.c.bf16 %v646_v12, %v641_v11  ;;  %v651_v23 = vld [vmem:[%s9553_s1 + $0x12d8] sm:$0xff]  ;;  %v4159_v25 = vpack.c.bf16 %v643_v17, %v638_v16  ;;  %v4671_v26 = vpack.c.bf16 %v645_v20, %v640_v18  ;;  %v688_v12 = vld [vmem:[%s9553_s1 + $0x1400] sm:$0xff]  ;;  %v706_v20 = vld [vmem:[%s9553_s1 + $0x1490] sm:$0xff] }
  0xdc   :  { %v4177_v11 = vpack.c.bf16 %v694_v6, %v689_v5  ;;  %v695_v16 = vld [vmem:[%s9553_s1 + $0x1438] sm:$0xff]  ;;  %v704_v18 = vld [vmem:[%s9553_s1 + $0x1480] sm:$0xff]  ;;  %v741_v5 = vld [vmem:[%s9553_s1 + $0x15a8] sm:$0xff] }
  0xdd   :  { %v699_v17 = vld [vmem:[%s9553_s1 + $0x1458] sm:$0xff]  ;;  %v746_v6 = vld [vmem:[%s9553_s1 + $0x15d0] sm:$0xff] }
  0xde   :  { %4140 = vmatpush1.bf16.msra.mxu0 %v4139_v29  ;;  %4652 = vmatpush1.bf16.msra.mxu1 %v4651_v30  ;;  %v653_v29 = vld [vmem:[%s9553_s1 + $0x12e8] sm:$0xff]  ;;  %v650_v30 = vld [vmem:[%s9553_s1 + $0x12d0] sm:$0xff] }
  0xdf   :  { %4142 = vmatprep.subr.bf16.mxu0 %v4141_v31  ;;  %4654 = vmatprep.subr.bf16.mxu1 %v4653_v35  ;;  %v4673_v31 = vpack.c.bf16 %v656_v24, %v651_v23  ;;  %v661_v35 = vld [vmem:[%s9553_s1 + $0x1328] sm:$0xff]  ;;  %v4163_v37 = vpack.c.bf16 %v653_v29, %v648_v28  ;;  %v4675_v38 = vpack.c.bf16 %v655_v32, %v650_v30  ;;  %v711_v32 = vld [vmem:[%s9553_s1 + $0x14b8] sm:$0xff] }
  0xe0   :  { %v4181_v24 = vpack.c.bf16 %v704_v18, %v699_v17  ;;  %v705_v29 = vld [vmem:[%s9553_s1 + $0x1488] sm:$0xff]  ;;  %v751_v17 = vld [vmem:[%s9553_s1 + $0x15f8] sm:$0xff]  ;;  %v756_v18 = vld [vmem:[%s9553_s1 + $0x1620] sm:$0xff] }
  0xe1   :  { %v709_v30 = vld [vmem:[%s9553_s1 + $0x14a8] sm:$0xff] }
  0xe2   :  { %4144 = vmatpush1.bf16.msra.mxu0 %v4143_v41  ;;  %4656 = vmatpush1.bf16.msra.mxu1 %v4655_v42  ;;  %v663_v41 = vld [vmem:[%s9553_s1 + $0x1338] sm:$0xff]  ;;  %v660_v42 = vld [vmem:[%s9553_s1 + $0x1320] sm:$0xff] }
  0xe3   :  { %4146 = vmatprep.subr.bf16.mxu0 %v4145_v43  ;;  %4658 = vmatprep.subr.bf16.mxu1 %v4657_v47  ;;  %v4677_v43 = vpack.c.bf16 %v666_v36, %v661_v35  ;;  %v671_v47 = vld [vmem:[%s9553_s1 + $0x1378] sm:$0xff]  ;;  %v4167_v49 = vpack.c.bf16 %v663_v41, %v658_v40  ;;  %v4679_v50 = vpack.c.bf16 %v665_v44, %v660_v42  ;;  %v710_v40 = vld [vmem:[%s9553_s1 + $0x14b0] sm:$0xff]  ;;  %v724_v44 = vld [vmem:[%s9553_s1 + $0x1520] sm:$0xff] }
  0xe4   :  { %v4697_v41 = vpack.c.bf16 %v716_v33, %v711_v32  ;;  %v715_v42 = vld [vmem:[%s9553_s1 + $0x14d8] sm:$0xff] }
  0xe6   :  { %4148 = vmatpush1.bf16.msra.mxu0 %v4147_v53  ;;  %4660 = vmatpush1.bf16.msra.mxu1 %v4659_v54  ;;  %v673_v53 = vld [vmem:[%s9553_s1 + $0x1388] sm:$0xff]  ;;  %v670_v54 = vld [vmem:[%s9553_s1 + $0x1370] sm:$0xff] }
  0xe7   :  { %4150 = vmatprep.subr.bf16.mxu0 %v4149_v55  ;;  %4662 = vmatprep.subr.bf16.mxu1 %v4661_v59  ;;  %v4681_v55 = vpack.c.bf16 %v676_v48, %v671_v47  ;;  %v681_v59 = vld [vmem:[%s9553_s1 + $0x13c8] sm:$0xff]  ;;  %v4171_v61 = vpack.c.bf16 %v673_v53, %v668_v52  ;;  %v4683_v62 = vpack.c.bf16 %v675_v56, %v670_v54  ;;  %v720_v52 = vld [vmem:[%s9553_s1 + $0x1500] sm:$0xff]  ;;  %v734_v56 = vld [vmem:[%s9553_s1 + $0x1570] sm:$0xff] }
  0xe8   :  { %v4699_v48 = vpack.c.bf16 %v715_v42, %v710_v40  ;;  %v4701_v53 = vpack.c.bf16 %v726_v46, %v721_v45  ;;  %v725_v54 = vld [vmem:[%s9553_s1 + $0x1528] sm:$0xff]  ;;  %v774_v40 = vld [vmem:[%s9553_s1 + $0x16b0] sm:$0xff]  ;;  %v776_v42 = vld [vmem:[%s9553_s1 + $0x16c0] sm:$0xff] }
  0xe9   :  { %v768_v46 = vld [vmem:[%s9553_s1 + $0x1680] sm:$0xff] }
  0xea   :  { %4152 = vmatpush1.bf16.msra.mxu0 %v4151_v1  ;;  %4664 = vmatpush1.bf16.msra.mxu1 %v4663_v2  ;;  %v683_v1 = vld [vmem:[%s9553_s1 + $0x13d8] sm:$0xff]  ;;  %v680_v2 = vld [vmem:[%s9553_s1 + $0x13c0] sm:$0xff] }
  0xeb   :  { %4154 = vmatprep.subr.bf16.mxu0 %v4153_v3  ;;  %4666 = vmatprep.subr.bf16.mxu1 %v4665_v7  ;;  %v4685_v3 = vpack.c.bf16 %v686_v60, %v681_v59  ;;  %v691_v7 = vld [vmem:[%s9553_s1 + $0x1418] sm:$0xff]  ;;  %v4175_v9 = vpack.c.bf16 %v683_v1, %v678_v0  ;;  %v4687_v10 = vpack.c.bf16 %v685_v4, %v680_v2  ;;  %v730_v0 = vld [vmem:[%s9553_s1 + $0x1550] sm:$0xff]  ;;  %v744_v4 = vld [vmem:[%s9553_s1 + $0x15c0] sm:$0xff] }
  0xec   :  { %v4703_v60 = vpack.c.bf16 %v725_v54, %v720_v52  ;;  %v4705_v1 = vpack.c.bf16 %v736_v58, %v731_v57  ;;  %v735_v2 = vld [vmem:[%s9553_s1 + $0x1578] sm:$0xff]  ;;  %v784_v52 = vld [vmem:[%s9553_s1 + $0x1700] sm:$0xff]  ;;  %v786_v54 = vld [vmem:[%s9553_s1 + $0x1710] sm:$0xff] }
  0xed   :  { %v778_v58 = vld [vmem:[%s9553_s1 + $0x16d0] sm:$0xff] }
  0xee   :  { %4156 = vmatpush1.bf16.msra.mxu0 %v4155_v13  ;;  %4668 = vmatpush1.bf16.msra.mxu1 %v4667_v14  ;;  %v693_v13 = vld [vmem:[%s9553_s1 + $0x1428] sm:$0xff]  ;;  %v690_v14 = vld [vmem:[%s9553_s1 + $0x1410] sm:$0xff] }
  0xef   :  { %4158 = vmatprep.subr.bf16.mxu0 %v4157_v15  ;;  %4670 = vmatprep.subr.bf16.mxu1 %v4669_v19  ;;  %v4689_v15 = vpack.c.bf16 %v696_v8, %v691_v7  ;;  %v701_v19 = vld [vmem:[%s9553_s1 + $0x1468] sm:$0xff]  ;;  %v4179_v22 = vpack.c.bf16 %v693_v13, %v688_v12  ;;  %v4691_v23 = vpack.c.bf16 %v695_v16, %v690_v14  ;;  %v740_v12 = vld [vmem:[%s9553_s1 + $0x15a0] sm:$0xff]  ;;  %v754_v16 = vld [vmem:[%s9553_s1 + $0x1610] sm:$0xff] }
  0xf0   :  { %v4693_v28 = vpack.c.bf16 %v706_v20, %v701_v19  ;;  %v4707_v8 = vpack.c.bf16 %v735_v2, %v730_v0  ;;  %v4709_v13 = vpack.c.bf16 %v746_v6, %v741_v5  ;;  %v745_v14 = vld [vmem:[%s9553_s1 + $0x15c8] sm:$0xff]  ;;  %v794_v0 = vld [vmem:[%s9553_s1 + $0x1750] sm:$0xff]  ;;  %v796_v2 = vld [vmem:[%s9553_s1 + $0x1760] sm:$0xff] }
  0xf1   :  { %v4711_v20 = vpack.c.bf16 %v745_v14, %v740_v12  ;;  %v788_v6 = vld [vmem:[%s9553_s1 + $0x1720] sm:$0xff]  ;;  %v806_v14 = vld [vmem:[%s9553_s1 + $0x17b0] sm:$0xff] }
  0xf2   :  { %4160 = vmatpush1.bf16.msra.mxu0 %v4159_v25  ;;  %4672 = vmatpush1.bf16.msra.mxu1 %v4671_v26  ;;  %v698_v25 = vld [vmem:[%s9553_s1 + $0x1450] sm:$0xff]  ;;  %v703_v26 = vld [vmem:[%s9553_s1 + $0x1478] sm:$0xff]  ;;  %v804_v12 = vld [vmem:[%s9553_s1 + $0x17a0] sm:$0xff] }
  0xf3   :  { %4162 = vmatprep.subr.bf16.mxu0 %v4161_v27  ;;  %4674 = vmatprep.subr.bf16.mxu1 %v4673_v31  ;;  %v700_v27 = vld [vmem:[%s9553_s1 + $0x1460] sm:$0xff]  ;;  %v714_v31 = vld [vmem:[%s9553_s1 + $0x14d0] sm:$0xff]  ;;  %v4183_v35 = vpack.c.bf16 %v703_v26, %v698_v25  ;;  %v4713_v25 = vpack.c.bf16 %v756_v18, %v751_v17  ;;  %v755_v26 = vld [vmem:[%s9553_s1 + $0x1618] sm:$0xff] }
  0xf4   :  { %v4695_v36 = vpack.c.bf16 %v705_v29, %v700_v27  ;;  %v759_v27 = vld [vmem:[%s9553_s1 + $0x1638] sm:$0xff]  ;;  %v761_v29 = vld [vmem:[%s9553_s1 + $0x1648] sm:$0xff]  ;;  %v798_v18 = vld [vmem:[%s9553_s1 + $0x1770] sm:$0xff] }
  0xf6   :  { %4164 = vmatpush1.bf16.msra.mxu0 %v4163_v37  ;;  %4676 = vmatpush1.bf16.msra.mxu1 %v4675_v38  ;;  %v4185_v37 = vpack.c.bf16 %v714_v31, %v709_v30  ;;  %v708_v38 = vld [vmem:[%s9553_s1 + $0x14a0] sm:$0xff]  ;;  %v766_v30 = vld [vmem:[%s9553_s1 + $0x1670] sm:$0xff] }
  0xf7   :  { %4166 = vmatprep.subr.bf16.mxu0 %v4165_v39  ;;  %4678 = vmatprep.subr.bf16.mxu1 %v4677_v43  ;;  %v713_v39 = vld [vmem:[%s9553_s1 + $0x14c8] sm:$0xff]  ;;  %v719_v43 = vld [vmem:[%s9553_s1 + $0x14f8] sm:$0xff] }
  0xf8   :  { %v4187_v47 = vpack.c.bf16 %v713_v39, %v708_v38  ;;  %v765_v38 = vld [vmem:[%s9553_s1 + $0x1668] sm:$0xff] }
  0xf9   :  { %v769_v39 = vld [vmem:[%s9553_s1 + $0x1688] sm:$0xff] }
  0xfa   :  { %4168 = vmatpush1.bf16.msra.mxu0 %v4167_v49  ;;  %4680 = vmatpush1.bf16.msra.mxu1 %v4679_v50  ;;  %v4189_v49 = vpack.c.bf16 %v724_v44, %v719_v43  ;;  %v718_v50 = vld [vmem:[%s9553_s1 + $0x14f0] sm:$0xff]  ;;  %v4209_v45 = vpack.c.bf16 %v774_v40, %v769_v39 }
  0xfb   :  { %4170 = vmatprep.subr.bf16.mxu0 %v4169_v51  ;;  %4682 = vmatprep.subr.bf16.mxu1 %v4681_v55  ;;  %v723_v51 = vld [vmem:[%s9553_s1 + $0x1518] sm:$0xff]  ;;  %v729_v55 = vld [vmem:[%s9553_s1 + $0x1548] sm:$0xff] }
  0xfc   :  { %v4191_v59 = vpack.c.bf16 %v723_v51, %v718_v50  ;;  %v775_v50 = vld [vmem:[%s9553_s1 + $0x16b8] sm:$0xff] }
  0xfd   :  { %v779_v51 = vld [vmem:[%s9553_s1 + $0x16d8] sm:$0xff] }
  0xfe   :  { %4172 = vmatpush1.bf16.msra.mxu0 %v4171_v61  ;;  %4684 = vmatpush1.bf16.msra.mxu1 %v4683_v62  ;;  %v4193_v61 = vpack.c.bf16 %v734_v56, %v729_v55  ;;  %v728_v62 = vld [vmem:[%s9553_s1 + $0x1540] sm:$0xff]  ;;  %v4213_v57 = vpack.c.bf16 %v784_v52, %v779_v51 }
  0xff   :  { %4174 = vmatprep.subr.bf16.mxu0 %v4173_v63  ;;  %4686 = vmatprep.subr.bf16.mxu1 %v4685_v3  ;;  %v733_v63 = vld [vmem:[%s9553_s1 + $0x1568] sm:$0xff]  ;;  %v739_v3 = vld [vmem:[%s9553_s1 + $0x1598] sm:$0xff] }
 0x100   :  { %v4195_v7 = vpack.c.bf16 %v733_v63, %v728_v62  ;;  %v785_v62 = vld [vmem:[%s9553_s1 + $0x1708] sm:$0xff] }
 0x101   :  { %v789_v63 = vld [vmem:[%s9553_s1 + $0x1728] sm:$0xff] }
 0x102   :  { %4176 = vmatpush1.bf16.msra.mxu0 %v4175_v9  ;;  %4688 = vmatpush1.bf16.msra.mxu1 %v4687_v10  ;;  %v4197_v9 = vpack.c.bf16 %v744_v4, %v739_v3  ;;  %v738_v10 = vld [vmem:[%s9553_s1 + $0x1590] sm:$0xff]  ;;  %v4217_v5 = vpack.c.bf16 %v794_v0, %v789_v63 }
 0x103   :  { %4178 = vmatprep.subr.bf16.mxu0 %v4177_v11  ;;  %4690 = vmatprep.subr.bf16.mxu1 %v4689_v15  ;;  %v743_v11 = vld [vmem:[%s9553_s1 + $0x15b8] sm:$0xff]  ;;  %v749_v15 = vld [vmem:[%s9553_s1 + $0x15e8] sm:$0xff] }
 0x104   :  { %v4199_v19 = vpack.c.bf16 %v743_v11, %v738_v10  ;;  %v795_v10 = vld [vmem:[%s9553_s1 + $0x1758] sm:$0xff] }
 0x105   :  { %1633 = vmatmul.mubr.f32.vlgmr.msra.gmra.mrb[0].mxu0 %v38_v21  ;;  %2201 = vmatmul.mubr.f32.vlgmr.msra.gmra.mrb[0].mxu1 %v38_v21  ;;  %v4201_v21 = vpack.c.bf16 %v754_v16, %v749_v15  ;;  %v799_v11 = vld [vmem:[%s9553_s1 + $0x1778] sm:$0xff] }
 0x106   :  { %4180 = vmatpush1.bf16.msra.mxu0 %v4179_v22  ;;  %4692 = vmatpush1.bf16.msra.mxu1 %v4691_v23  ;;  %v748_v22 = vld [vmem:[%s9553_s1 + $0x15e0] sm:$0xff]  ;;  %v753_v23 = vld [vmem:[%s9553_s1 + $0x1608] sm:$0xff]  ;;  %v4221_v17 = vpack.c.bf16 %v804_v12, %v799_v11 }
 0x107   :  { %4182 = vmatprep.subr.bf16.mxu0 %v4181_v24  ;;  %4694 = vmatprep.subr.bf16.mxu1 %v4693_v28  ;;  %v750_v24 = vld [vmem:[%s9553_s1 + $0x15f0] sm:$0xff]  ;;  %v764_v28 = vld [vmem:[%s9553_s1 + $0x1660] sm:$0xff]  ;;  %v4203_v31 = vpack.c.bf16 %v753_v23, %v748_v22  ;;  %v805_v22 = vld [vmem:[%s9553_s1 + $0x17a8] sm:$0xff] }
 0x108   :  { %1703 = vmatprep.mubr.f32.mxu0 %v41_v34  ;;  %2271 = vmatprep.mubr.f32.mxu1 %v41_v34  ;;  %v4715_v32 = vpack.c.bf16 %v755_v26, %v750_v24  ;;  %v4205_v33 = vpack.c.bf16 %v764_v28, %v759_v27  ;;  %v758_v34 = vld [vmem:[%s9553_s1 + $0x1630] sm:$0xff]  ;;  %v809_v23 = vld [vmem:[%s9553_s1 + $0x17c8] sm:$0xff]  ;;  %v816_v26 = vld [vmem:[%s9553_s1 + $0x1800] sm:$0xff] }
 0x109   :  { %v814_v24 = vld [vmem:[%s9553_s1 + $0x17f0] sm:$0xff] }
 0x10a   :  { %4184 = vmatpush1.bf16.msra.mxu0 %v4183_v35  ;;  %4696 = vmatpush1.bf16.msra.mxu1 %v4695_v36  ;;  %v763_v35 = vld [vmem:[%s9553_s1 + $0x1658] sm:$0xff]  ;;  %v760_v36 = vld [vmem:[%s9553_s1 + $0x1640] sm:$0xff] }
 0x10b   :  { %4186 = vmatprep.subr.bf16.mxu0 %v4185_v37  ;;  %4698 = vmatprep.subr.bf16.mxu1 %v4697_v41  ;;  %v4717_v37 = vpack.c.bf16 %v766_v30, %v761_v29  ;;  %v771_v41 = vld [vmem:[%s9553_s1 + $0x1698] sm:$0xff]  ;;  %v4207_v43 = vpack.c.bf16 %v763_v35, %v758_v34  ;;  %v4719_v44 = vpack.c.bf16 %v765_v38, %v760_v36  ;;  %v808_v30 = vld [vmem:[%s9553_s1 + $0x17c0] sm:$0xff]  ;;  %v826_v38 = vld [vmem:[%s9553_s1 + $0x1850] sm:$0xff] }
 0x10c   :  { %v4225_v29 = vpack.c.bf16 %v814_v24, %v809_v23  ;;  %v815_v34 = vld [vmem:[%s9553_s1 + $0x17f8] sm:$0xff]  ;;  %v824_v36 = vld [vmem:[%s9553_s1 + $0x1840] sm:$0xff] }
 0x10d   :  { %v819_v35 = vld [vmem:[%s9553_s1 + $0x1818] sm:$0xff]  ;;  %v40_v23 = vld [vmem:[%s9554_s0 + $0x40] sm:$0xff] }
 0x10e   :  { %4188 = vmatpush1.bf16.msra.mxu0 %v4187_v47  ;;  %4700 = vmatpush1.bf16.msra.mxu1 %v4699_v48  ;;  %v773_v47 = vld [vmem:[%s9553_s1 + $0x16a8] sm:$0xff]  ;;  %v770_v48 = vld [vmem:[%s9553_s1 + $0x1690] sm:$0xff] }
 0x10f   :  { %4190 = vmatprep.subr.bf16.mxu0 %v4189_v49  ;;  %4702 = vmatprep.subr.bf16.mxu1 %v4701_v53  ;;  %v4721_v49 = vpack.c.bf16 %v776_v42, %v771_v41  ;;  %v781_v53 = vld [vmem:[%s9553_s1 + $0x16e8] sm:$0xff]  ;;  %v4211_v55 = vpack.c.bf16 %v773_v47, %v768_v46  ;;  %v4723_v56 = vpack.c.bf16 %v775_v50, %v770_v48  ;;  %v818_v42 = vld [vmem:[%s9553_s1 + $0x1810] sm:$0xff]  ;;  %v836_v50 = vld [vmem:[%s9553_s1 + $0x18a0] sm:$0xff] }
 0x110   :  { %v4229_v41 = vpack.c.bf16 %v824_v36, %v819_v35  ;;  %v825_v46 = vld [vmem:[%s9553_s1 + $0x1848] sm:$0xff]  ;;  %v834_v48 = vld [vmem:[%s9553_s1 + $0x1890] sm:$0xff]  ;;  %v876_v35 = vld [vmem:[%s9553_s1 + $0x19e0] sm:$0xff] }
 0x111   :  { %v829_v47 = vld [vmem:[%s9553_s1 + $0x1868] sm:$0xff]  ;;  %v43_v36 = vld [vmem:[%s9554_s0 + $0x58] sm:$0xff] }
 0x112   :  { %4192 = vmatpush1.bf16.msra.mxu0 %v4191_v59  ;;  %4704 = vmatpush1.bf16.msra.mxu1 %v4703_v60  ;;  %v783_v59 = vld [vmem:[%s9553_s1 + $0x16f8] sm:$0xff]  ;;  %v780_v60 = vld [vmem:[%s9553_s1 + $0x16e0] sm:$0xff] }
 0x113   :  { %4194 = vmatprep.subr.bf16.mxu0 %v4193_v61  ;;  %4706 = vmatprep.subr.bf16.mxu1 %v4705_v1  ;;  %v4725_v61 = vpack.c.bf16 %v786_v54, %v781_v53  ;;  %v791_v1 = vld [vmem:[%s9553_s1 + $0x1738] sm:$0xff]  ;;  %v4215_v3 = vpack.c.bf16 %v783_v59, %v778_v58  ;;  %v4727_v4 = vpack.c.bf16 %v785_v62, %v780_v60  ;;  %v828_v54 = vld [vmem:[%s9553_s1 + $0x1860] sm:$0xff]  ;;  %v846_v62 = vld [vmem:[%s9553_s1 + $0x18f0] sm:$0xff] }
 0x114   :  { %v4233_v53 = vpack.c.bf16 %v834_v48, %v829_v47  ;;  %v835_v58 = vld [vmem:[%s9553_s1 + $0x1898] sm:$0xff]  ;;  %v844_v60 = vld [vmem:[%s9553_s1 + $0x18e0] sm:$0xff]  ;;  %v881_v47 = vld [vmem:[%s9553_s1 + $0x1a08] sm:$0xff] }
 0x115   :  { %v839_v59 = vld [vmem:[%s9553_s1 + $0x18b8] sm:$0xff]  ;;  %v886_v48 = vld [vmem:[%s9553_s1 + $0x1a30] sm:$0xff] }
 0x116   :  { %4196 = vmatpush1.bf16.msra.mxu0 %v4195_v7  ;;  %4708 = vmatpush1.bf16.msra.mxu1 %v4707_v8  ;;  %v793_v7 = vld [vmem:[%s9553_s1 + $0x1748] sm:$0xff]  ;;  %v790_v8 = vld [vmem:[%s9553_s1 + $0x1730] sm:$0xff] }
 0x117   :  { %4198 = vmatprep.subr.bf16.mxu0 %v4197_v9  ;;  %4710 = vmatprep.subr.bf16.mxu1 %v4709_v13  ;;  %v4729_v9 = vpack.c.bf16 %v796_v2, %v791_v1  ;;  %v801_v13 = vld [vmem:[%s9553_s1 + $0x1788] sm:$0xff]  ;;  %v4219_v15 = vpack.c.bf16 %v793_v7, %v788_v6  ;;  %v4731_v16 = vpack.c.bf16 %v795_v10, %v790_v8  ;;  %v838_v2 = vld [vmem:[%s9553_s1 + $0x18b0] sm:$0xff]  ;;  %v856_v10 = vld [vmem:[%s9553_s1 + $0x1940] sm:$0xff] }
 0x118   :  { %v4237_v1 = vpack.c.bf16 %v844_v60, %v839_v59  ;;  %v845_v6 = vld [vmem:[%s9553_s1 + $0x18e8] sm:$0xff]  ;;  %v854_v8 = vld [vmem:[%s9553_s1 + $0x1930] sm:$0xff]  ;;  %v891_v59 = vld [vmem:[%s9553_s1 + $0x1a58] sm:$0xff] }
 0x119   :  { %v849_v7 = vld [vmem:[%s9553_s1 + $0x1908] sm:$0xff]  ;;  %v896_v60 = vld [vmem:[%s9553_s1 + $0x1a80] sm:$0xff] }
 0x11a   :  { %4200 = vmatpush1.bf16.msra.mxu0 %v4199_v19  ;;  %4712 = vmatpush1.bf16.msra.mxu1 %v4711_v20  ;;  %v803_v19 = vld [vmem:[%s9553_s1 + $0x1798] sm:$0xff]  ;;  %v800_v20 = vld [vmem:[%s9553_s1 + $0x1780] sm:$0xff] }
 0x11b   :  { %4202 = vmatprep.subr.bf16.mxu0 %v4201_v21  ;;  %4714 = vmatprep.subr.bf16.mxu1 %v4713_v25  ;;  %v4733_v21 = vpack.c.bf16 %v806_v14, %v801_v13  ;;  %v811_v25 = vld [vmem:[%s9553_s1 + $0x17d8] sm:$0xff]  ;;  %v4223_v27 = vpack.c.bf16 %v803_v19, %v798_v18  ;;  %v4735_v28 = vpack.c.bf16 %v805_v22, %v800_v20  ;;  %v848_v14 = vld [vmem:[%s9553_s1 + $0x1900] sm:$0xff]  ;;  %v866_v22 = vld [vmem:[%s9553_s1 + $0x1990] sm:$0xff] }
 0x11c   :  { %v4241_v13 = vpack.c.bf16 %v854_v8, %v849_v7  ;;  %v855_v18 = vld [vmem:[%s9553_s1 + $0x1938] sm:$0xff]  ;;  %v864_v20 = vld [vmem:[%s9553_s1 + $0x1980] sm:$0xff]  ;;  %v901_v7 = vld [vmem:[%s9553_s1 + $0x1aa8] sm:$0xff] }
 0x11d   :  { %v859_v19 = vld [vmem:[%s9553_s1 + $0x1958] sm:$0xff]  ;;  %v906_v8 = vld [vmem:[%s9553_s1 + $0x1ad0] sm:$0xff] }
 0x11e   :  { %4204 = vmatpush1.bf16.msra.mxu0 %v4203_v31  ;;  %4716 = vmatpush1.bf16.msra.mxu1 %v4715_v32  ;;  %v813_v31 = vld [vmem:[%s9553_s1 + $0x17e8] sm:$0xff]  ;;  %v810_v32 = vld [vmem:[%s9553_s1 + $0x17d0] sm:$0xff] }
 0x11f   :  { %4206 = vmatprep.subr.bf16.mxu0 %v4205_v33  ;;  %4718 = vmatprep.subr.bf16.mxu1 %v4717_v37  ;;  %v4737_v33 = vpack.c.bf16 %v816_v26, %v811_v25  ;;  %v821_v37 = vld [vmem:[%s9553_s1 + $0x1828] sm:$0xff]  ;;  %v4227_v39 = vpack.c.bf16 %v813_v31, %v808_v30  ;;  %v4739_v40 = vpack.c.bf16 %v815_v34, %v810_v32  ;;  %v871_v34 = vld [vmem:[%s9553_s1 + $0x19b8] sm:$0xff] }
 0x120   :  { %v4245_v26 = vpack.c.bf16 %v864_v20, %v859_v19  ;;  %v865_v31 = vld [vmem:[%s9553_s1 + $0x1988] sm:$0xff]  ;;  %v911_v19 = vld [vmem:[%s9553_s1 + $0x1af8] sm:$0xff]  ;;  %v916_v20 = vld [vmem:[%s9553_s1 + $0x1b20] sm:$0xff] }
 0x121   :  { %v869_v32 = vld [vmem:[%s9553_s1 + $0x19a8] sm:$0xff] }
 0x122   :  { %4208 = vmatpush1.bf16.msra.mxu0 %v4207_v43  ;;  %4720 = vmatpush1.bf16.msra.mxu1 %v4719_v44  ;;  %v823_v43 = vld [vmem:[%s9553_s1 + $0x1838] sm:$0xff]  ;;  %v820_v44 = vld [vmem:[%s9553_s1 + $0x1820] sm:$0xff] }
 0x123   :  { %4210 = vmatprep.subr.bf16.mxu0 %v4209_v45  ;;  %4722 = vmatprep.subr.bf16.mxu1 %v4721_v49  ;;  %v4741_v45 = vpack.c.bf16 %v826_v38, %v821_v37  ;;  %v831_v49 = vld [vmem:[%s9553_s1 + $0x1878] sm:$0xff]  ;;  %v4231_v51 = vpack.c.bf16 %v823_v43, %v818_v42  ;;  %v4743_v52 = vpack.c.bf16 %v825_v46, %v820_v44  ;;  %v870_v42 = vld [vmem:[%s9553_s1 + $0x19b0] sm:$0xff]  ;;  %v884_v46 = vld [vmem:[%s9553_s1 + $0x1a20] sm:$0xff] }
 0x124   :  { %v4761_v43 = vpack.c.bf16 %v876_v35, %v871_v34  ;;  %v875_v44 = vld [vmem:[%s9553_s1 + $0x19d8] sm:$0xff] }
 0x126   :  { %4212 = vmatpush1.bf16.msra.mxu0 %v4211_v55  ;;  %4724 = vmatpush1.bf16.msra.mxu1 %v4723_v56  ;;  %v833_v55 = vld [vmem:[%s9553_s1 + $0x1888] sm:$0xff]  ;;  %v830_v56 = vld [vmem:[%s9553_s1 + $0x1870] sm:$0xff] }
 0x127   :  { %4214 = vmatprep.subr.bf16.mxu0 %v4213_v57  ;;  %4726 = vmatprep.subr.bf16.mxu1 %v4725_v61  ;;  %v4745_v57 = vpack.c.bf16 %v836_v50, %v831_v49  ;;  %v841_v61 = vld [vmem:[%s9553_s1 + $0x18c8] sm:$0xff]  ;;  %v4235_v63 = vpack.c.bf16 %v833_v55, %v828_v54  ;;  %v4747_v0 = vpack.c.bf16 %v835_v58, %v830_v56  ;;  %v880_v54 = vld [vmem:[%s9553_s1 + $0x1a00] sm:$0xff]  ;;  %v894_v58 = vld [vmem:[%s9553_s1 + $0x1a70] sm:$0xff] }
 0x128   :  { %v4763_v50 = vpack.c.bf16 %v875_v44, %v870_v42  ;;  %v4765_v55 = vpack.c.bf16 %v886_v48, %v881_v47  ;;  %v885_v56 = vld [vmem:[%s9553_s1 + $0x1a28] sm:$0xff]  ;;  %v934_v42 = vld [vmem:[%s9553_s1 + $0x1bb0] sm:$0xff]  ;;  %v936_v44 = vld [vmem:[%s9553_s1 + $0x1bc0] sm:$0xff] }
 0x129   :  { %v928_v48 = vld [vmem:[%s9553_s1 + $0x1b80] sm:$0xff] }
 0x12a   :  { %4216 = vmatpush1.bf16.msra.mxu0 %v4215_v3  ;;  %4728 = vmatpush1.bf16.msra.mxu1 %v4727_v4  ;;  %v843_v3 = vld [vmem:[%s9553_s1 + $0x18d8] sm:$0xff]  ;;  %v840_v4 = vld [vmem:[%s9553_s1 + $0x18c0] sm:$0xff] }
 0x12b   :  { %4218 = vmatprep.subr.bf16.mxu0 %v4217_v5  ;;  %4730 = vmatprep.subr.bf16.mxu1 %v4729_v9  ;;  %v4749_v5 = vpack.c.bf16 %v846_v62, %v841_v61  ;;  %v851_v9 = vld [vmem:[%s9553_s1 + $0x1918] sm:$0xff]  ;;  %v4239_v11 = vpack.c.bf16 %v843_v3, %v838_v2  ;;  %v4751_v12 = vpack.c.bf16 %v845_v6, %v840_v4  ;;  %v890_v2 = vld [vmem:[%s9553_s1 + $0x1a50] sm:$0xff]  ;;  %v904_v6 = vld [vmem:[%s9553_s1 + $0x1ac0] sm:$0xff] }
 0x12c   :  { %v4767_v62 = vpack.c.bf16 %v885_v56, %v880_v54  ;;  %v4769_v3 = vpack.c.bf16 %v896_v60, %v891_v59  ;;  %v895_v4 = vld [vmem:[%s9553_s1 + $0x1a78] sm:$0xff]  ;;  %v944_v54 = vld [vmem:[%s9553_s1 + $0x1c00] sm:$0xff]  ;;  %v946_v56 = vld [vmem:[%s9553_s1 + $0x1c10] sm:$0xff] }
 0x12d   :  { %v938_v60 = vld [vmem:[%s9553_s1 + $0x1bd0] sm:$0xff] }
 0x12e   :  { %4220 = vmatpush1.bf16.msra.mxu0 %v4219_v15  ;;  %4732 = vmatpush1.bf16.msra.mxu1 %v4731_v16  ;;  %v853_v15 = vld [vmem:[%s9553_s1 + $0x1928] sm:$0xff]  ;;  %v850_v16 = vld [vmem:[%s9553_s1 + $0x1910] sm:$0xff] }
 0x12f   :  { %4222 = vmatprep.subr.bf16.mxu0 %v4221_v17  ;;  %4734 = vmatprep.subr.bf16.mxu1 %v4733_v21  ;;  %v4753_v17 = vpack.c.bf16 %v856_v10, %v851_v9  ;;  %v861_v21 = vld [vmem:[%s9553_s1 + $0x1968] sm:$0xff]  ;;  %v4243_v24 = vpack.c.bf16 %v853_v15, %v848_v14  ;;  %v4755_v25 = vpack.c.bf16 %v855_v18, %v850_v16  ;;  %v900_v14 = vld [vmem:[%s9553_s1 + $0x1aa0] sm:$0xff]  ;;  %v914_v18 = vld [vmem:[%s9553_s1 + $0x1b10] sm:$0xff] }
 0x130   :  { %v4757_v30 = vpack.c.bf16 %v866_v22, %v861_v21  ;;  %v4771_v10 = vpack.c.bf16 %v895_v4, %v890_v2  ;;  %v4773_v15 = vpack.c.bf16 %v906_v8, %v901_v7  ;;  %v905_v16 = vld [vmem:[%s9553_s1 + $0x1ac8] sm:$0xff]  ;;  %v954_v2 = vld [vmem:[%s9553_s1 + $0x1c50] sm:$0xff]  ;;  %v956_v4 = vld [vmem:[%s9553_s1 + $0x1c60] sm:$0xff] }
 0x131   :  { %v4775_v22 = vpack.c.bf16 %v905_v16, %v900_v14  ;;  %v948_v8 = vld [vmem:[%s9553_s1 + $0x1c20] sm:$0xff]  ;;  %v966_v16 = vld [vmem:[%s9553_s1 + $0x1cb0] sm:$0xff] }
 0x132   :  { %4224 = vmatpush1.bf16.msra.mxu0 %v4223_v27  ;;  %4736 = vmatpush1.bf16.msra.mxu1 %v4735_v28  ;;  %v858_v27 = vld [vmem:[%s9553_s1 + $0x1950] sm:$0xff]  ;;  %v863_v28 = vld [vmem:[%s9553_s1 + $0x1978] sm:$0xff]  ;;  %v964_v14 = vld [vmem:[%s9553_s1 + $0x1ca0] sm:$0xff] }
 0x133   :  { %4226 = vmatprep.subr.bf16.mxu0 %v4225_v29  ;;  %4738 = vmatprep.subr.bf16.mxu1 %v4737_v33  ;;  %v860_v29 = vld [vmem:[%s9553_s1 + $0x1960] sm:$0xff]  ;;  %v874_v33 = vld [vmem:[%s9553_s1 + $0x19d0] sm:$0xff]  ;;  %v4247_v37 = vpack.c.bf16 %v863_v28, %v858_v27  ;;  %v4777_v27 = vpack.c.bf16 %v916_v20, %v911_v19  ;;  %v915_v28 = vld [vmem:[%s9553_s1 + $0x1b18] sm:$0xff] }
 0x134   :  { %v4759_v38 = vpack.c.bf16 %v865_v31, %v860_v29  ;;  %v919_v29 = vld [vmem:[%s9553_s1 + $0x1b38] sm:$0xff]  ;;  %v921_v31 = vld [vmem:[%s9553_s1 + $0x1b48] sm:$0xff]  ;;  %v958_v20 = vld [vmem:[%s9553_s1 + $0x1c70] sm:$0xff] }
 0x136   :  { %4228 = vmatpush1.bf16.msra.mxu0 %v4227_v39  ;;  %4740 = vmatpush1.bf16.msra.mxu1 %v4739_v40  ;;  %v4249_v39 = vpack.c.bf16 %v874_v33, %v869_v32  ;;  %v868_v40 = vld [vmem:[%s9553_s1 + $0x19a0] sm:$0xff]  ;;  %v926_v32 = vld [vmem:[%s9553_s1 + $0x1b70] sm:$0xff] }
 0x137   :  { %4230 = vmatprep.subr.bf16.mxu0 %v4229_v41  ;;  %4742 = vmatprep.subr.bf16.mxu1 %v4741_v45  ;;  %v873_v41 = vld [vmem:[%s9553_s1 + $0x19c8] sm:$0xff]  ;;  %v879_v45 = vld [vmem:[%s9553_s1 + $0x19f8] sm:$0xff] }
 0x138   :  { %v4251_v49 = vpack.c.bf16 %v873_v41, %v868_v40  ;;  %v925_v40 = vld [vmem:[%s9553_s1 + $0x1b68] sm:$0xff] }
 0x139   :  { %v929_v41 = vld [vmem:[%s9553_s1 + $0x1b88] sm:$0xff] }
 0x13a   :  { %4232 = vmatpush1.bf16.msra.mxu0 %v4231_v51  ;;  %4744 = vmatpush1.bf16.msra.mxu1 %v4743_v52  ;;  %v4253_v51 = vpack.c.bf16 %v884_v46, %v879_v45  ;;  %v878_v52 = vld [vmem:[%s9553_s1 + $0x19f0] sm:$0xff]  ;;  %v4273_v47 = vpack.c.bf16 %v934_v42, %v929_v41 }
 0x13b   :  { %4234 = vmatprep.subr.bf16.mxu0 %v4233_v53  ;;  %4746 = vmatprep.subr.bf16.mxu1 %v4745_v57  ;;  %v883_v53 = vld [vmem:[%s9553_s1 + $0x1a18] sm:$0xff]  ;;  %v889_v57 = vld [vmem:[%s9553_s1 + $0x1a48] sm:$0xff] }
 0x13c   :  { %v4255_v61 = vpack.c.bf16 %v883_v53, %v878_v52  ;;  %v935_v52 = vld [vmem:[%s9553_s1 + $0x1bb8] sm:$0xff] }
 0x13d   :  { %v939_v53 = vld [vmem:[%s9553_s1 + $0x1bd8] sm:$0xff] }
 0x13e   :  { %4236 = vmatpush1.bf16.msra.mxu0 %v4235_v63  ;;  %4748 = vmatpush1.bf16.msra.mxu1 %v4747_v0  ;;  %v4257_v63 = vpack.c.bf16 %v894_v58, %v889_v57  ;;  %v888_v0 = vld [vmem:[%s9553_s1 + $0x1a40] sm:$0xff]  ;;  %v4277_v59 = vpack.c.bf16 %v944_v54, %v939_v53 }
 0x13f   :  { %4238 = vmatprep.subr.bf16.mxu0 %v4237_v1  ;;  %4750 = vmatprep.subr.bf16.mxu1 %v4749_v5  ;;  %v893_v1 = vld [vmem:[%s9553_s1 + $0x1a68] sm:$0xff]  ;;  %v899_v5 = vld [vmem:[%s9553_s1 + $0x1a98] sm:$0xff] }
 0x140   :  { %v4259_v9 = vpack.c.bf16 %v893_v1, %v888_v0  ;;  %v945_v0 = vld [vmem:[%s9553_s1 + $0x1c08] sm:$0xff] }
 0x141   :  { %v949_v1 = vld [vmem:[%s9553_s1 + $0x1c28] sm:$0xff] }
 0x142   :  { %4240 = vmatpush1.bf16.msra.mxu0 %v4239_v11  ;;  %4752 = vmatpush1.bf16.msra.mxu1 %v4751_v12  ;;  %v4261_v11 = vpack.c.bf16 %v904_v6, %v899_v5  ;;  %v898_v12 = vld [vmem:[%s9553_s1 + $0x1a90] sm:$0xff]  ;;  %v4281_v7 = vpack.c.bf16 %v954_v2, %v949_v1 }
 0x143   :  { %4242 = vmatprep.subr.bf16.mxu0 %v4241_v13  ;;  %4754 = vmatprep.subr.bf16.mxu1 %v4753_v17  ;;  %v903_v13 = vld [vmem:[%s9553_s1 + $0x1ab8] sm:$0xff]  ;;  %v909_v17 = vld [vmem:[%s9553_s1 + $0x1ae8] sm:$0xff] }
 0x144   :  { %v4263_v21 = vpack.c.bf16 %v903_v13, %v898_v12  ;;  %v955_v12 = vld [vmem:[%s9553_s1 + $0x1c58] sm:$0xff] }
 0x145   :  { %1704 = vmatmul.mubr.f32.vlgmr.msra.gmra.mrb[0].mxu0 %v40_v23  ;;  %2272 = vmatmul.mubr.f32.vlgmr.msra.gmra.mrb[0].mxu1 %v40_v23  ;;  %v4265_v23 = vpack.c.bf16 %v914_v18, %v909_v17  ;;  %v959_v13 = vld [vmem:[%s9553_s1 + $0x1c78] sm:$0xff] }
 0x146   :  { %4244 = vmatpush1.bf16.msra.mxu0 %v4243_v24  ;;  %4756 = vmatpush1.bf16.msra.mxu1 %v4755_v25  ;;  %v908_v24 = vld [vmem:[%s9553_s1 + $0x1ae0] sm:$0xff]  ;;  %v913_v25 = vld [vmem:[%s9553_s1 + $0x1b08] sm:$0xff]  ;;  %v4285_v19 = vpack.c.bf16 %v964_v14, %v959_v13 }
 0x147   :  { %4246 = vmatprep.subr.bf16.mxu0 %v4245_v26  ;;  %4758 = vmatprep.subr.bf16.mxu1 %v4757_v30  ;;  %v910_v26 = vld [vmem:[%s9553_s1 + $0x1af0] sm:$0xff]  ;;  %v924_v30 = vld [vmem:[%s9553_s1 + $0x1b60] sm:$0xff]  ;;  %v4267_v33 = vpack.c.bf16 %v913_v25, %v908_v24  ;;  %v965_v24 = vld [vmem:[%s9553_s1 + $0x1ca8] sm:$0xff] }
 0x148   :  { %1774 = vmatprep.mubr.f32.mxu0 %v43_v36  ;;  %2342 = vmatprep.mubr.f32.mxu1 %v43_v36  ;;  %v4779_v34 = vpack.c.bf16 %v915_v28, %v910_v26  ;;  %v4269_v35 = vpack.c.bf16 %v924_v30, %v919_v29  ;;  %v918_v36 = vld [vmem:[%s9553_s1 + $0x1b30] sm:$0xff]  ;;  %v969_v25 = vld [vmem:[%s9553_s1 + $0x1cc8] sm:$0xff]  ;;  %v976_v28 = vld [vmem:[%s9553_s1 + $0x1d00] sm:$0xff] }
 0x149   :  { %v974_v26 = vld [vmem:[%s9553_s1 + $0x1cf0] sm:$0xff] }
 0x14a   :  { %4248 = vmatpush1.bf16.msra.mxu0 %v4247_v37  ;;  %4760 = vmatpush1.bf16.msra.mxu1 %v4759_v38  ;;  %v923_v37 = vld [vmem:[%s9553_s1 + $0x1b58] sm:$0xff]  ;;  %v920_v38 = vld [vmem:[%s9553_s1 + $0x1b40] sm:$0xff] }
 0x14b   :  { %4250 = vmatprep.subr.bf16.mxu0 %v4249_v39  ;;  %4762 = vmatprep.subr.bf16.mxu1 %v4761_v43  ;;  %v4781_v39 = vpack.c.bf16 %v926_v32, %v921_v31  ;;  %v931_v43 = vld [vmem:[%s9553_s1 + $0x1b98] sm:$0xff]  ;;  %v4271_v45 = vpack.c.bf16 %v923_v37, %v918_v36  ;;  %v4783_v46 = vpack.c.bf16 %v925_v40, %v920_v38  ;;  %v968_v32 = vld [vmem:[%s9553_s1 + $0x1cc0] sm:$0xff]  ;;  %v986_v40 = vld [vmem:[%s9553_s1 + $0x1d50] sm:$0xff] }
 0x14c   :  { %v4289_v31 = vpack.c.bf16 %v974_v26, %v969_v25  ;;  %v975_v36 = vld [vmem:[%s9553_s1 + $0x1cf8] sm:$0xff]  ;;  %v984_v38 = vld [vmem:[%s9553_s1 + $0x1d40] sm:$0xff]  ;;  %v42_v25 = vld [vmem:[%s9554_s0 + $0x50] sm:$0xff] }
 0x14d   :  { %v979_v37 = vld [vmem:[%s9553_s1 + $0x1d18] sm:$0xff] }
 0x14e   :  { %4252 = vmatpush1.bf16.msra.mxu0 %v4251_v49  ;;  %4764 = vmatpush1.bf16.msra.mxu1 %v4763_v50  ;;  %v933_v49 = vld [vmem:[%s9553_s1 + $0x1ba8] sm:$0xff]  ;;  %v930_v50 = vld [vmem:[%s9553_s1 + $0x1b90] sm:$0xff] }
 0x14f   :  { %4254 = vmatprep.subr.bf16.mxu0 %v4253_v51  ;;  %4766 = vmatprep.subr.bf16.mxu1 %v4765_v55  ;;  %v4785_v51 = vpack.c.bf16 %v936_v44, %v931_v43  ;;  %v941_v55 = vld [vmem:[%s9553_s1 + $0x1be8] sm:$0xff]  ;;  %v4275_v57 = vpack.c.bf16 %v933_v49, %v928_v48  ;;  %v4787_v58 = vpack.c.bf16 %v935_v52, %v930_v50  ;;  %v978_v44 = vld [vmem:[%s9553_s1 + $0x1d10] sm:$0xff]  ;;  %v996_v52 = vld [vmem:[%s9553_s1 + $0x1da0] sm:$0xff] }
 0x150   :  { %v4293_v43 = vpack.c.bf16 %v984_v38, %v979_v37  ;;  %v985_v48 = vld [vmem:[%s9553_s1 + $0x1d48] sm:$0xff]  ;;  %v994_v50 = vld [vmem:[%s9553_s1 + $0x1d90] sm:$0xff]  ;;  %v1036_v37 = vld [vmem:[%s9553_s1 + $0x1ee0] sm:$0xff] }
 0x151   :  { %v989_v49 = vld [vmem:[%s9553_s1 + $0x1d68] sm:$0xff] }
 0x152   :  { %4256 = vmatpush1.bf16.msra.mxu0 %v4255_v61  ;;  %4768 = vmatpush1.bf16.msra.mxu1 %v4767_v62  ;;  %v943_v61 = vld [vmem:[%s9553_s1 + $0x1bf8] sm:$0xff]  ;;  %v940_v62 = vld [vmem:[%s9553_s1 + $0x1be0] sm:$0xff]  ;;  %v45_v38 = vld [vmem:[%s9554_s0 + $0x68] sm:$0xff] }
 0x153   :  { %4258 = vmatprep.subr.bf16.mxu0 %v4257_v63  ;;  %4770 = vmatprep.subr.bf16.mxu1 %v4769_v3  ;;  %v4789_v63 = vpack.c.bf16 %v946_v56, %v941_v55  ;;  %v951_v3 = vld [vmem:[%s9553_s1 + $0x1c38] sm:$0xff]  ;;  %v4279_v5 = vpack.c.bf16 %v943_v61, %v938_v60  ;;  %v4791_v6 = vpack.c.bf16 %v945_v0, %v940_v62  ;;  %v988_v56 = vld [vmem:[%s9553_s1 + $0x1d60] sm:$0xff]  ;;  %v1006_v0 = vld [vmem:[%s9553_s1 + $0x1df0] sm:$0xff] }
 0x154   :  { %v4297_v55 = vpack.c.bf16 %v994_v50, %v989_v49  ;;  %v995_v60 = vld [vmem:[%s9553_s1 + $0x1d98] sm:$0xff]  ;;  %v1004_v62 = vld [vmem:[%s9553_s1 + $0x1de0] sm:$0xff]  ;;  %v1041_v49 = vld [vmem:[%s9553_s1 + $0x1f08] sm:$0xff] }
 0x155   :  { %v999_v61 = vld [vmem:[%s9553_s1 + $0x1db8] sm:$0xff]  ;;  %v1046_v50 = vld [vmem:[%s9553_s1 + $0x1f30] sm:$0xff] }
 0x156   :  { %4260 = vmatpush1.bf16.msra.mxu0 %v4259_v9  ;;  %4772 = vmatpush1.bf16.msra.mxu1 %v4771_v10  ;;  %v953_v9 = vld [vmem:[%s9553_s1 + $0x1c48] sm:$0xff]  ;;  %v950_v10 = vld [vmem:[%s9553_s1 + $0x1c30] sm:$0xff] }
 0x157   :  { %4262 = vmatprep.subr.bf16.mxu0 %v4261_v11  ;;  %4774 = vmatprep.subr.bf16.mxu1 %v4773_v15  ;;  %v4793_v11 = vpack.c.bf16 %v956_v4, %v951_v3  ;;  %v961_v15 = vld [vmem:[%s9553_s1 + $0x1c88] sm:$0xff]  ;;  %v4283_v17 = vpack.c.bf16 %v953_v9, %v948_v8  ;;  %v4795_v18 = vpack.c.bf16 %v955_v12, %v950_v10  ;;  %v998_v4 = vld [vmem:[%s9553_s1 + $0x1db0] sm:$0xff]  ;;  %v1016_v12 = vld [vmem:[%s9553_s1 + $0x1e40] sm:$0xff] }
 0x158   :  { %v4301_v3 = vpack.c.bf16 %v1004_v62, %v999_v61  ;;  %v1005_v8 = vld [vmem:[%s9553_s1 + $0x1de8] sm:$0xff]  ;;  %v1014_v10 = vld [vmem:[%s9553_s1 + $0x1e30] sm:$0xff]  ;;  %v1051_v61 = vld [vmem:[%s9553_s1 + $0x1f58] sm:$0xff] }
 0x159   :  { %v1009_v9 = vld [vmem:[%s9553_s1 + $0x1e08] sm:$0xff]  ;;  %v1056_v62 = vld [vmem:[%s9553_s1 + $0x1f80] sm:$0xff] }
 0x15a   :  { %4264 = vmatpush1.bf16.msra.mxu0 %v4263_v21  ;;  %4776 = vmatpush1.bf16.msra.mxu1 %v4775_v22  ;;  %v963_v21 = vld [vmem:[%s9553_s1 + $0x1c98] sm:$0xff]  ;;  %v960_v22 = vld [vmem:[%s9553_s1 + $0x1c80] sm:$0xff] }
 0x15b   :  { %4266 = vmatprep.subr.bf16.mxu0 %v4265_v23  ;;  %4778 = vmatprep.subr.bf16.mxu1 %v4777_v27  ;;  %v4797_v23 = vpack.c.bf16 %v966_v16, %v961_v15  ;;  %v971_v27 = vld [vmem:[%s9553_s1 + $0x1cd8] sm:$0xff]  ;;  %v4287_v29 = vpack.c.bf16 %v963_v21, %v958_v20  ;;  %v4799_v30 = vpack.c.bf16 %v965_v24, %v960_v22  ;;  %v1008_v16 = vld [vmem:[%s9553_s1 + $0x1e00] sm:$0xff]  ;;  %v1026_v24 = vld [vmem:[%s9553_s1 + $0x1e90] sm:$0xff] }
 0x15c   :  { %v4305_v15 = vpack.c.bf16 %v1014_v10, %v1009_v9  ;;  %v1015_v20 = vld [vmem:[%s9553_s1 + $0x1e38] sm:$0xff]  ;;  %v1024_v22 = vld [vmem:[%s9553_s1 + $0x1e80] sm:$0xff]  ;;  %v1061_v9 = vld [vmem:[%s9553_s1 + $0x1fa8] sm:$0xff] }
 0x15d   :  { %v1019_v21 = vld [vmem:[%s9553_s1 + $0x1e58] sm:$0xff]  ;;  %v1066_v10 = vld [vmem:[%s9553_s1 + $0x1fd0] sm:$0xff] }
 0x15e   :  { %4268 = vmatpush1.bf16.msra.mxu0 %v4267_v33  ;;  %4780 = vmatpush1.bf16.msra.mxu1 %v4779_v34  ;;  %v973_v33 = vld [vmem:[%s9553_s1 + $0x1ce8] sm:$0xff]  ;;  %v970_v34 = vld [vmem:[%s9553_s1 + $0x1cd0] sm:$0xff] }
 0x15f   :  { %4270 = vmatprep.subr.bf16.mxu0 %v4269_v35  ;;  %4782 = vmatprep.subr.bf16.mxu1 %v4781_v39  ;;  %v4801_v35 = vpack.c.bf16 %v976_v28, %v971_v27  ;;  %v981_v39 = vld [vmem:[%s9553_s1 + $0x1d28] sm:$0xff]  ;;  %v4291_v41 = vpack.c.bf16 %v973_v33, %v968_v32  ;;  %v4803_v42 = vpack.c.bf16 %v975_v36, %v970_v34  ;;  %v1031_v36 = vld [vmem:[%s9553_s1 + $0x1eb8] sm:$0xff] }
 0x160   :  { %v4309_v28 = vpack.c.bf16 %v1024_v22, %v1019_v21  ;;  %v1025_v33 = vld [vmem:[%s9553_s1 + $0x1e88] sm:$0xff]  ;;  %v1071_v21 = vld [vmem:[%s9553_s1 + $0x1ff8] sm:$0xff]  ;;  %v1076_v22 = vld [vmem:[%s9553_s1 + $0x2020] sm:$0xff] }
 0x161   :  { %v1029_v34 = vld [vmem:[%s9553_s1 + $0x1ea8] sm:$0xff] }
 0x162   :  { %4272 = vmatpush1.bf16.msra.mxu0 %v4271_v45  ;;  %4784 = vmatpush1.bf16.msra.mxu1 %v4783_v46  ;;  %v983_v45 = vld [vmem:[%s9553_s1 + $0x1d38] sm:$0xff]  ;;  %v980_v46 = vld [vmem:[%s9553_s1 + $0x1d20] sm:$0xff] }
 0x163   :  { %4274 = vmatprep.subr.bf16.mxu0 %v4273_v47  ;;  %4786 = vmatprep.subr.bf16.mxu1 %v4785_v51  ;;  %v4805_v47 = vpack.c.bf16 %v986_v40, %v981_v39  ;;  %v991_v51 = vld [vmem:[%s9553_s1 + $0x1d78] sm:$0xff]  ;;  %v4295_v53 = vpack.c.bf16 %v983_v45, %v978_v44  ;;  %v4807_v54 = vpack.c.bf16 %v985_v48, %v980_v46  ;;  %v1030_v44 = vld [vmem:[%s9553_s1 + $0x1eb0] sm:$0xff]  ;;  %v1044_v48 = vld [vmem:[%s9553_s1 + $0x1f20] sm:$0xff] }
 0x164   :  { %v4825_v45 = vpack.c.bf16 %v1036_v37, %v1031_v36  ;;  %v1035_v46 = vld [vmem:[%s9553_s1 + $0x1ed8] sm:$0xff] }
 0x166   :  { %4276 = vmatpush1.bf16.msra.mxu0 %v4275_v57  ;;  %4788 = vmatpush1.bf16.msra.mxu1 %v4787_v58  ;;  %v993_v57 = vld [vmem:[%s9553_s1 + $0x1d88] sm:$0xff]  ;;  %v990_v58 = vld [vmem:[%s9553_s1 + $0x1d70] sm:$0xff] }
 0x167   :  { %4278 = vmatprep.subr.bf16.mxu0 %v4277_v59  ;;  %4790 = vmatprep.subr.bf16.mxu1 %v4789_v63  ;;  %v4809_v59 = vpack.c.bf16 %v996_v52, %v991_v51  ;;  %v1001_v63 = vld [vmem:[%s9553_s1 + $0x1dc8] sm:$0xff]  ;;  %v4299_v1 = vpack.c.bf16 %v993_v57, %v988_v56  ;;  %v4811_v2 = vpack.c.bf16 %v995_v60, %v990_v58  ;;  %v1040_v56 = vld [vmem:[%s9553_s1 + $0x1f00] sm:$0xff]  ;;  %v1054_v60 = vld [vmem:[%s9553_s1 + $0x1f70] sm:$0xff] }
 0x168   :  { %v4827_v52 = vpack.c.bf16 %v1035_v46, %v1030_v44  ;;  %v4829_v57 = vpack.c.bf16 %v1046_v50, %v1041_v49  ;;  %v1045_v58 = vld [vmem:[%s9553_s1 + $0x1f28] sm:$0xff]  ;;  %v1094_v44 = vld [vmem:[%s9553_s1 + $0x20b0] sm:$0xff]  ;;  %v1096_v46 = vld [vmem:[%s9553_s1 + $0x20c0] sm:$0xff] }
 0x169   :  { %v1088_v50 = vld [vmem:[%s9553_s1 + $0x2080] sm:$0xff] }
 0x16a   :  { %4280 = vmatpush1.bf16.msra.mxu0 %v4279_v5  ;;  %4792 = vmatpush1.bf16.msra.mxu1 %v4791_v6  ;;  %v1003_v5 = vld [vmem:[%s9553_s1 + $0x1dd8] sm:$0xff]  ;;  %v1000_v6 = vld [vmem:[%s9553_s1 + $0x1dc0] sm:$0xff] }
 0x16b   :  { %4282 = vmatprep.subr.bf16.mxu0 %v4281_v7  ;;  %4794 = vmatprep.subr.bf16.mxu1 %v4793_v11  ;;  %v4813_v7 = vpack.c.bf16 %v1006_v0, %v1001_v63  ;;  %v1011_v11 = vld [vmem:[%s9553_s1 + $0x1e18] sm:$0xff]  ;;  %v4303_v13 = vpack.c.bf16 %v1003_v5, %v998_v4  ;;  %v4815_v14 = vpack.c.bf16 %v1005_v8, %v1000_v6  ;;  %v1050_v4 = vld [vmem:[%s9553_s1 + $0x1f50] sm:$0xff]  ;;  %v1064_v8 = vld [vmem:[%s9553_s1 + $0x1fc0] sm:$0xff] }
 0x16c   :  { %v4831_v0 = vpack.c.bf16 %v1045_v58, %v1040_v56  ;;  %v4833_v5 = vpack.c.bf16 %v1056_v62, %v1051_v61  ;;  %v1055_v6 = vld [vmem:[%s9553_s1 + $0x1f78] sm:$0xff]  ;;  %v1104_v56 = vld [vmem:[%s9553_s1 + $0x2100] sm:$0xff]  ;;  %v1106_v58 = vld [vmem:[%s9553_s1 + $0x2110] sm:$0xff] }
 0x16d   :  { %v1098_v62 = vld [vmem:[%s9553_s1 + $0x20d0] sm:$0xff] }
 0x16e   :  { %4284 = vmatpush1.bf16.msra.mxu0 %v4283_v17  ;;  %4796 = vmatpush1.bf16.msra.mxu1 %v4795_v18  ;;  %v1013_v17 = vld [vmem:[%s9553_s1 + $0x1e28] sm:$0xff]  ;;  %v1010_v18 = vld [vmem:[%s9553_s1 + $0x1e10] sm:$0xff] }
 0x16f   :  { %4286 = vmatprep.subr.bf16.mxu0 %v4285_v19  ;;  %4798 = vmatprep.subr.bf16.mxu1 %v4797_v23  ;;  %v4817_v19 = vpack.c.bf16 %v1016_v12, %v1011_v11  ;;  %v1021_v23 = vld [vmem:[%s9553_s1 + $0x1e68] sm:$0xff]  ;;  %v4307_v26 = vpack.c.bf16 %v1013_v17, %v1008_v16  ;;  %v4819_v27 = vpack.c.bf16 %v1015_v20, %v1010_v18  ;;  %v1060_v16 = vld [vmem:[%s9553_s1 + $0x1fa0] sm:$0xff]  ;;  %v1074_v20 = vld [vmem:[%s9553_s1 + $0x2010] sm:$0xff] }
 0x170   :  { %v4821_v32 = vpack.c.bf16 %v1026_v24, %v1021_v23  ;;  %v4835_v12 = vpack.c.bf16 %v1055_v6, %v1050_v4  ;;  %v4837_v17 = vpack.c.bf16 %v1066_v10, %v1061_v9  ;;  %v1065_v18 = vld [vmem:[%s9553_s1 + $0x1fc8] sm:$0xff]  ;;  %v1114_v4 = vld [vmem:[%s9553_s1 + $0x2150] sm:$0xff]  ;;  %v1116_v6 = vld [vmem:[%s9553_s1 + $0x2160] sm:$0xff] }
 0x171   :  { %v4839_v24 = vpack.c.bf16 %v1065_v18, %v1060_v16  ;;  %v1108_v10 = vld [vmem:[%s9553_s1 + $0x2120] sm:$0xff]  ;;  %v1126_v18 = vld [vmem:[%s9553_s1 + $0x21b0] sm:$0xff] }
 0x172   :  { %4288 = vmatpush1.bf16.msra.mxu0 %v4287_v29  ;;  %4800 = vmatpush1.bf16.msra.mxu1 %v4799_v30  ;;  %v1018_v29 = vld [vmem:[%s9553_s1 + $0x1e50] sm:$0xff]  ;;  %v1023_v30 = vld [vmem:[%s9553_s1 + $0x1e78] sm:$0xff]  ;;  %v1124_v16 = vld [vmem:[%s9553_s1 + $0x21a0] sm:$0xff] }
 0x173   :  { %4290 = vmatprep.subr.bf16.mxu0 %v4289_v31  ;;  %4802 = vmatprep.subr.bf16.mxu1 %v4801_v35  ;;  %v1020_v31 = vld [vmem:[%s9553_s1 + $0x1e60] sm:$0xff]  ;;  %v1034_v35 = vld [vmem:[%s9553_s1 + $0x1ed0] sm:$0xff]  ;;  %v4311_v39 = vpack.c.bf16 %v1023_v30, %v1018_v29  ;;  %v4841_v29 = vpack.c.bf16 %v1076_v22, %v1071_v21  ;;  %v1075_v30 = vld [vmem:[%s9553_s1 + $0x2018] sm:$0xff] }
 0x174   :  { %v4823_v40 = vpack.c.bf16 %v1025_v33, %v1020_v31  ;;  %v1079_v31 = vld [vmem:[%s9553_s1 + $0x2038] sm:$0xff]  ;;  %v1081_v33 = vld [vmem:[%s9553_s1 + $0x2048] sm:$0xff]  ;;  %v1118_v22 = vld [vmem:[%s9553_s1 + $0x2170] sm:$0xff] }
 0x176   :  { %4292 = vmatpush1.bf16.msra.mxu0 %v4291_v41  ;;  %4804 = vmatpush1.bf16.msra.mxu1 %v4803_v42  ;;  %v4313_v41 = vpack.c.bf16 %v1034_v35, %v1029_v34  ;;  %v1028_v42 = vld [vmem:[%s9553_s1 + $0x1ea0] sm:$0xff]  ;;  %v1086_v34 = vld [vmem:[%s9553_s1 + $0x2070] sm:$0xff] }
 0x177   :  { %4294 = vmatprep.subr.bf16.mxu0 %v4293_v43  ;;  %4806 = vmatprep.subr.bf16.mxu1 %v4805_v47  ;;  %v1033_v43 = vld [vmem:[%s9553_s1 + $0x1ec8] sm:$0xff]  ;;  %v1039_v47 = vld [vmem:[%s9553_s1 + $0x1ef8] sm:$0xff] }
 0x178   :  { %v4315_v51 = vpack.c.bf16 %v1033_v43, %v1028_v42  ;;  %v1085_v42 = vld [vmem:[%s9553_s1 + $0x2068] sm:$0xff] }
 0x179   :  { %v1089_v43 = vld [vmem:[%s9553_s1 + $0x2088] sm:$0xff] }
 0x17a   :  { %4296 = vmatpush1.bf16.msra.mxu0 %v4295_v53  ;;  %4808 = vmatpush1.bf16.msra.mxu1 %v4807_v54  ;;  %v4317_v53 = vpack.c.bf16 %v1044_v48, %v1039_v47  ;;  %v1038_v54 = vld [vmem:[%s9553_s1 + $0x1ef0] sm:$0xff]  ;;  %v4337_v49 = vpack.c.bf16 %v1094_v44, %v1089_v43 }
 0x17b   :  { %4298 = vmatprep.subr.bf16.mxu0 %v4297_v55  ;;  %4810 = vmatprep.subr.bf16.mxu1 %v4809_v59  ;;  %v1043_v55 = vld [vmem:[%s9553_s1 + $0x1f18] sm:$0xff]  ;;  %v1049_v59 = vld [vmem:[%s9553_s1 + $0x1f48] sm:$0xff] }
 0x17c   :  { %v4319_v63 = vpack.c.bf16 %v1043_v55, %v1038_v54  ;;  %v1095_v54 = vld [vmem:[%s9553_s1 + $0x20b8] sm:$0xff] }
 0x17d   :  { %v1099_v55 = vld [vmem:[%s9553_s1 + $0x20d8] sm:$0xff] }
 0x17e   :  { %4300 = vmatpush1.bf16.msra.mxu0 %v4299_v1  ;;  %4812 = vmatpush1.bf16.msra.mxu1 %v4811_v2  ;;  %v4321_v1 = vpack.c.bf16 %v1054_v60, %v1049_v59  ;;  %v1048_v2 = vld [vmem:[%s9553_s1 + $0x1f40] sm:$0xff]  ;;  %v4341_v61 = vpack.c.bf16 %v1104_v56, %v1099_v55 }
 0x17f   :  { %4302 = vmatprep.subr.bf16.mxu0 %v4301_v3  ;;  %4814 = vmatprep.subr.bf16.mxu1 %v4813_v7  ;;  %v1053_v3 = vld [vmem:[%s9553_s1 + $0x1f68] sm:$0xff]  ;;  %v1059_v7 = vld [vmem:[%s9553_s1 + $0x1f98] sm:$0xff] }
 0x180   :  { %v4323_v11 = vpack.c.bf16 %v1053_v3, %v1048_v2  ;;  %v1105_v2 = vld [vmem:[%s9553_s1 + $0x2108] sm:$0xff] }
 0x181   :  { %v1109_v3 = vld [vmem:[%s9553_s1 + $0x2128] sm:$0xff] }
 0x182   :  { %4304 = vmatpush1.bf16.msra.mxu0 %v4303_v13  ;;  %4816 = vmatpush1.bf16.msra.mxu1 %v4815_v14  ;;  %v4325_v13 = vpack.c.bf16 %v1064_v8, %v1059_v7  ;;  %v1058_v14 = vld [vmem:[%s9553_s1 + $0x1f90] sm:$0xff]  ;;  %v4345_v9 = vpack.c.bf16 %v1114_v4, %v1109_v3 }
 0x183   :  { %4306 = vmatprep.subr.bf16.mxu0 %v4305_v15  ;;  %4818 = vmatprep.subr.bf16.mxu1 %v4817_v19  ;;  %v1063_v15 = vld [vmem:[%s9553_s1 + $0x1fb8] sm:$0xff]  ;;  %v1069_v19 = vld [vmem:[%s9553_s1 + $0x1fe8] sm:$0xff] }
 0x184   :  { %v4327_v23 = vpack.c.bf16 %v1063_v15, %v1058_v14  ;;  %v1115_v14 = vld [vmem:[%s9553_s1 + $0x2158] sm:$0xff] }
 0x185   :  { %1775 = vmatmul.mubr.f32.vlgmr.msra.gmra.mrb[0].mxu0 %v42_v25  ;;  %2343 = vmatmul.mubr.f32.vlgmr.msra.gmra.mrb[0].mxu1 %v42_v25  ;;  %v4329_v25 = vpack.c.bf16 %v1074_v20, %v1069_v19  ;;  %v1119_v15 = vld [vmem:[%s9553_s1 + $0x2178] sm:$0xff] }
 0x186   :  { %4308 = vmatpush1.bf16.msra.mxu0 %v4307_v26  ;;  %4820 = vmatpush1.bf16.msra.mxu1 %v4819_v27  ;;  %v1068_v26 = vld [vmem:[%s9553_s1 + $0x1fe0] sm:$0xff]  ;;  %v1073_v27 = vld [vmem:[%s9553_s1 + $0x2008] sm:$0xff]  ;;  %v4349_v21 = vpack.c.bf16 %v1124_v16, %v1119_v15 }
 0x187   :  { %4310 = vmatprep.subr.bf16.mxu0 %v4309_v28  ;;  %4822 = vmatprep.subr.bf16.mxu1 %v4821_v32  ;;  %v1070_v28 = vld [vmem:[%s9553_s1 + $0x1ff0] sm:$0xff]  ;;  %v1084_v32 = vld [vmem:[%s9553_s1 + $0x2060] sm:$0xff]  ;;  %v4331_v35 = vpack.c.bf16 %v1073_v27, %v1068_v26  ;;  %v1125_v26 = vld [vmem:[%s9553_s1 + $0x21a8] sm:$0xff] }
 0x188   :  { %1845 = vmatprep.mubr.f32.mxu0 %v45_v38  ;;  %2413 = vmatprep.mubr.f32.mxu1 %v45_v38  ;;  %v4843_v36 = vpack.c.bf16 %v1075_v30, %v1070_v28  ;;  %v4333_v37 = vpack.c.bf16 %v1084_v32, %v1079_v31  ;;  %v1078_v38 = vld [vmem:[%s9553_s1 + $0x2030] sm:$0xff]  ;;  %v1129_v27 = vld [vmem:[%s9553_s1 + $0x21c8] sm:$0xff]  ;;  %v1136_v30 = vld [vmem:[%s9553_s1 + $0x2200] sm:$0xff] }
 0x189   :  { %v1134_v28 = vld [vmem:[%s9553_s1 + $0x21f0] sm:$0xff] }
 0x18a   :  { %4312 = vmatpush1.bf16.msra.mxu0 %v4311_v39  ;;  %4824 = vmatpush1.bf16.msra.mxu1 %v4823_v40  ;;  %v1083_v39 = vld [vmem:[%s9553_s1 + $0x2058] sm:$0xff]  ;;  %v1080_v40 = vld [vmem:[%s9553_s1 + $0x2040] sm:$0xff] }
 0x18b   :  { %4314 = vmatprep.subr.bf16.mxu0 %v4313_v41  ;;  %4826 = vmatprep.subr.bf16.mxu1 %v4825_v45  ;;  %v4845_v41 = vpack.c.bf16 %v1086_v34, %v1081_v33  ;;  %v1091_v45 = vld [vmem:[%s9553_s1 + $0x2098] sm:$0xff]  ;;  %v4335_v47 = vpack.c.bf16 %v1083_v39, %v1078_v38  ;;  %v4847_v48 = vpack.c.bf16 %v1085_v42, %v1080_v40  ;;  %v1128_v34 = vld [vmem:[%s9553_s1 + $0x21c0] sm:$0xff]  ;;  %v1146_v42 = vld [vmem:[%s9553_s1 + $0x2250] sm:$0xff] }
 0x18c   :  { %v4353_v33 = vpack.c.bf16 %v1134_v28, %v1129_v27  ;;  %v1135_v38 = vld [vmem:[%s9553_s1 + $0x21f8] sm:$0xff]  ;;  %v1144_v40 = vld [vmem:[%s9553_s1 + $0x2240] sm:$0xff] }
 0x18d   :  { %v1139_v39 = vld [vmem:[%s9553_s1 + $0x2218] sm:$0xff]  ;;  %v44_v27 = vld [vmem:[%s9554_s0 + $0x60] sm:$0xff] }
 0x18e   :  { %4316 = vmatpush1.bf16.msra.mxu0 %v4315_v51  ;;  %4828 = vmatpush1.bf16.msra.mxu1 %v4827_v52  ;;  %v1093_v51 = vld [vmem:[%s9553_s1 + $0x20a8] sm:$0xff]  ;;  %v1090_v52 = vld [vmem:[%s9553_s1 + $0x2090] sm:$0xff] }
 0x18f   :  { %4318 = vmatprep.subr.bf16.mxu0 %v4317_v53  ;;  %4830 = vmatprep.subr.bf16.mxu1 %v4829_v57  ;;  %v4849_v53 = vpack.c.bf16 %v1096_v46, %v1091_v45  ;;  %v1101_v57 = vld [vmem:[%s9553_s1 + $0x20e8] sm:$0xff]  ;;  %v4339_v59 = vpack.c.bf16 %v1093_v51, %v1088_v50  ;;  %v4851_v60 = vpack.c.bf16 %v1095_v54, %v1090_v52  ;;  %v1138_v46 = vld [vmem:[%s9553_s1 + $0x2210] sm:$0xff]  ;;  %v1156_v54 = vld [vmem:[%s9553_s1 + $0x22a0] sm:$0xff] }
 0x190   :  { %v4357_v45 = vpack.c.bf16 %v1144_v40, %v1139_v39  ;;  %v1145_v50 = vld [vmem:[%s9553_s1 + $0x2248] sm:$0xff]  ;;  %v1154_v52 = vld [vmem:[%s9553_s1 + $0x2290] sm:$0xff]  ;;  %v1196_v39 = vld [vmem:[%s9553_s1 + $0x23e0] sm:$0xff] }
 0x191   :  { %v1149_v51 = vld [vmem:[%s9553_s1 + $0x2268] sm:$0xff]  ;;  %v47_v40 = vld [vmem:[%s9554_s0 + $0x78] sm:$0xff] }
 0x192   :  { %4320 = vmatpush1.bf16.msra.mxu0 %v4319_v63  ;;  %4832 = vmatpush1.bf16.msra.mxu1 %v4831_v0  ;;  %v1103_v63 = vld [vmem:[%s9553_s1 + $0x20f8] sm:$0xff]  ;;  %v1100_v0 = vld [vmem:[%s9553_s1 + $0x20e0] sm:$0xff] }
 0x193   :  { %4322 = vmatprep.subr.bf16.mxu0 %v4321_v1  ;;  %4834 = vmatprep.subr.bf16.mxu1 %v4833_v5  ;;  %v4853_v1 = vpack.c.bf16 %v1106_v58, %v1101_v57  ;;  %v1111_v5 = vld [vmem:[%s9553_s1 + $0x2138] sm:$0xff]  ;;  %v4343_v7 = vpack.c.bf16 %v1103_v63, %v1098_v62  ;;  %v4855_v8 = vpack.c.bf16 %v1105_v2, %v1100_v0  ;;  %v1148_v58 = vld [vmem:[%s9553_s1 + $0x2260] sm:$0xff]  ;;  %v1166_v2 = vld [vmem:[%s9553_s1 + $0x22f0] sm:$0xff] }
 0x194   :  { %v4361_v57 = vpack.c.bf16 %v1154_v52, %v1149_v51  ;;  %v1155_v62 = vld [vmem:[%s9553_s1 + $0x2298] sm:$0xff]  ;;  %v1164_v0 = vld [vmem:[%s9553_s1 + $0x22e0] sm:$0xff]  ;;  %v1201_v51 = vld [vmem:[%s9553_s1 + $0x2408] sm:$0xff] }
 0x195   :  { %v1159_v63 = vld [vmem:[%s9553_s1 + $0x22b8] sm:$0xff]  ;;  %v1206_v52 = vld [vmem:[%s9553_s1 + $0x2430] sm:$0xff] }
 0x196   :  { %4324 = vmatpush1.bf16.msra.mxu0 %v4323_v11  ;;  %4836 = vmatpush1.bf16.msra.mxu1 %v4835_v12  ;;  %v1113_v11 = vld [vmem:[%s9553_s1 + $0x2148] sm:$0xff]  ;;  %v1110_v12 = vld [vmem:[%s9553_s1 + $0x2130] sm:$0xff] }
 0x197   :  { %4326 = vmatprep.subr.bf16.mxu0 %v4325_v13  ;;  %4838 = vmatprep.subr.bf16.mxu1 %v4837_v17  ;;  %v4857_v13 = vpack.c.bf16 %v1116_v6, %v1111_v5  ;;  %v1121_v17 = vld [vmem:[%s9553_s1 + $0x2188] sm:$0xff]  ;;  %v4347_v19 = vpack.c.bf16 %v1113_v11, %v1108_v10  ;;  %v4859_v20 = vpack.c.bf16 %v1115_v14, %v1110_v12  ;;  %v1158_v6 = vld [vmem:[%s9553_s1 + $0x22b0] sm:$0xff]  ;;  %v1176_v14 = vld [vmem:[%s9553_s1 + $0x2340] sm:$0xff] }
 0x198   :  { %v4365_v5 = vpack.c.bf16 %v1164_v0, %v1159_v63  ;;  %v1165_v10 = vld [vmem:[%s9553_s1 + $0x22e8] sm:$0xff]  ;;  %v1174_v12 = vld [vmem:[%s9553_s1 + $0x2330] sm:$0xff]  ;;  %v1211_v63 = vld [vmem:[%s9553_s1 + $0x2458] sm:$0xff] }
 0x199   :  { %v1169_v11 = vld [vmem:[%s9553_s1 + $0x2308] sm:$0xff]  ;;  %v1216_v0 = vld [vmem:[%s9553_s1 + $0x2480] sm:$0xff] }
 0x19a   :  { %4328 = vmatpush1.bf16.msra.mxu0 %v4327_v23  ;;  %4840 = vmatpush1.bf16.msra.mxu1 %v4839_v24  ;;  %v1123_v23 = vld [vmem:[%s9553_s1 + $0x2198] sm:$0xff]  ;;  %v1120_v24 = vld [vmem:[%s9553_s1 + $0x2180] sm:$0xff] }
 0x19b   :  { %4330 = vmatprep.subr.bf16.mxu0 %v4329_v25  ;;  %4842 = vmatprep.subr.bf16.mxu1 %v4841_v29  ;;  %v4861_v25 = vpack.c.bf16 %v1126_v18, %v1121_v17  ;;  %v1131_v29 = vld [vmem:[%s9553_s1 + $0x21d8] sm:$0xff]  ;;  %v4351_v31 = vpack.c.bf16 %v1123_v23, %v1118_v22  ;;  %v4863_v32 = vpack.c.bf16 %v1125_v26, %v1120_v24  ;;  %v1168_v18 = vld [vmem:[%s9553_s1 + $0x2300] sm:$0xff]  ;;  %v1186_v26 = vld [vmem:[%s9553_s1 + $0x2390] sm:$0xff] }
 0x19c   :  { %v4369_v17 = vpack.c.bf16 %v1174_v12, %v1169_v11  ;;  %v1175_v22 = vld [vmem:[%s9553_s1 + $0x2338] sm:$0xff]  ;;  %v1184_v24 = vld [vmem:[%s9553_s1 + $0x2380] sm:$0xff]  ;;  %v1221_v11 = vld [vmem:[%s9553_s1 + $0x24a8] sm:$0xff] }
 0x19d   :  { %v1179_v23 = vld [vmem:[%s9553_s1 + $0x2358] sm:$0xff]  ;;  %v1226_v12 = vld [vmem:[%s9553_s1 + $0x24d0] sm:$0xff] }
 0x19e   :  { %4332 = vmatpush1.bf16.msra.mxu0 %v4331_v35  ;;  %4844 = vmatpush1.bf16.msra.mxu1 %v4843_v36  ;;  %v1133_v35 = vld [vmem:[%s9553_s1 + $0x21e8] sm:$0xff]  ;;  %v1130_v36 = vld [vmem:[%s9553_s1 + $0x21d0] sm:$0xff] }
 0x19f   :  { %4334 = vmatprep.subr.bf16.mxu0 %v4333_v37  ;;  %4846 = vmatprep.subr.bf16.mxu1 %v4845_v41  ;;  %v4865_v37 = vpack.c.bf16 %v1136_v30, %v1131_v29  ;;  %v1141_v41 = vld [vmem:[%s9553_s1 + $0x2228] sm:$0xff]  ;;  %v4355_v43 = vpack.c.bf16 %v1133_v35, %v1128_v34  ;;  %v4867_v44 = vpack.c.bf16 %v1135_v38, %v1130_v36  ;;  %v1191_v38 = vld [vmem:[%s9553_s1 + $0x23b8] sm:$0xff] }
 0x1a0   :  { %v4373_v30 = vpack.c.bf16 %v1184_v24, %v1179_v23  ;;  %v1185_v35 = vld [vmem:[%s9553_s1 + $0x2388] sm:$0xff]  ;;  %v1231_v23 = vld [vmem:[%s9553_s1 + $0x24f8] sm:$0xff]  ;;  %v1236_v24 = vld [vmem:[%s9553_s1 + $0x2520] sm:$0xff] }
 0x1a1   :  { %v1189_v36 = vld [vmem:[%s9553_s1 + $0x23a8] sm:$0xff] }
 0x1a2   :  { %4336 = vmatpush1.bf16.msra.mxu0 %v4335_v47  ;;  %4848 = vmatpush1.bf16.msra.mxu1 %v4847_v48  ;;  %v1143_v47 = vld [vmem:[%s9553_s1 + $0x2238] sm:$0xff]  ;;  %v1140_v48 = vld [vmem:[%s9553_s1 + $0x2220] sm:$0xff] }
 0x1a3   :  { %4338 = vmatprep.subr.bf16.mxu0 %v4337_v49  ;;  %4850 = vmatprep.subr.bf16.mxu1 %v4849_v53  ;;  %v4869_v49 = vpack.c.bf16 %v1146_v42, %v1141_v41  ;;  %v1151_v53 = vld [vmem:[%s9553_s1 + $0x2278] sm:$0xff]  ;;  %v4359_v55 = vpack.c.bf16 %v1143_v47, %v1138_v46  ;;  %v4871_v56 = vpack.c.bf16 %v1145_v50, %v1140_v48  ;;  %v1190_v46 = vld [vmem:[%s9553_s1 + $0x23b0] sm:$0xff]  ;;  %v1204_v50 = vld [vmem:[%s9553_s1 + $0x2420] sm:$0xff] }
 0x1a4   :  { %v4889_v47 = vpack.c.bf16 %v1196_v39, %v1191_v38  ;;  %v1195_v48 = vld [vmem:[%s9553_s1 + $0x23d8] sm:$0xff] }
 0x1a6   :  { %4340 = vmatpush1.bf16.msra.mxu0 %v4339_v59  ;;  %4852 = vmatpush1.bf16.msra.mxu1 %v4851_v60  ;;  %v1153_v59 = vld [vmem:[%s9553_s1 + $0x2288] sm:$0xff]  ;;  %v1150_v60 = vld [vmem:[%s9553_s1 + $0x2270] sm:$0xff] }
 0x1a7   :  { %4342 = vmatprep.subr.bf16.mxu0 %v4341_v61  ;;  %4854 = vmatprep.subr.bf16.mxu1 %v4853_v1  ;;  %v4873_v61 = vpack.c.bf16 %v1156_v54, %v1151_v53  ;;  %v1161_v1 = vld [vmem:[%s9553_s1 + $0x22c8] sm:$0xff]  ;;  %v4363_v3 = vpack.c.bf16 %v1153_v59, %v1148_v58  ;;  %v4875_v4 = vpack.c.bf16 %v1155_v62, %v1150_v60  ;;  %v1200_v58 = vld [vmem:[%s9553_s1 + $0x2400] sm:$0xff]  ;;  %v1214_v62 = vld [vmem:[%s9553_s1 + $0x2470] sm:$0xff] }
 0x1a8   :  { %v4891_v54 = vpack.c.bf16 %v1195_v48, %v1190_v46  ;;  %v4893_v59 = vpack.c.bf16 %v1206_v52, %v1201_v51  ;;  %v1205_v60 = vld [vmem:[%s9553_s1 + $0x2428] sm:$0xff]  ;;  %v1254_v46 = vld [vmem:[%s9553_s1 + $0x25b0] sm:$0xff]  ;;  %v1256_v48 = vld [vmem:[%s9553_s1 + $0x25c0] sm:$0xff] }
 0x1a9   :  { %v1248_v52 = vld [vmem:[%s9553_s1 + $0x2580] sm:$0xff] }
 0x1aa   :  { %4344 = vmatpush1.bf16.msra.mxu0 %v4343_v7  ;;  %4856 = vmatpush1.bf16.msra.mxu1 %v4855_v8  ;;  %v1163_v7 = vld [vmem:[%s9553_s1 + $0x22d8] sm:$0xff]  ;;  %v1160_v8 = vld [vmem:[%s9553_s1 + $0x22c0] sm:$0xff] }
 0x1ab   :  { %4346 = vmatprep.subr.bf16.mxu0 %v4345_v9  ;;  %4858 = vmatprep.subr.bf16.mxu1 %v4857_v13  ;;  %v4877_v9 = vpack.c.bf16 %v1166_v2, %v1161_v1  ;;  %v1171_v13 = vld [vmem:[%s9553_s1 + $0x2318] sm:$0xff]  ;;  %v4367_v15 = vpack.c.bf16 %v1163_v7, %v1158_v6  ;;  %v4879_v16 = vpack.c.bf16 %v1165_v10, %v1160_v8  ;;  %v1210_v6 = vld [vmem:[%s9553_s1 + $0x2450] sm:$0xff]  ;;  %v1224_v10 = vld [vmem:[%s9553_s1 + $0x24c0] sm:$0xff] }
 0x1ac   :  { %v4895_v2 = vpack.c.bf16 %v1205_v60, %v1200_v58  ;;  %v4897_v7 = vpack.c.bf16 %v1216_v0, %v1211_v63  ;;  %v1215_v8 = vld [vmem:[%s9553_s1 + $0x2478] sm:$0xff]  ;;  %v1264_v58 = vld [vmem:[%s9553_s1 + $0x2600] sm:$0xff]  ;;  %v1266_v60 = vld [vmem:[%s9553_s1 + $0x2610] sm:$0xff] }
 0x1ad   :  { %v1258_v0 = vld [vmem:[%s9553_s1 + $0x25d0] sm:$0xff] }
 0x1ae   :  { %4348 = vmatpush1.bf16.msra.mxu0 %v4347_v19  ;;  %4860 = vmatpush1.bf16.msra.mxu1 %v4859_v20  ;;  %v1173_v19 = vld [vmem:[%s9553_s1 + $0x2328] sm:$0xff]  ;;  %v1170_v20 = vld [vmem:[%s9553_s1 + $0x2310] sm:$0xff] }
 0x1af   :  { %4350 = vmatprep.subr.bf16.mxu0 %v4349_v21  ;;  %4862 = vmatprep.subr.bf16.mxu1 %v4861_v25  ;;  %v4881_v21 = vpack.c.bf16 %v1176_v14, %v1171_v13  ;;  %v1181_v25 = vld [vmem:[%s9553_s1 + $0x2368] sm:$0xff]  ;;  %v4371_v28 = vpack.c.bf16 %v1173_v19, %v1168_v18  ;;  %v4883_v29 = vpack.c.bf16 %v1175_v22, %v1170_v20  ;;  %v1220_v18 = vld [vmem:[%s9553_s1 + $0x24a0] sm:$0xff]  ;;  %v1234_v22 = vld [vmem:[%s9553_s1 + $0x2510] sm:$0xff] }
 0x1b0   :  { %v4885_v34 = vpack.c.bf16 %v1186_v26, %v1181_v25  ;;  %v4899_v14 = vpack.c.bf16 %v1215_v8, %v1210_v6  ;;  %v4901_v19 = vpack.c.bf16 %v1226_v12, %v1221_v11  ;;  %v1225_v20 = vld [vmem:[%s9553_s1 + $0x24c8] sm:$0xff]  ;;  %v1274_v6 = vld [vmem:[%s9553_s1 + $0x2650] sm:$0xff]  ;;  %v1276_v8 = vld [vmem:[%s9553_s1 + $0x2660] sm:$0xff] }
 0x1b1   :  { %v4903_v26 = vpack.c.bf16 %v1225_v20, %v1220_v18  ;;  %v1268_v12 = vld [vmem:[%s9553_s1 + $0x2620] sm:$0xff]  ;;  %v1286_v20 = vld [vmem:[%s9553_s1 + $0x26b0] sm:$0xff] }
 0x1b2   :  { %4352 = vmatpush1.bf16.msra.mxu0 %v4351_v31  ;;  %4864 = vmatpush1.bf16.msra.mxu1 %v4863_v32  ;;  %v1178_v31 = vld [vmem:[%s9553_s1 + $0x2350] sm:$0xff]  ;;  %v1183_v32 = vld [vmem:[%s9553_s1 + $0x2378] sm:$0xff]  ;;  %v1284_v18 = vld [vmem:[%s9553_s1 + $0x26a0] sm:$0xff] }
 0x1b3   :  { %4354 = vmatprep.subr.bf16.mxu0 %v4353_v33  ;;  %4866 = vmatprep.subr.bf16.mxu1 %v4865_v37  ;;  %v1180_v33 = vld [vmem:[%s9553_s1 + $0x2360] sm:$0xff]  ;;  %v1194_v37 = vld [vmem:[%s9553_s1 + $0x23d0] sm:$0xff]  ;;  %v4375_v41 = vpack.c.bf16 %v1183_v32, %v1178_v31  ;;  %v4905_v31 = vpack.c.bf16 %v1236_v24, %v1231_v23  ;;  %v1235_v32 = vld [vmem:[%s9553_s1 + $0x2518] sm:$0xff] }
 0x1b4   :  { %v4887_v42 = vpack.c.bf16 %v1185_v35, %v1180_v33  ;;  %v1239_v33 = vld [vmem:[%s9553_s1 + $0x2538] sm:$0xff]  ;;  %v1241_v35 = vld [vmem:[%s9553_s1 + $0x2548] sm:$0xff]  ;;  %v1278_v24 = vld [vmem:[%s9553_s1 + $0x2670] sm:$0xff] }
 0x1b6   :  { %4356 = vmatpush1.bf16.msra.mxu0 %v4355_v43  ;;  %4868 = vmatpush1.bf16.msra.mxu1 %v4867_v44  ;;  %v4377_v43 = vpack.c.bf16 %v1194_v37, %v1189_v36  ;;  %v1188_v44 = vld [vmem:[%s9553_s1 + $0x23a0] sm:$0xff]  ;;  %v1246_v36 = vld [vmem:[%s9553_s1 + $0x2570] sm:$0xff] }
 0x1b7   :  { %4358 = vmatprep.subr.bf16.mxu0 %v4357_v45  ;;  %4870 = vmatprep.subr.bf16.mxu1 %v4869_v49  ;;  %v1193_v45 = vld [vmem:[%s9553_s1 + $0x23c8] sm:$0xff]  ;;  %v1199_v49 = vld [vmem:[%s9553_s1 + $0x23f8] sm:$0xff] }
 0x1b8   :  { %v4379_v53 = vpack.c.bf16 %v1193_v45, %v1188_v44  ;;  %v1245_v44 = vld [vmem:[%s9553_s1 + $0x2568] sm:$0xff] }
 0x1b9   :  { %v1249_v45 = vld [vmem:[%s9553_s1 + $0x2588] sm:$0xff] }
 0x1ba   :  { %4360 = vmatpush1.bf16.msra.mxu0 %v4359_v55  ;;  %4872 = vmatpush1.bf16.msra.mxu1 %v4871_v56  ;;  %v4381_v55 = vpack.c.bf16 %v1204_v50, %v1199_v49  ;;  %v1198_v56 = vld [vmem:[%s9553_s1 + $0x23f0] sm:$0xff]  ;;  %v4401_v51 = vpack.c.bf16 %v1254_v46, %v1249_v45 }
 0x1bb   :  { %4362 = vmatprep.subr.bf16.mxu0 %v4361_v57  ;;  %4874 = vmatprep.subr.bf16.mxu1 %v4873_v61  ;;  %v1203_v57 = vld [vmem:[%s9553_s1 + $0x2418] sm:$0xff]  ;;  %v1209_v61 = vld [vmem:[%s9553_s1 + $0x2448] sm:$0xff] }
 0x1bc   :  { %v4383_v1 = vpack.c.bf16 %v1203_v57, %v1198_v56  ;;  %v1255_v56 = vld [vmem:[%s9553_s1 + $0x25b8] sm:$0xff] }
 0x1bd   :  { %v1259_v57 = vld [vmem:[%s9553_s1 + $0x25d8] sm:$0xff] }
 0x1be   :  { %4364 = vmatpush1.bf16.msra.mxu0 %v4363_v3  ;;  %4876 = vmatpush1.bf16.msra.mxu1 %v4875_v4  ;;  %v4385_v3 = vpack.c.bf16 %v1214_v62, %v1209_v61  ;;  %v1208_v4 = vld [vmem:[%s9553_s1 + $0x2440] sm:$0xff]  ;;  %v4405_v63 = vpack.c.bf16 %v1264_v58, %v1259_v57 }
 0x1bf   :  { %4366 = vmatprep.subr.bf16.mxu0 %v4365_v5  ;;  %4878 = vmatprep.subr.bf16.mxu1 %v4877_v9  ;;  %v1213_v5 = vld [vmem:[%s9553_s1 + $0x2468] sm:$0xff]  ;;  %v1219_v9 = vld [vmem:[%s9553_s1 + $0x2498] sm:$0xff] }
 0x1c0   :  { %v4387_v13 = vpack.c.bf16 %v1213_v5, %v1208_v4  ;;  %v1265_v4 = vld [vmem:[%s9553_s1 + $0x2608] sm:$0xff] }
 0x1c1   :  { %v1269_v5 = vld [vmem:[%s9553_s1 + $0x2628] sm:$0xff] }
 0x1c2   :  { %4368 = vmatpush1.bf16.msra.mxu0 %v4367_v15  ;;  %4880 = vmatpush1.bf16.msra.mxu1 %v4879_v16  ;;  %v4389_v15 = vpack.c.bf16 %v1224_v10, %v1219_v9  ;;  %v1218_v16 = vld [vmem:[%s9553_s1 + $0x2490] sm:$0xff]  ;;  %v4409_v11 = vpack.c.bf16 %v1274_v6, %v1269_v5 }
 0x1c3   :  { %4370 = vmatprep.subr.bf16.mxu0 %v4369_v17  ;;  %4882 = vmatprep.subr.bf16.mxu1 %v4881_v21  ;;  %v1223_v17 = vld [vmem:[%s9553_s1 + $0x24b8] sm:$0xff]  ;;  %v1229_v21 = vld [vmem:[%s9553_s1 + $0x24e8] sm:$0xff] }
 0x1c4   :  { %v4391_v25 = vpack.c.bf16 %v1223_v17, %v1218_v16  ;;  %v1275_v16 = vld [vmem:[%s9553_s1 + $0x2658] sm:$0xff] }
 0x1c5   :  { %1846 = vmatmul.mubr.f32.vlgmr.msra.gmra.mrb[0].mxu0 %v44_v27  ;;  %2414 = vmatmul.mubr.f32.vlgmr.msra.gmra.mrb[0].mxu1 %v44_v27  ;;  %v4393_v27 = vpack.c.bf16 %v1234_v22, %v1229_v21  ;;  %v1279_v17 = vld [vmem:[%s9553_s1 + $0x2678] sm:$0xff] }
 0x1c6   :  { %4372 = vmatpush1.bf16.msra.mxu0 %v4371_v28  ;;  %4884 = vmatpush1.bf16.msra.mxu1 %v4883_v29  ;;  %v1228_v28 = vld [vmem:[%s9553_s1 + $0x24e0] sm:$0xff]  ;;  %v1233_v29 = vld [vmem:[%s9553_s1 + $0x2508] sm:$0xff]  ;;  %v4413_v23 = vpack.c.bf16 %v1284_v18, %v1279_v17 }
 0x1c7   :  { %4374 = vmatprep.subr.bf16.mxu0 %v4373_v30  ;;  %4886 = vmatprep.subr.bf16.mxu1 %v4885_v34  ;;  %v1230_v30 = vld [vmem:[%s9553_s1 + $0x24f0] sm:$0xff]  ;;  %v1244_v34 = vld [vmem:[%s9553_s1 + $0x2560] sm:$0xff]  ;;  %v4395_v37 = vpack.c.bf16 %v1233_v29, %v1228_v28  ;;  %v1285_v28 = vld [vmem:[%s9553_s1 + $0x26a8] sm:$0xff] }
 0x1c8   :  { %1916 = vmatprep.mubr.f32.mxu0 %v47_v40  ;;  %2484 = vmatprep.mubr.f32.mxu1 %v47_v40  ;;  %v4907_v38 = vpack.c.bf16 %v1235_v32, %v1230_v30  ;;  %v4397_v39 = vpack.c.bf16 %v1244_v34, %v1239_v33  ;;  %v1238_v40 = vld [vmem:[%s9553_s1 + $0x2530] sm:$0xff]  ;;  %v1289_v29 = vld [vmem:[%s9553_s1 + $0x26c8] sm:$0xff]  ;;  %v1296_v32 = vld [vmem:[%s9553_s1 + $0x2700] sm:$0xff] }
 0x1c9   :  { %v1294_v30 = vld [vmem:[%s9553_s1 + $0x26f0] sm:$0xff] }
 0x1ca   :  { %4376 = vmatpush1.bf16.msra.mxu0 %v4375_v41  ;;  %4888 = vmatpush1.bf16.msra.mxu1 %v4887_v42  ;;  %v1243_v41 = vld [vmem:[%s9553_s1 + $0x2558] sm:$0xff]  ;;  %v1240_v42 = vld [vmem:[%s9553_s1 + $0x2540] sm:$0xff] }
 0x1cb   :  { %4378 = vmatprep.subr.bf16.mxu0 %v4377_v43  ;;  %4890 = vmatprep.subr.bf16.mxu1 %v4889_v47  ;;  %v4909_v43 = vpack.c.bf16 %v1246_v36, %v1241_v35  ;;  %v1251_v47 = vld [vmem:[%s9553_s1 + $0x2598] sm:$0xff]  ;;  %v4399_v49 = vpack.c.bf16 %v1243_v41, %v1238_v40  ;;  %v4911_v50 = vpack.c.bf16 %v1245_v44, %v1240_v42  ;;  %v1288_v36 = vld [vmem:[%s9553_s1 + $0x26c0] sm:$0xff]  ;;  %v1306_v44 = vld [vmem:[%s9553_s1 + $0x2750] sm:$0xff] }
 0x1cc   :  { %v4417_v35 = vpack.c.bf16 %v1294_v30, %v1289_v29  ;;  %v1295_v40 = vld [vmem:[%s9553_s1 + $0x26f8] sm:$0xff]  ;;  %v1304_v42 = vld [vmem:[%s9553_s1 + $0x2740] sm:$0xff]  ;;  %v46_v29 = vld [vmem:[%s9554_s0 + $0x70] sm:$0xff] }
 0x1cd   :  { %v1299_v41 = vld [vmem:[%s9553_s1 + $0x2718] sm:$0xff] }
 0x1ce   :  { %4380 = vmatpush1.bf16.msra.mxu0 %v4379_v53  ;;  %4892 = vmatpush1.bf16.msra.mxu1 %v4891_v54  ;;  %v1253_v53 = vld [vmem:[%s9553_s1 + $0x25a8] sm:$0xff]  ;;  %v1250_v54 = vld [vmem:[%s9553_s1 + $0x2590] sm:$0xff] }
 0x1cf   :  { %4382 = vmatprep.subr.bf16.mxu0 %v4381_v55  ;;  %4894 = vmatprep.subr.bf16.mxu1 %v4893_v59  ;;  %v4913_v55 = vpack.c.bf16 %v1256_v48, %v1251_v47  ;;  %v1261_v59 = vld [vmem:[%s9553_s1 + $0x25e8] sm:$0xff]  ;;  %v4403_v61 = vpack.c.bf16 %v1253_v53, %v1248_v52  ;;  %v4915_v62 = vpack.c.bf16 %v1255_v56, %v1250_v54  ;;  %v1298_v48 = vld [vmem:[%s9553_s1 + $0x2710] sm:$0xff]  ;;  %v1316_v56 = vld [vmem:[%s9553_s1 + $0x27a0] sm:$0xff] }
 0x1d0   :  { %v4421_v47 = vpack.c.bf16 %v1304_v42, %v1299_v41  ;;  %v1305_v52 = vld [vmem:[%s9553_s1 + $0x2748] sm:$0xff]  ;;  %v1314_v54 = vld [vmem:[%s9553_s1 + $0x2790] sm:$0xff] }
 0x1d1   :  { %v1309_v53 = vld [vmem:[%s9553_s1 + $0x2768] sm:$0xff] }
 0x1d2   :  { %4384 = vmatpush1.bf16.msra.mxu0 %v4383_v1  ;;  %4896 = vmatpush1.bf16.msra.mxu1 %v4895_v2  ;;  %v1263_v1 = vld [vmem:[%s9553_s1 + $0x25f8] sm:$0xff]  ;;  %v1260_v2 = vld [vmem:[%s9553_s1 + $0x25e0] sm:$0xff]  ;;  %v317_v41 = vld [vmem:[%s9553_s1 + $0x868] sm:$0xff] }
 0x1d3   :  { %4386 = vmatprep.subr.bf16.mxu0 %v4385_v3  ;;  %4898 = vmatprep.subr.bf16.mxu1 %v4897_v7  ;;  %v4917_v3 = vpack.c.bf16 %v1266_v60, %v1261_v59  ;;  %v1271_v7 = vld [vmem:[%s9553_s1 + $0x2638] sm:$0xff]  ;;  %v4407_v9 = vpack.c.bf16 %v1263_v1, %v1258_v0  ;;  %v4919_v10 = vpack.c.bf16 %v1265_v4, %v1260_v2  ;;  %v1308_v60 = vld [vmem:[%s9553_s1 + $0x2760] sm:$0xff]  ;;  %v1326_v4 = vld [vmem:[%s9553_s1 + $0x27f0] sm:$0xff] }
 0x1d4   :  { %v4425_v59 = vpack.c.bf16 %v1314_v54, %v1309_v53  ;;  %v1315_v0 = vld [vmem:[%s9553_s1 + $0x2798] sm:$0xff]  ;;  %v1324_v2 = vld [vmem:[%s9553_s1 + $0x27e0] sm:$0xff]  ;;  %v322_v53 = vld [vmem:[%s9553_s1 + $0x890] sm:$0xff] }
 0x1d5   :  { %v1319_v1 = vld [vmem:[%s9553_s1 + $0x27b8] sm:$0xff] }
 0x1d6   :  { %4388 = vmatpush1.bf16.msra.mxu0 %v4387_v13  ;;  %4900 = vmatpush1.bf16.msra.mxu1 %v4899_v14  ;;  %v1273_v13 = vld [vmem:[%s9553_s1 + $0x2648] sm:$0xff]  ;;  %v1270_v14 = vld [vmem:[%s9553_s1 + $0x2630] sm:$0xff]  ;;  %v327_v54 = vld [vmem:[%s9553_s1 + $0x8b8] sm:$0xff] }
 0x1d7   :  { %4390 = vmatprep.subr.bf16.mxu0 %v4389_v15  ;;  %4902 = vmatprep.subr.bf16.mxu1 %v4901_v19  ;;  %v4921_v15 = vpack.c.bf16 %v1276_v8, %v1271_v7  ;;  %v1281_v19 = vld [vmem:[%s9553_s1 + $0x2688] sm:$0xff]  ;;  %v4411_v21 = vpack.c.bf16 %v1273_v13, %v1268_v12  ;;  %v4923_v22 = vpack.c.bf16 %v1275_v16, %v1270_v14  ;;  %v1318_v8 = vld [vmem:[%s9553_s1 + $0x27b0] sm:$0xff]  ;;  %v132_v13 = vld [vmem:[%s9553_s1 + $0x2a0] sm:$0xff] }
 0x1d8   :  { %v4429_v7 = vpack.c.bf16 %v1324_v2, %v1319_v1  ;;  %v1325_v12 = vld [vmem:[%s9553_s1 + $0x27e8] sm:$0xff]  ;;  %v332_v2 = vld [vmem:[%s9553_s1 + $0x8e0] sm:$0xff] }
 0x1d9   :  { %v137_v14 = vld [vmem:[%s9553_s1 + $0x2c8] sm:$0xff] }
 0x1da   :  { %4392 = vmatpush1.bf16.msra.mxu0 %v4391_v25  ;;  %4904 = vmatpush1.bf16.msra.mxu1 %v4903_v26  ;;  %v1283_v25 = vld [vmem:[%s9553_s1 + $0x2698] sm:$0xff]  ;;  %v1280_v26 = vld [vmem:[%s9553_s1 + $0x2680] sm:$0xff]  ;;  %v297_v16 = vld [vmem:[%s9553_s1 + $0x7c8] sm:$0xff] }
 0x1db   :  { %4394 = vmatprep.subr.bf16.mxu0 %v4393_v27  ;;  %4906 = vmatprep.subr.bf16.mxu1 %v4905_v31  ;;  %v4925_v27 = vpack.c.bf16 %v1286_v20, %v1281_v19  ;;  %v1291_v31 = vld [vmem:[%s9553_s1 + $0x26d8] sm:$0xff]  ;;  %v4415_v33 = vpack.c.bf16 %v1283_v25, %v1278_v24  ;;  %v4927_v34 = vpack.c.bf16 %v1285_v28, %v1280_v26  ;;  %v52_v20 = vld [vmem:[%s9553_s1 + $0x20] sm:$0xff]  ;;  %v217_v24 = vld [vmem:[%s9553_s1 + $0x548] sm:$0xff] }
 0x1dc   :  { %v4945_v19 = vpack.c.bf16 %v137_v14, %v132_v13  ;;  %v142_v25 = vld [vmem:[%s9553_s1 + $0x2f0] sm:$0xff]  ;;  %v147_v26 = vld [vmem:[%s9553_s1 + $0x318] sm:$0xff]  ;;  %v177_v1 = vld [vmem:[%s9553_s1 + $0x408] sm:$0xff] }
 0x1dd   :  { %v307_v28 = vld [vmem:[%s9553_s1 + $0x818] sm:$0xff]  ;;  %v342_v14 = vld [vmem:[%s9553_s1 + $0x930] sm:$0xff] }
 0x1de   :  { %4396 = vmatpush1.bf16.msra.mxu0 %v4395_v37  ;;  %4908 = vmatpush1.bf16.msra.mxu1 %v4907_v38  ;;  %v1293_v37 = vld [vmem:[%s9553_s1 + $0x26e8] sm:$0xff]  ;;  %v1290_v38 = vld [vmem:[%s9553_s1 + $0x26d0] sm:$0xff]  ;;  %v187_v13 = vld [vmem:[%s9553_s1 + $0x458] sm:$0xff] }
 0x1df   :  { %4398 = vmatprep.subr.bf16.mxu0 %v4397_v39  ;;  %4910 = vmatprep.subr.bf16.mxu1 %v4909_v43  ;;  %v4929_v39 = vpack.c.bf16 %v1296_v32, %v1291_v31  ;;  %v1301_v43 = vld [vmem:[%s9553_s1 + $0x2728] sm:$0xff]  ;;  %v4419_v45 = vpack.c.bf16 %v1293_v37, %v1288_v36  ;;  %v4931_v46 = vpack.c.bf16 %v1295_v40, %v1290_v38  ;;  %v227_v37 = vld [vmem:[%s9553_s1 + $0x598] sm:$0xff]  ;;  %v152_v38 = vld [vmem:[%s9553_s1 + $0x340] sm:$0xff] }
 0x1e0   :  { %v4949_v32 = vpack.c.bf16 %v147_v26, %v142_v25  ;;  %v312_v40 = vld [vmem:[%s9553_s1 + $0x840] sm:$0xff]  ;;  %v197_v25 = vld [vmem:[%s9553_s1 + $0x4a8] sm:$0xff] }
 0x1e1   :  { %v352_v26 = vld [vmem:[%s9553_s1 + $0x980] sm:$0xff] }
 0x1e2   :  { %4400 = vmatpush1.bf16.msra.mxu0 %v4399_v49  ;;  %4912 = vmatpush1.bf16.msra.mxu1 %v4911_v50  ;;  %v1303_v49 = vld [vmem:[%s9553_s1 + $0x2738] sm:$0xff]  ;;  %v1300_v50 = vld [vmem:[%s9553_s1 + $0x2720] sm:$0xff] }
 0x1e3   :  { %4402 = vmatprep.subr.bf16.mxu0 %v4401_v51  ;;  %4914 = vmatprep.subr.bf16.mxu1 %v4913_v55  ;;  %v4933_v51 = vpack.c.bf16 %v1306_v44, %v1301_v43  ;;  %v1311_v55 = vld [vmem:[%s9553_s1 + $0x2778] sm:$0xff]  ;;  %v4423_v57 = vpack.c.bf16 %v1303_v49, %v1298_v48  ;;  %v4935_v58 = vpack.c.bf16 %v1305_v52, %v1300_v50  ;;  %v237_v49 = vld [vmem:[%s9553_s1 + $0x5e8] sm:$0xff]  ;;  %v162_v50 = vld [vmem:[%s9553_s1 + $0x390] sm:$0xff] }
 0x1e4   :  { %v4985_v48 = vpack.c.bf16 %v317_v41, %v312_v40  ;;  %v5317_v52 = vld [vmem:[%s9554_s0 + $0x8] sm:$0xff] }
 0x1e6   :  { %4404 = vmatpush1.bf16.msra.mxu0 %v4403_v61  ;;  %4916 = vmatpush1.bf16.msra.mxu1 %v4915_v62  ;;  %v1313_v61 = vld [vmem:[%s9553_s1 + $0x2788] sm:$0xff]  ;;  %v1310_v62 = vld [vmem:[%s9553_s1 + $0x2770] sm:$0xff] }
 0x1e7   :  { %4406 = vmatprep.subr.bf16.mxu0 %v4405_v63  ;;  %4918 = vmatprep.subr.bf16.mxu1 %v4917_v3  ;;  %v4937_v63 = vpack.c.bf16 %v1316_v56, %v1311_v55  ;;  %v1321_v3 = vld [vmem:[%s9553_s1 + $0x27c8] sm:$0xff]  ;;  %v4427_v5 = vpack.c.bf16 %v1313_v61, %v1308_v60  ;;  %v4939_v6 = vpack.c.bf16 %v1315_v0, %v1310_v62  ;;  %v5318_v55 = vld [vmem:[%s9554_s0 + $0x18] sm:$0xff]  ;;  %v242_v61 = vld [vmem:[%s9553_s1 + $0x610] sm:$0xff] }
 0x1e8   :  { %v87_v60 = vld [vmem:[%s9553_s1 + $0x138] sm:$0xff]  ;;  %v4989_v62 = vpack.c.bf16 %v327_v54, %v322_v53  ;;  %v172_v0 = vld [vmem:[%s9553_s1 + $0x3e0] sm:$0xff] }
 0x1ea   :  { %4408 = vmatpush1.bf16.msra.mxu0 %v4407_v9  ;;  %4920 = vmatpush1.bf16.msra.mxu1 %v4919_v10  ;;  %v1323_v9 = vld [vmem:[%s9553_s1 + $0x27d8] sm:$0xff]  ;;  %v1320_v10 = vld [vmem:[%s9553_s1 + $0x27c0] sm:$0xff] }
 0x1eb   :  { %4410 = vmatprep.subr.bf16.mxu0 %v4409_v11  ;;  %4922 = vmatprep.subr.bf16.mxu1 %v4921_v15  ;;  %v4941_v11 = vpack.c.bf16 %v1326_v4, %v1321_v3  ;;  %v292_v15 = vld [vmem:[%s9553_s1 + $0x7a0] sm:$0xff]  ;;  %v4431_v17 = vpack.c.bf16 %v1323_v9, %v1318_v8  ;;  %v4943_v18 = vpack.c.bf16 %v1325_v12, %v1320_v10  ;;  %v337_v3 = vld [vmem:[%s9553_s1 + $0x908] sm:$0xff]  ;;  %v182_v12 = vld [vmem:[%s9553_s1 + $0x430] sm:$0xff] }
 0x1ec   :  { %v97_v8 = vld [vmem:[%s9553_s1 + $0x188] sm:$0xff]  ;;  %v252_v9 = vld [vmem:[%s9553_s1 + $0x660] sm:$0xff]  ;;  %v4993_v10 = vpack.c.bf16 %v337_v3, %v332_v2  ;;  %v382_v3 = vld [vmem:[%s9553_s1 + $0xa70] sm:$0xff] }
 0x1ee   :  { %4412 = vmatpush1.bf16.msra.mxu0 %v4411_v21  ;;  %4924 = vmatpush1.bf16.msra.mxu1 %v4923_v22  ;;  %v57_v21 = vld [vmem:[%s9553_s1 + $0x48] sm:$0xff]  ;;  %v212_v22 = vld [vmem:[%s9553_s1 + $0x520] sm:$0xff] }
 0x1ef   :  { %4414 = vmatprep.subr.bf16.mxu0 %v4413_v23  ;;  %4926 = vmatprep.subr.bf16.mxu1 %v4925_v27  ;;  %v4977_v23 = vpack.c.bf16 %v297_v16, %v292_v15  ;;  %v302_v27 = vld [vmem:[%s9553_s1 + $0x7f0] sm:$0xff]  ;;  %v4947_v30 = vpack.c.bf16 %v57_v21, %v52_v20  ;;  %v4979_v31 = vpack.c.bf16 %v217_v24, %v212_v22  ;;  %v347_v15 = vld [vmem:[%s9553_s1 + $0x958] sm:$0xff]  ;;  %v192_v24 = vld [vmem:[%s9553_s1 + $0x480] sm:$0xff] }
 0x1f0   :  { %v4981_v36 = vpack.c.bf16 %v307_v28, %v302_v27  ;;  %v107_v20 = vld [vmem:[%s9553_s1 + $0x1d8] sm:$0xff]  ;;  %v262_v21 = vld [vmem:[%s9553_s1 + $0x6b0] sm:$0xff]  ;;  %v4997_v22 = vpack.c.bf16 %v347_v15, %v342_v14  ;;  %v357_v27 = vld [vmem:[%s9553_s1 + $0x9a8] sm:$0xff] }
 0x1f2   :  { %4416 = vmatpush1.bf16.msra.mxu0 %v4415_v33  ;;  %4928 = vmatpush1.bf16.msra.mxu1 %v4927_v34  ;;  %v62_v33 = vld [vmem:[%s9553_s1 + $0x70] sm:$0xff]  ;;  %v67_v34 = vld [vmem:[%s9553_s1 + $0x98] sm:$0xff] }
 0x1f3   :  { %4418 = vmatprep.subr.bf16.mxu0 %v4417_v35  ;;  %4930 = vmatprep.subr.bf16.mxu1 %v4929_v39  ;;  %v222_v35 = vld [vmem:[%s9553_s1 + $0x570] sm:$0xff]  ;;  %v157_v39 = vld [vmem:[%s9553_s1 + $0x368] sm:$0xff]  ;;  %v4951_v42 = vpack.c.bf16 %v67_v34, %v62_v33  ;;  %v272_v33 = vld [vmem:[%s9553_s1 + $0x700] sm:$0xff]  ;;  %v5001_v34 = vpack.c.bf16 %v357_v27, %v352_v26 }
 0x1f4   :  { %v4983_v43 = vpack.c.bf16 %v227_v37, %v222_v35  ;;  %v4953_v44 = vpack.c.bf16 %v157_v39, %v152_v38  ;;  %v277_v35 = vld [vmem:[%s9553_s1 + $0x728] sm:$0xff]  ;;  %v207_v37 = vld [vmem:[%s9553_s1 + $0x4f8] sm:$0xff]  ;;  %v362_v38 = vld [vmem:[%s9553_s1 + $0x9d0] sm:$0xff] }
 0x1f5   :  { %v367_v39 = vld [vmem:[%s9553_s1 + $0x9f8] sm:$0xff]  ;;  %v5003_v41 = vpack.c.bf16 %v277_v35, %v272_v33  ;;  %v562_v33 = vld [vmem:[%s9553_s1 + $0x1010] sm:$0xff] }
 0x1f6   :  { %4420 = vmatpush1.bf16.msra.mxu0 %v4419_v45  ;;  %4932 = vmatpush1.bf16.msra.mxu1 %v4931_v46  ;;  %v72_v45 = vld [vmem:[%s9553_s1 + $0xc0] sm:$0xff]  ;;  %v77_v46 = vld [vmem:[%s9553_s1 + $0xe8] sm:$0xff]  ;;  %v647_v26 = vld [vmem:[%s9553_s1 + $0x12b8] sm:$0xff] }
 0x1f7   :  { %4422 = vmatprep.subr.bf16.mxu0 %v4421_v47  ;;  %4934 = vmatprep.subr.bf16.mxu1 %v4933_v51  ;;  %v232_v47 = vld [vmem:[%s9553_s1 + $0x5c0] sm:$0xff]  ;;  %v167_v51 = vld [vmem:[%s9553_s1 + $0x3b8] sm:$0xff]  ;;  %v4955_v56 = vpack.c.bf16 %v77_v46, %v72_v45  ;;  %v282_v45 = vld [vmem:[%s9553_s1 + $0x750] sm:$0xff]  ;;  %v5005_v46 = vpack.c.bf16 %v367_v39, %v362_v38 }
 0x1f8   :  { %v5322_v27 = vld [vmem:[%s9554_s0 + $0x38] sm:$0xff]  ;;  %v652_v38 = vld [vmem:[%s9553_s1 + $0x12e0] sm:$0xff]  ;;  %v657_v39 = vld [vmem:[%s9553_s1 + $0x1308] sm:$0xff] }
 0x1f9   :  { %v567_v35 = vld [vmem:[%s9553_s1 + $0x1038] sm:$0xff] }
 0x1fa   :  { %4424 = vmatpush1.bf16.msra.mxu0 %v4423_v57  ;;  %4936 = vmatpush1.bf16.msra.mxu1 %v4935_v58  ;;  %v4987_v57 = vpack.c.bf16 %v237_v49, %v232_v47  ;;  %v4957_v58 = vpack.c.bf16 %v167_v51, %v162_v50  ;;  %v287_v47 = vld [vmem:[%s9553_s1 + $0x778] sm:$0xff]  ;;  %v457_v49 = vld [vmem:[%s9553_s1 + $0xcc8] sm:$0xff]  ;;  %v612_v50 = vld [vmem:[%s9553_s1 + $0x11a0] sm:$0xff] }
 0x1fb   :  { %4426 = vmatprep.subr.bf16.mxu0 %v4425_v59  ;;  %4938 = vmatprep.subr.bf16.mxu1 %v4937_v63  ;;  %v82_v59 = vld [vmem:[%s9553_s1 + $0x110] sm:$0xff]  ;;  %v247_v63 = vld [vmem:[%s9553_s1 + $0x638] sm:$0xff]  ;;  %v617_v51 = vld [vmem:[%s9553_s1 + $0x11c8] sm:$0xff]  ;;  %v5007_v53 = vpack.c.bf16 %v287_v47, %v282_v45 }
 0x1fc   :  { %v4959_v4 = vpack.c.bf16 %v87_v60, %v82_v59  ;;  %v537_v59 = vld [vmem:[%s9553_s1 + $0xf48] sm:$0xff]  ;;  %v462_v60 = vld [vmem:[%s9553_s1 + $0xcf0] sm:$0xff]  ;;  %v572_v45 = vld [vmem:[%s9553_s1 + $0x1060] sm:$0xff] }
 0x1fd   :  { %v577_v47 = vld [vmem:[%s9553_s1 + $0x1088] sm:$0xff] }
 0x1fe   :  { %4428 = vmatpush1.bf16.msra.mxu0 %v4427_v5  ;;  %4940 = vmatpush1.bf16.msra.mxu1 %v4939_v6  ;;  %v4991_v5 = vpack.c.bf16 %v247_v63, %v242_v61  ;;  %v4961_v6 = vpack.c.bf16 %v177_v1, %v172_v0  ;;  %v467_v61 = vld [vmem:[%s9553_s1 + $0xd18] sm:$0xff] }
 0x1ff   :  { %4430 = vmatprep.subr.bf16.mxu0 %v4429_v7  ;;  %4942 = vmatprep.subr.bf16.mxu1 %v4941_v11  ;;  %v92_v7 = vld [vmem:[%s9553_s1 + $0x160] sm:$0xff]  ;;  %v257_v11 = vld [vmem:[%s9553_s1 + $0x688] sm:$0xff]  ;;  %v627_v63 = vld [vmem:[%s9553_s1 + $0x1218] sm:$0xff]  ;;  %v5013_v2 = vpack.c.bf16 %v467_v61, %v462_v60 }
 0x200   :  { %v4963_v16 = vpack.c.bf16 %v97_v8, %v92_v7  ;;  %v547_v7 = vld [vmem:[%s9553_s1 + $0xf98] sm:$0xff]  ;;  %v472_v8 = vld [vmem:[%s9553_s1 + $0xd40] sm:$0xff]  ;;  %v517_v61 = vld [vmem:[%s9553_s1 + $0xea8] sm:$0xff] }
 0x201   :  { %v512_v60 = vld [vmem:[%s9553_s1 + $0xe80] sm:$0xff] }
 0x202   :  { %4432 = vmatpush1.bf16.msra.mxu0 %v4431_v17  ;;  %4944 = vmatpush1.bf16.msra.mxu1 %v4943_v18  ;;  %v4995_v17 = vpack.c.bf16 %v257_v11, %v252_v9  ;;  %v4965_v18 = vpack.c.bf16 %v187_v13, %v182_v12  ;;  %v477_v9 = vld [vmem:[%s9553_s1 + $0xd68] sm:$0xff]  ;;  %v632_v11 = vld [vmem:[%s9553_s1 + $0x1240] sm:$0xff]  ;;  %v5320_v13 = vld [vmem:[%s9554_s0 + $0x10] sm:$0xff] }
 0x203   :  { %4946 = vmatprep.subr.bf16.mxu0 %v4945_v19  ;;  %4978 = vmatprep.subr.bf16.mxu1 %v4977_v23  ;;  %v102_v19 = vld [vmem:[%s9553_s1 + $0x1b0] sm:$0xff]  ;;  %v267_v23 = vld [vmem:[%s9553_s1 + $0x6d8] sm:$0xff]  ;;  %v637_v12 = vld [vmem:[%s9553_s1 + $0x1268] sm:$0xff] }
 0x204   :  { %v4967_v28 = vpack.c.bf16 %v107_v20, %v102_v19  ;;  %v552_v19 = vld [vmem:[%s9553_s1 + $0xfc0] sm:$0xff]  ;;  %v5049_v20 = vpack.c.bf16 %v637_v12, %v632_v11  ;;  %v687_v11 = vld [vmem:[%s9553_s1 + $0x13f8] sm:$0xff] }
 0x205   :  { %1917 = vmatmul.mubr.f32.vlgmr.msra.gmra.mrb[0].mxu0 %v46_v29  ;;  %2485 = vmatmul.mubr.f32.vlgmr.msra.gmra.mrb[0].mxu1 %v46_v29  ;;  %v4999_v29 = vpack.c.bf16 %v267_v23, %v262_v21  ;;  %v557_v21 = vld [vmem:[%s9553_s1 + $0xfe8] sm:$0xff]  ;;  %v487_v23 = vld [vmem:[%s9553_s1 + $0xdb8] sm:$0xff] }
 0x206   :  { %4948 = vmatpush3.bf16.msra.mxu0 %v4947_v30  ;;  %4980 = vmatpush3.bf16.msra.mxu1 %v4979_v31  ;;  %v4969_v30 = vpack.c.bf16 %v197_v25, %v192_v24  ;;  %v112_v31 = vld [vmem:[%s9553_s1 + $0x200] sm:$0xff]  ;;  %v5321_v24 = vld [vmem:[%s9554_s0 + $0x28] sm:$0xff]  ;;  %v642_v25 = vld [vmem:[%s9553_s1 + $0x1290] sm:$0xff] }
 0x207   :  { %4950 = vmatprep.subr.bf16.mxu0 %v4949_v32  ;;  %4982 = vmatprep.subr.bf16.mxu1 %v4981_v36  ;;  %v117_v32 = vld [vmem:[%s9553_s1 + $0x228] sm:$0xff]  ;;  %v202_v36 = vld [vmem:[%s9553_s1 + $0x4d0] sm:$0xff] }
 0x208   :  { %2555 = vmatprep.mubr.f32.mxu0 %v5317_v52  ;;  %2625 = vmatprep.mubr.f32.mxu1 %v5318_v55  ;;  %v4971_v40 = vpack.c.bf16 %v117_v32, %v112_v31  ;;  %v372_v55 = vld [vmem:[%s9553_s1 + $0xa20] sm:$0xff]  ;;  %v402_v31 = vld [vmem:[%s9553_s1 + $0xb10] sm:$0xff]  ;;  %v407_v32 = vld [vmem:[%s9553_s1 + $0xb38] sm:$0xff] }
 0x20a   :  { %4952 = vmatpush3.bf16.msra.mxu0 %v4951_v42  ;;  %4984 = vmatpush3.bf16.msra.mxu1 %v4983_v43  ;;  %v4973_v42 = vpack.c.bf16 %v207_v37, %v202_v36  ;;  %v122_v43 = vld [vmem:[%s9553_s1 + $0x250] sm:$0xff]  ;;  %v492_v36 = vld [vmem:[%s9553_s1 + $0xde0] sm:$0xff]  ;;  %v497_v37 = vld [vmem:[%s9553_s1 + $0xe08] sm:$0xff] }
 0x20b   :  { %4954 = vmatprep.subr.bf16.mxu0 %v4953_v44  ;;  %4986 = vmatprep.subr.bf16.mxu1 %v4985_v48  ;;  %v127_v44 = vld [vmem:[%s9553_s1 + $0x278] sm:$0xff]  ;;  %v452_v48 = vld [vmem:[%s9553_s1 + $0xca0] sm:$0xff] }
 0x20c   :  { %v4975_v52 = vpack.c.bf16 %v127_v44, %v122_v43  ;;  %v5009_v54 = vpack.c.bf16 %v457_v49, %v452_v48  ;;  %v412_v43 = vld [vmem:[%s9553_s1 + $0xb60] sm:$0xff]  ;;  %v417_v44 = vld [vmem:[%s9553_s1 + $0xb88] sm:$0xff]  ;;  %v502_v48 = vld [vmem:[%s9553_s1 + $0xe30] sm:$0xff] }
 0x20d   :  { %v507_v49 = vld [vmem:[%s9553_s1 + $0xe58] sm:$0xff] }
 0x20e   :  { %4956 = vmatpush3.bf16.msra.mxu0 %v4955_v56  ;;  %4988 = vmatpush3.bf16.msra.mxu1 %v4987_v57  ;;  %v377_v56 = vld [vmem:[%s9553_s1 + $0xa48] sm:$0xff]  ;;  %v532_v57 = vld [vmem:[%s9553_s1 + $0xf20] sm:$0xff] }
 0x20f   :  { %4958 = vmatprep.subr.bf16.mxu0 %v4957_v58  ;;  %4990 = vmatprep.subr.bf16.mxu1 %v4989_v62  ;;  %v5041_v58 = vpack.c.bf16 %v617_v51, %v612_v50  ;;  %v622_v62 = vld [vmem:[%s9553_s1 + $0x11f0] sm:$0xff]  ;;  %v5011_v0 = vpack.c.bf16 %v377_v56, %v372_v55  ;;  %v5043_v1 = vpack.c.bf16 %v537_v59, %v532_v57  ;;  %v667_v51 = vld [vmem:[%s9553_s1 + $0x1358] sm:$0xff] }
 0x210   :  { %v662_v50 = vld [vmem:[%s9553_s1 + $0x1330] sm:$0xff]  ;;  %v427_v56 = vld [vmem:[%s9553_s1 + $0xbd8] sm:$0xff] }
 0x211   :  { %v422_v55 = vld [vmem:[%s9553_s1 + $0xbb0] sm:$0xff]  ;;  %v587_v59 = vld [vmem:[%s9553_s1 + $0x10d8] sm:$0xff] }
 0x212   :  { %4960 = vmatpush3.bf16.msra.mxu0 %v4959_v4  ;;  %4992 = vmatpush3.bf16.msra.mxu1 %v4991_v5  ;;  %v387_v4 = vld [vmem:[%s9553_s1 + $0xa98] sm:$0xff]  ;;  %v542_v5 = vld [vmem:[%s9553_s1 + $0xf70] sm:$0xff] }
 0x213   :  { %4962 = vmatprep.subr.bf16.mxu0 %v4961_v6  ;;  %4994 = vmatprep.subr.bf16.mxu1 %v4993_v10  ;;  %v5045_v6 = vpack.c.bf16 %v627_v63, %v622_v62  ;;  %v5319_v10 = vld [vmem:[%s9554_s0] sm:$0xff]  ;;  %v5015_v14 = vpack.c.bf16 %v387_v4, %v382_v3  ;;  %v5047_v15 = vpack.c.bf16 %v547_v7, %v542_v5  ;;  %v582_v57 = vld [vmem:[%s9553_s1 + $0x10b0] sm:$0xff]  ;;  %v677_v63 = vld [vmem:[%s9553_s1 + $0x13a8] sm:$0xff] }
 0x214   :  { %v672_v62 = vld [vmem:[%s9553_s1 + $0x1380] sm:$0xff]  ;;  %v437_v4 = vld [vmem:[%s9553_s1 + $0xc28] sm:$0xff] }
 0x215   :  { %v432_v3 = vld [vmem:[%s9553_s1 + $0xc00] sm:$0xff]  ;;  %v597_v7 = vld [vmem:[%s9553_s1 + $0x1128] sm:$0xff] }
 0x216   :  { %4964 = vmatpush3.bf16.msra.mxu0 %v4963_v16  ;;  %4996 = vmatpush3.bf16.msra.mxu1 %v4995_v17  ;;  %v5017_v16 = vpack.c.bf16 %v477_v9, %v472_v8  ;;  %v392_v17 = vld [vmem:[%s9553_s1 + $0xac0] sm:$0xff]  ;;  %v522_v8 = vld [vmem:[%s9553_s1 + $0xed0] sm:$0xff]  ;;  %v527_v9 = vld [vmem:[%s9553_s1 + $0xef8] sm:$0xff]  ;;  %v5035_v12 = vpack.c.bf16 %v437_v4, %v432_v3 }
 0x217   :  { %4966 = vmatprep.subr.bf16.mxu0 %v4965_v18  ;;  %4998 = vmatprep.subr.bf16.mxu1 %v4997_v22  ;;  %v397_v18 = vld [vmem:[%s9553_s1 + $0xae8] sm:$0xff]  ;;  %v482_v22 = vld [vmem:[%s9553_s1 + $0xd90] sm:$0xff]  ;;  %v592_v5 = vld [vmem:[%s9553_s1 + $0x1100] sm:$0xff] }
 0x218   :  { %v722_v3 = vld [vmem:[%s9553_s1 + $0x1510] sm:$0xff]  ;;  %v727_v4 = vld [vmem:[%s9553_s1 + $0x1538] sm:$0xff] }
 0x21a   :  { %4968 = vmatpush3.bf16.msra.mxu0 %v4967_v28  ;;  %5000 = vmatpush3.bf16.msra.mxu1 %v4999_v29  ;;  %v5019_v28 = vpack.c.bf16 %v397_v18, %v392_v17  ;;  %v5051_v29 = vpack.c.bf16 %v557_v21, %v552_v19  ;;  %v602_v17 = vld [vmem:[%s9553_s1 + $0x1150] sm:$0xff]  ;;  %v607_v19 = vld [vmem:[%s9553_s1 + $0x1178] sm:$0xff]  ;;  %v777_v21 = vld [vmem:[%s9553_s1 + $0x16c8] sm:$0xff] }
 0x21b   :  { %4970 = vmatprep.subr.bf16.mxu0 %v4969_v30  ;;  %5002 = vmatprep.subr.bf16.mxu1 %v5001_v34  ;;  %v5021_v30 = vpack.c.bf16 %v487_v23, %v482_v22  ;;  %v5053_v34 = vpack.c.bf16 %v647_v26, %v642_v25  ;;  %v932_v22 = vld [vmem:[%s9553_s1 + $0x1ba0] sm:$0xff]  ;;  %v937_v23 = vld [vmem:[%s9553_s1 + $0x1bc8] sm:$0xff]  ;;  %v5071_v25 = vpack.c.bf16 %v607_v19, %v602_v17 }
 0x21c   :  { %v892_v17 = vld [vmem:[%s9553_s1 + $0x1a60] sm:$0xff]  ;;  %v897_v19 = vld [vmem:[%s9553_s1 + $0x1a88] sm:$0xff] }
 0x21e   :  { %4972 = vmatpush3.bf16.msra.mxu0 %v4971_v40  ;;  %5004 = vmatpush3.bf16.msra.mxu1 %v5003_v41  ;;  %v5023_v40 = vpack.c.bf16 %v407_v32, %v402_v31  ;;  %v5055_v41 = vpack.c.bf16 %v567_v35, %v562_v33  ;;  %v857_v31 = vld [vmem:[%s9553_s1 + $0x1948] sm:$0xff]  ;;  %v782_v32 = vld [vmem:[%s9553_s1 + $0x16f0] sm:$0xff]  ;;  %v787_v33 = vld [vmem:[%s9553_s1 + $0x1718] sm:$0xff] }
 0x21f   :  { %4974 = vmatprep.subr.bf16.mxu0 %v4973_v42  ;;  %5006 = vmatprep.subr.bf16.mxu1 %v5005_v46  ;;  %v5025_v42 = vpack.c.bf16 %v497_v37, %v492_v36  ;;  %v5057_v46 = vpack.c.bf16 %v657_v39, %v652_v38  ;;  %v947_v35 = vld [vmem:[%s9553_s1 + $0x1c18] sm:$0xff]  ;;  %v5077_v38 = vpack.c.bf16 %v787_v33, %v782_v32  ;;  %v702_v39 = vld [vmem:[%s9553_s1 + $0x1470] sm:$0xff]  ;;  %v832_v32 = vld [vmem:[%s9553_s1 + $0x1880] sm:$0xff] }
 0x220   :  { %v837_v33 = vld [vmem:[%s9553_s1 + $0x18a8] sm:$0xff] }
 0x222   :  { %4976 = vmatpush3.bf16.msra.mxu0 %v4975_v52  ;;  %5008 = vmatpush3.bf16.msra.mxu1 %v5007_v53  ;;  %v5027_v52 = vpack.c.bf16 %v417_v44, %v412_v43  ;;  %v5059_v53 = vpack.c.bf16 %v577_v47, %v572_v45  ;;  %v867_v43 = vld [vmem:[%s9553_s1 + $0x1998] sm:$0xff]  ;;  %v792_v44 = vld [vmem:[%s9553_s1 + $0x1740] sm:$0xff]  ;;  %v797_v45 = vld [vmem:[%s9553_s1 + $0x1768] sm:$0xff] }
 0x223   :  { %5010 = vmatprep.subr.bf16.mxu0 %v5009_v54  ;;  %5042 = vmatprep.subr.bf16.mxu1 %v5041_v58  ;;  %v5029_v54 = vpack.c.bf16 %v507_v49, %v502_v48  ;;  %v5061_v58 = vpack.c.bf16 %v667_v51, %v662_v50  ;;  %v952_v47 = vld [vmem:[%s9553_s1 + $0x1c40] sm:$0xff]  ;;  %v957_v48 = vld [vmem:[%s9553_s1 + $0x1c68] sm:$0xff]  ;;  %v5324_v49 = vld [vmem:[%s9554_s0 + $0x30] sm:$0xff] }
 0x225   :  { %2556 = vmatmul.mubr.f32.vlgmr.msra.gmra.mrb[2].mxu0 %v5319_v10  ;;  %2626 = vmatmul.mubr.f32.vlgmr.msra.gmra.mrb[2].mxu1 %v5320_v13  ;;  %v682_v10 = vld [vmem:[%s9553_s1 + $0x13d0] sm:$0xff]  ;;  %v5067_v13 = vpack.c.bf16 %v597_v7, %v592_v5  ;;  %v887_v7 = vld [vmem:[%s9553_s1 + $0x1a38] sm:$0xff] }
 0x226   :  { %5012 = vmatpush3.bf16.msra.mxu0 %v5011_v0  ;;  %5044 = vmatpush3.bf16.msra.mxu1 %v5043_v1  ;;  %v5031_v0 = vpack.c.bf16 %v427_v56, %v422_v55  ;;  %v5063_v1 = vpack.c.bf16 %v587_v59, %v582_v57  ;;  %v5069_v18 = vpack.c.bf16 %v687_v11, %v682_v10  ;;  %v872_v55 = vld [vmem:[%s9553_s1 + $0x19c0] sm:$0xff]  ;;  %v877_v57 = vld [vmem:[%s9553_s1 + $0x19e8] sm:$0xff]  ;;  %v807_v59 = vld [vmem:[%s9553_s1 + $0x17b8] sm:$0xff] }
 0x227   :  { %5014 = vmatprep.subr.bf16.mxu0 %v5013_v2  ;;  %5046 = vmatprep.subr.bf16.mxu1 %v5045_v6  ;;  %v5033_v2 = vpack.c.bf16 %v517_v61, %v512_v60  ;;  %v5065_v6 = vpack.c.bf16 %v677_v63, %v672_v62  ;;  %v5113_v56 = vpack.c.bf16 %v957_v48, %v952_v47  ;;  %v5325_v60 = vld [vmem:[%s9554_s0 + $0x48] sm:$0xff]  ;;  %v962_v61 = vld [vmem:[%s9553_s1 + $0x1c90] sm:$0xff]  ;;  %v967_v62 = vld [vmem:[%s9553_s1 + $0x1cb8] sm:$0xff] }
 0x228   :  { %2695 = vmatprep.mubr.f32.mxu0 %v5321_v24  ;;  %2765 = vmatprep.mubr.f32.mxu1 %v5322_v27  ;;  %v692_v27 = vld [vmem:[%s9553_s1 + $0x1420] sm:$0xff]  ;;  %v5326_v63 = vld [vmem:[%s9554_s0 + $0x58] sm:$0xff]  ;;  %v882_v5 = vld [vmem:[%s9553_s1 + $0x1a10] sm:$0xff] }
 0x229   :  { %v972_v10 = vld [vmem:[%s9553_s1 + $0x1ce0] sm:$0xff]  ;;  %v977_v11 = vld [vmem:[%s9553_s1 + $0x1d08] sm:$0xff]  ;;  %v1007_v47 = vld [vmem:[%s9553_s1 + $0x1df8] sm:$0xff] }
 0x22a   :  { %5016 = vmatpush3.bf16.msra.mxu0 %v5015_v14  ;;  %5048 = vmatpush3.bf16.msra.mxu1 %v5047_v15  ;;  %v5037_v14 = vpack.c.bf16 %v527_v9, %v522_v8  ;;  %v442_v15 = vld [vmem:[%s9553_s1 + $0xc50] sm:$0xff]  ;;  %v812_v8 = vld [vmem:[%s9553_s1 + $0x17e0] sm:$0xff]  ;;  %v817_v9 = vld [vmem:[%s9553_s1 + $0x1808] sm:$0xff] }
 0x22b   :  { %5018 = vmatprep.subr.bf16.mxu0 %v5017_v16  ;;  %5050 = vmatprep.subr.bf16.mxu1 %v5049_v20  ;;  %v447_v16 = vld [vmem:[%s9553_s1 + $0xc78] sm:$0xff]  ;;  %v772_v20 = vld [vmem:[%s9553_s1 + $0x16a0] sm:$0xff] }
 0x22c   :  { %v5039_v24 = vpack.c.bf16 %v447_v16, %v442_v15  ;;  %v5073_v26 = vpack.c.bf16 %v777_v21, %v772_v20  ;;  %v732_v15 = vld [vmem:[%s9553_s1 + $0x1560] sm:$0xff]  ;;  %v737_v16 = vld [vmem:[%s9553_s1 + $0x1588] sm:$0xff]  ;;  %v822_v20 = vld [vmem:[%s9553_s1 + $0x1830] sm:$0xff] }
 0x22d   :  { %v827_v21 = vld [vmem:[%s9553_s1 + $0x1858] sm:$0xff] }
 0x22e   :  { %5020 = vmatpush3.bf16.msra.mxu0 %v5019_v28  ;;  %5052 = vmatpush3.bf16.msra.mxu1 %v5051_v29  ;;  %v697_v28 = vld [vmem:[%s9553_s1 + $0x1448] sm:$0xff]  ;;  %v852_v29 = vld [vmem:[%s9553_s1 + $0x1920] sm:$0xff] }
 0x22f   :  { %5022 = vmatprep.subr.bf16.mxu0 %v5021_v30  ;;  %5054 = vmatprep.subr.bf16.mxu1 %v5053_v34  ;;  %v5105_v30 = vpack.c.bf16 %v937_v23, %v932_v22  ;;  %v942_v34 = vld [vmem:[%s9553_s1 + $0x1bf0] sm:$0xff]  ;;  %v5075_v36 = vpack.c.bf16 %v697_v28, %v692_v27  ;;  %v5107_v37 = vpack.c.bf16 %v857_v31, %v852_v29  ;;  %v987_v23 = vld [vmem:[%s9553_s1 + $0x1d58] sm:$0xff] }
 0x230   :  { %v982_v22 = vld [vmem:[%s9553_s1 + $0x1d30] sm:$0xff]  ;;  %v747_v28 = vld [vmem:[%s9553_s1 + $0x15d8] sm:$0xff] }
 0x231   :  { %v742_v27 = vld [vmem:[%s9553_s1 + $0x15b0] sm:$0xff]  ;;  %v907_v31 = vld [vmem:[%s9553_s1 + $0x1ad8] sm:$0xff] }
 0x232   :  { %5024 = vmatpush3.bf16.msra.mxu0 %v5023_v40  ;;  %5056 = vmatpush3.bf16.msra.mxu1 %v5055_v41  ;;  %v707_v40 = vld [vmem:[%s9553_s1 + $0x1498] sm:$0xff]  ;;  %v862_v41 = vld [vmem:[%s9553_s1 + $0x1970] sm:$0xff] }
 0x233   :  { %5026 = vmatprep.subr.bf16.mxu0 %v5025_v42  ;;  %5058 = vmatprep.subr.bf16.mxu1 %v5057_v46  ;;  %v5109_v42 = vpack.c.bf16 %v947_v35, %v942_v34  ;;  %v5323_v46 = vld [vmem:[%s9554_s0 + $0x20] sm:$0xff]  ;;  %v5079_v50 = vpack.c.bf16 %v707_v40, %v702_v39  ;;  %v5111_v51 = vpack.c.bf16 %v867_v43, %v862_v41  ;;  %v902_v29 = vld [vmem:[%s9553_s1 + $0x1ab0] sm:$0xff]  ;;  %v997_v35 = vld [vmem:[%s9553_s1 + $0x1da8] sm:$0xff] }
 0x234   :  { %v992_v34 = vld [vmem:[%s9553_s1 + $0x1d80] sm:$0xff]  ;;  %v757_v40 = vld [vmem:[%s9553_s1 + $0x1628] sm:$0xff] }
 0x235   :  { %v752_v39 = vld [vmem:[%s9553_s1 + $0x1600] sm:$0xff]  ;;  %v917_v43 = vld [vmem:[%s9553_s1 + $0x1b28] sm:$0xff] }
 0x236   :  { %5028 = vmatpush3.bf16.msra.mxu0 %v5027_v52  ;;  %5060 = vmatpush3.bf16.msra.mxu1 %v5059_v53  ;;  %v5081_v52 = vpack.c.bf16 %v797_v45, %v792_v44  ;;  %v712_v53 = vld [vmem:[%s9553_s1 + $0x14c0] sm:$0xff]  ;;  %v842_v44 = vld [vmem:[%s9553_s1 + $0x18d0] sm:$0xff]  ;;  %v847_v45 = vld [vmem:[%s9553_s1 + $0x18f8] sm:$0xff]  ;;  %v5099_v48 = vpack.c.bf16 %v757_v40, %v752_v39 }
 0x237   :  { %5030 = vmatprep.subr.bf16.mxu0 %v5029_v54  ;;  %5062 = vmatprep.subr.bf16.mxu1 %v5061_v58  ;;  %v717_v54 = vld [vmem:[%s9553_s1 + $0x14e8] sm:$0xff]  ;;  %v802_v58 = vld [vmem:[%s9553_s1 + $0x1790] sm:$0xff]  ;;  %v912_v41 = vld [vmem:[%s9553_s1 + $0x1b00] sm:$0xff] }
 0x238   :  { %v1042_v39 = vld [vmem:[%s9553_s1 + $0x1f10] sm:$0xff]  ;;  %v1047_v40 = vld [vmem:[%s9553_s1 + $0x1f38] sm:$0xff] }
 0x23a   :  { %5032 = vmatpush3.bf16.msra.mxu0 %v5031_v0  ;;  %5064 = vmatpush3.bf16.msra.mxu1 %v5063_v1  ;;  %v5083_v0 = vpack.c.bf16 %v717_v54, %v712_v53  ;;  %v5115_v1 = vpack.c.bf16 %v877_v57, %v872_v55  ;;  %v922_v53 = vld [vmem:[%s9553_s1 + $0x1b50] sm:$0xff]  ;;  %v927_v55 = vld [vmem:[%s9553_s1 + $0x1b78] sm:$0xff]  ;;  %v1097_v57 = vld [vmem:[%s9553_s1 + $0x20c8] sm:$0xff] }
 0x23b   :  { %5034 = vmatprep.subr.bf16.mxu0 %v5033_v2  ;;  %5066 = vmatprep.subr.bf16.mxu1 %v5065_v6  ;;  %v5085_v2 = vpack.c.bf16 %v807_v59, %v802_v58  ;;  %v5117_v6 = vpack.c.bf16 %v967_v62, %v962_v61  ;;  %v1252_v58 = vld [vmem:[%s9553_s1 + $0x25a0] sm:$0xff]  ;;  %v1257_v59 = vld [vmem:[%s9553_s1 + $0x25c8] sm:$0xff]  ;;  %v5135_v61 = vpack.c.bf16 %v927_v55, %v922_v53 }
 0x23c   :  { %v1212_v53 = vld [vmem:[%s9553_s1 + $0x2460] sm:$0xff]  ;;  %v1217_v55 = vld [vmem:[%s9553_s1 + $0x2488] sm:$0xff] }
 0x23e   :  { %5036 = vmatpush3.bf16.msra.mxu0 %v5035_v12  ;;  %5068 = vmatpush3.bf16.msra.mxu1 %v5067_v13  ;;  %v5087_v12 = vpack.c.bf16 %v727_v4, %v722_v3  ;;  %v5119_v13 = vpack.c.bf16 %v887_v7, %v882_v5  ;;  %v1177_v3 = vld [vmem:[%s9553_s1 + $0x2348] sm:$0xff]  ;;  %v1102_v4 = vld [vmem:[%s9553_s1 + $0x20f0] sm:$0xff]  ;;  %v1107_v5 = vld [vmem:[%s9553_s1 + $0x2118] sm:$0xff] }
 0x23f   :  { %5038 = vmatprep.subr.bf16.mxu0 %v5037_v14  ;;  %5070 = vmatprep.subr.bf16.mxu1 %v5069_v18  ;;  %v5089_v14 = vpack.c.bf16 %v817_v9, %v812_v8  ;;  %v5121_v18 = vpack.c.bf16 %v977_v11, %v972_v10  ;;  %v1267_v7 = vld [vmem:[%s9553_s1 + $0x2618] sm:$0xff]  ;;  %v5141_v10 = vpack.c.bf16 %v1107_v5, %v1102_v4  ;;  %v1022_v11 = vld [vmem:[%s9553_s1 + $0x1e70] sm:$0xff]  ;;  %v1152_v4 = vld [vmem:[%s9553_s1 + $0x2280] sm:$0xff] }
 0x240   :  { %v1157_v5 = vld [vmem:[%s9553_s1 + $0x22a8] sm:$0xff] }
 0x242   :  { %5040 = vmatpush3.bf16.msra.mxu0 %v5039_v24  ;;  %5072 = vmatpush3.bf16.msra.mxu1 %v5071_v25  ;;  %v5091_v24 = vpack.c.bf16 %v737_v16, %v732_v15  ;;  %v5123_v25 = vpack.c.bf16 %v897_v19, %v892_v17  ;;  %v1187_v15 = vld [vmem:[%s9553_s1 + $0x2398] sm:$0xff]  ;;  %v1112_v16 = vld [vmem:[%s9553_s1 + $0x2140] sm:$0xff]  ;;  %v1117_v17 = vld [vmem:[%s9553_s1 + $0x2168] sm:$0xff] }
 0x243   :  { %5074 = vmatprep.subr.bf16.mxu0 %v5073_v26  ;;  %5106 = vmatprep.subr.bf16.mxu1 %v5105_v30  ;;  %v5093_v26 = vpack.c.bf16 %v827_v21, %v822_v20  ;;  %v5125_v30 = vpack.c.bf16 %v987_v23, %v982_v22  ;;  %v1272_v19 = vld [vmem:[%s9553_s1 + $0x2640] sm:$0xff]  ;;  %v1277_v20 = vld [vmem:[%s9553_s1 + $0x2668] sm:$0xff]  ;;  %v5328_v21 = vld [vmem:[%s9554_s0 + $0x50] sm:$0xff] }
 0x245   :  { %2696 = vmatmul.mubr.f32.vlgmr.msra.gmra.mrb[4].mxu0 %v5323_v46  ;;  %2766 = vmatmul.mubr.f32.vlgmr.msra.gmra.mrb[4].mxu1 %v5324_v49  ;;  %v1002_v46 = vld [vmem:[%s9553_s1 + $0x1dd0] sm:$0xff]  ;;  %v5131_v49 = vpack.c.bf16 %v917_v43, %v912_v41  ;;  %v1207_v43 = vld [vmem:[%s9553_s1 + $0x2438] sm:$0xff] }
 0x246   :  { %5076 = vmatpush3.bf16.msra.mxu0 %v5075_v36  ;;  %5108 = vmatpush3.bf16.msra.mxu1 %v5107_v37  ;;  %v5095_v36 = vpack.c.bf16 %v747_v28, %v742_v27  ;;  %v5127_v37 = vpack.c.bf16 %v907_v31, %v902_v29  ;;  %v5133_v54 = vpack.c.bf16 %v1007_v47, %v1002_v46  ;;  %v1192_v27 = vld [vmem:[%s9553_s1 + $0x23c0] sm:$0xff]  ;;  %v1197_v29 = vld [vmem:[%s9553_s1 + $0x23e8] sm:$0xff]  ;;  %v1127_v31 = vld [vmem:[%s9553_s1 + $0x21b8] sm:$0xff] }
 0x247   :  { %5078 = vmatprep.subr.bf16.mxu0 %v5077_v38  ;;  %5110 = vmatprep.subr.bf16.mxu1 %v5109_v42  ;;  %v5097_v38 = vpack.c.bf16 %v837_v33, %v832_v32  ;;  %v5129_v42 = vpack.c.bf16 %v997_v35, %v992_v34  ;;  %v5177_v28 = vpack.c.bf16 %v1277_v20, %v1272_v19  ;;  %v5329_v32 = vld [vmem:[%s9554_s0 + $0x68] sm:$0xff]  ;;  %v1282_v33 = vld [vmem:[%s9553_s1 + $0x2690] sm:$0xff]  ;;  %v1287_v34 = vld [vmem:[%s9553_s1 + $0x26b8] sm:$0xff] }
 0x248   :  { %2835 = vmatprep.mubr.f32.mxu0 %v5325_v60  ;;  %2905 = vmatprep.mubr.f32.mxu1 %v5326_v63  ;;  %v1012_v63 = vld [vmem:[%s9553_s1 + $0x1e20] sm:$0xff]  ;;  %v5330_v35 = vld [vmem:[%s9554_s0 + $0x78] sm:$0xff]  ;;  %v1202_v41 = vld [vmem:[%s9553_s1 + $0x2410] sm:$0xff] }
 0x249   :  { %v1292_v46 = vld [vmem:[%s9553_s1 + $0x26e0] sm:$0xff]  ;;  %v1297_v47 = vld [vmem:[%s9553_s1 + $0x2708] sm:$0xff]  ;;  %v1327_v19 = vld [vmem:[%s9553_s1 + $0x27f8] sm:$0xff] }
 0x24a   :  { %5080 = vmatpush3.bf16.msra.mxu0 %v5079_v50  ;;  %5112 = vmatpush3.bf16.msra.mxu1 %v5111_v51  ;;  %v5101_v50 = vpack.c.bf16 %v847_v45, %v842_v44  ;;  %v762_v51 = vld [vmem:[%s9553_s1 + $0x1650] sm:$0xff]  ;;  %v1132_v44 = vld [vmem:[%s9553_s1 + $0x21e0] sm:$0xff]  ;;  %v1137_v45 = vld [vmem:[%s9553_s1 + $0x2208] sm:$0xff] }
 0x24b   :  { %5082 = vmatprep.subr.bf16.mxu0 %v5081_v52  ;;  %5114 = vmatprep.subr.bf16.mxu1 %v5113_v56  ;;  %v767_v52 = vld [vmem:[%s9553_s1 + $0x1678] sm:$0xff]  ;;  %v1092_v56 = vld [vmem:[%s9553_s1 + $0x20a0] sm:$0xff] }
 0x24c   :  { %v5103_v60 = vpack.c.bf16 %v767_v52, %v762_v51  ;;  %v5137_v62 = vpack.c.bf16 %v1097_v57, %v1092_v56  ;;  %v1052_v51 = vld [vmem:[%s9553_s1 + $0x1f60] sm:$0xff]  ;;  %v1057_v52 = vld [vmem:[%s9553_s1 + $0x1f88] sm:$0xff]  ;;  %v1142_v56 = vld [vmem:[%s9553_s1 + $0x2230] sm:$0xff] }
 0x24d   :  { %v1147_v57 = vld [vmem:[%s9553_s1 + $0x2258] sm:$0xff] }
 0x24e   :  { %5084 = vmatpush3.bf16.msra.mxu0 %v5083_v0  ;;  %5116 = vmatpush3.bf16.msra.mxu1 %v5115_v1  ;;  %v1017_v0 = vld [vmem:[%s9553_s1 + $0x1e48] sm:$0xff]  ;;  %v1172_v1 = vld [vmem:[%s9553_s1 + $0x2320] sm:$0xff] }
 0x24f   :  { %5086 = vmatprep.subr.bf16.mxu0 %v5085_v2  ;;  %5118 = vmatprep.subr.bf16.mxu1 %v5117_v6  ;;  %v5169_v2 = vpack.c.bf16 %v1257_v59, %v1252_v58  ;;  %v1262_v6 = vld [vmem:[%s9553_s1 + $0x25f0] sm:$0xff]  ;;  %v5139_v8 = vpack.c.bf16 %v1017_v0, %v1012_v63  ;;  %v5171_v9 = vpack.c.bf16 %v1177_v3, %v1172_v1  ;;  %v1307_v59 = vld [vmem:[%s9553_s1 + $0x2758] sm:$0xff] }
 0x250   :  { %v1302_v58 = vld [vmem:[%s9553_s1 + $0x2730] sm:$0xff]  ;;  %v1067_v0 = vld [vmem:[%s9553_s1 + $0x1fd8] sm:$0xff] }
 0x251   :  { %v1062_v63 = vld [vmem:[%s9553_s1 + $0x1fb0] sm:$0xff]  ;;  %v1227_v3 = vld [vmem:[%s9553_s1 + $0x24d8] sm:$0xff] }
 0x252   :  { %5088 = vmatpush3.bf16.msra.mxu0 %v5087_v12  ;;  %5120 = vmatpush3.bf16.msra.mxu1 %v5119_v13  ;;  %v1027_v12 = vld [vmem:[%s9553_s1 + $0x1e98] sm:$0xff]  ;;  %v1182_v13 = vld [vmem:[%s9553_s1 + $0x2370] sm:$0xff] }
 0x253   :  { %5090 = vmatprep.subr.bf16.mxu0 %v5089_v14  ;;  %5122 = vmatprep.subr.bf16.mxu1 %v5121_v18  ;;  %v5173_v14 = vpack.c.bf16 %v1267_v7, %v1262_v6  ;;  %v5327_v18 = vld [vmem:[%s9554_s0 + $0x40] sm:$0xff]  ;;  %v5143_v22 = vpack.c.bf16 %v1027_v12, %v1022_v11  ;;  %v5175_v23 = vpack.c.bf16 %v1187_v15, %v1182_v13  ;;  %v1222_v1 = vld [vmem:[%s9553_s1 + $0x24b0] sm:$0xff]  ;;  %v1317_v7 = vld [vmem:[%s9553_s1 + $0x27a8] sm:$0xff] }
 0x254   :  { %v1312_v6 = vld [vmem:[%s9553_s1 + $0x2780] sm:$0xff]  ;;  %v1077_v12 = vld [vmem:[%s9553_s1 + $0x2028] sm:$0xff] }
 0x255   :  { %v1072_v11 = vld [vmem:[%s9553_s1 + $0x2000] sm:$0xff]  ;;  %v1237_v15 = vld [vmem:[%s9553_s1 + $0x2528] sm:$0xff] }
 0x256   :  { %5092 = vmatpush3.bf16.msra.mxu0 %v5091_v24  ;;  %5124 = vmatpush3.bf16.msra.mxu1 %v5123_v25  ;;  %v5145_v24 = vpack.c.bf16 %v1117_v17, %v1112_v16  ;;  %v1032_v25 = vld [vmem:[%s9553_s1 + $0x1ec0] sm:$0xff]  ;;  %v1162_v16 = vld [vmem:[%s9553_s1 + $0x22d0] sm:$0xff]  ;;  %v1167_v17 = vld [vmem:[%s9553_s1 + $0x22f8] sm:$0xff]  ;;  %v5163_v20 = vpack.c.bf16 %v1077_v12, %v1072_v11 }
 0x257   :  { %5094 = vmatprep.subr.bf16.mxu0 %v5093_v26  ;;  %5126 = vmatprep.subr.bf16.mxu1 %v5125_v30  ;;  %v1037_v26 = vld [vmem:[%s9553_s1 + $0x1ee8] sm:$0xff]  ;;  %v1122_v30 = vld [vmem:[%s9553_s1 + $0x2190] sm:$0xff]  ;;  %v1232_v13 = vld [vmem:[%s9553_s1 + $0x2500] sm:$0xff] }
 0x258   :  { %v3094_v11 = vld [vmem:[%s9555_s3 + $0x130] sm:$0xff] }
 0x25a   :  { %5096 = vmatpush3.bf16.msra.mxu0 %v5095_v36  ;;  %5128 = vmatpush3.bf16.msra.mxu1 %v5127_v37  ;;  %v5147_v36 = vpack.c.bf16 %v1037_v26, %v1032_v25  ;;  %v5179_v37 = vpack.c.bf16 %v1197_v29, %v1192_v27  ;;  %v1242_v25 = vld [vmem:[%s9553_s1 + $0x2550] sm:$0xff]  ;;  %v1247_v27 = vld [vmem:[%s9553_s1 + $0x2578] sm:$0xff]  ;;  %v3073_v29 = vld [vmem:[%s9555_s3 + $0x88] sm:$0xff] }
 0x25b   :  { %5098 = vmatprep.subr.bf16.mxu0 %v5097_v38  ;;  %5130 = vmatprep.subr.bf16.mxu1 %v5129_v42  ;;  %v5149_v38 = vpack.c.bf16 %v1127_v31, %v1122_v30  ;;  %v5181_v42 = vpack.c.bf16 %v1287_v34, %v1282_v33  ;;  %v3104_v30 = vld [vmem:[%s9555_s3 + $0x180] sm:$0xff]  ;;  %v3105_v31 = vld [vmem:[%s9555_s3 + $0x188] sm:$0xff]  ;;  %v5199_v33 = vpack.c.bf16 %v1247_v27, %v1242_v25  ;;  %v3083_v27 = vld [vmem:[%s9555_s3 + $0xd8] sm:$0xff] }
 0x25c   :  { %v3097_v25 = vld [vmem:[%s9555_s3 + $0x148] sm:$0xff] }
 0x25e   :  { %5100 = vmatpush3.bf16.msra.mxu0 %v5099_v48  ;;  %5132 = vmatpush3.bf16.msra.mxu1 %v5131_v49  ;;  %v5151_v48 = vpack.c.bf16 %v1047_v40, %v1042_v39  ;;  %v5183_v49 = vpack.c.bf16 %v1207_v43, %v1202_v41  ;;  %v3089_v39 = vld [vmem:[%s9555_s3 + $0x108] sm:$0xff]  ;;  %v3074_v40 = vld [vmem:[%s9555_s3 + $0x90] sm:$0xff]  ;;  %v3075_v41 = vld [vmem:[%s9555_s3 + $0x98] sm:$0xff] }
 0x25f   :  { %5102 = vmatprep.subr.bf16.mxu0 %v5101_v50  ;;  %5134 = vmatprep.subr.bf16.mxu1 %v5133_v54  ;;  %v5153_v50 = vpack.c.bf16 %v1137_v45, %v1132_v44  ;;  %v5185_v54 = vpack.c.bf16 %v1297_v47, %v1292_v46  ;;  %v3107_v43 = vld [vmem:[%s9555_s3 + $0x198] sm:$0xff]  ;;  %v5205_v46 = vpack.c.bf16 %v3075_v41, %v3074_v40  ;;  %v3058_v47 = vld [vmem:[%s9555_s3 + $0x10] sm:$0xff]  ;;  %v3116_v40 = vld [vmem:[%s9555_s3 + $0x1e0] sm:$0xff] }
 0x260   :  { %v3117_v41 = vld [vmem:[%s9555_s3 + $0x1e8] sm:$0xff] }
 0x262   :  { %5104 = vmatpush3.bf16.msra.mxu0 %v5103_v60  ;;  %5136 = vmatpush3.bf16.msra.mxu1 %v5135_v61  ;;  %v5155_v60 = vpack.c.bf16 %v1057_v52, %v1052_v51  ;;  %v5187_v61 = vpack.c.bf16 %v1217_v55, %v1212_v53  ;;  %v3091_v51 = vld [vmem:[%s9555_s3 + $0x118] sm:$0xff]  ;;  %v3076_v52 = vld [vmem:[%s9555_s3 + $0xa0] sm:$0xff]  ;;  %v3077_v53 = vld [vmem:[%s9555_s3 + $0xa8] sm:$0xff] }
 0x263   :  { %5138 = vmatprep.subr.bf16.mxu0 %v5137_v62  ;;  %5170 = vmatprep.subr.bf16.mxu1 %v5169_v2  ;;  %v5157_v62 = vpack.c.bf16 %v1147_v57, %v1142_v56  ;;  %v5189_v2 = vpack.c.bf16 %v1307_v59, %v1302_v58  ;;  %v3108_v55 = vld [vmem:[%s9555_s3 + $0x1a0] sm:$0xff]  ;;  %v3109_v56 = vld [vmem:[%s9555_s3 + $0x1a8] sm:$0xff]  ;;  %v5332_v57 = vld [vmem:[%s9554_s0 + $0x70] sm:$0xff] }
 0x265   :  { %2836 = vmatmul.mubr.f32.vlgmr.msra.gmra.mrb[6].mxu0 %v5327_v18  ;;  %2906 = vmatmul.mubr.f32.vlgmr.msra.gmra.mrb[6].mxu1 %v5328_v21  ;;  %v1322_v18 = vld [vmem:[%s9553_s1 + $0x27d0] sm:$0xff]  ;;  %v5195_v21 = vpack.c.bf16 %v1237_v15, %v1232_v13  ;;  %v3095_v13 = vld [vmem:[%s9555_s3 + $0x138] sm:$0xff]  ;;  %v3081_v15 = vld [vmem:[%s9555_s3 + $0xc8] sm:$0xff] }
 0x266   :  { %5140 = vmatpush3.bf16.msra.mxu0 %v5139_v8  ;;  %5172 = vmatpush3.bf16.msra.mxu1 %v5171_v9  ;;  %v5159_v8 = vpack.c.bf16 %v1067_v0, %v1062_v63  ;;  %v5191_v9 = vpack.c.bf16 %v1227_v3, %v1222_v1  ;;  %v5197_v26 = vpack.c.bf16 %v1327_v19, %v1322_v18  ;;  %v3092_v63 = vld [vmem:[%s9555_s3 + $0x120] sm:$0xff]  ;;  %v3093_v1 = vld [vmem:[%s9555_s3 + $0x128] sm:$0xff]  ;;  %v3079_v3 = vld [vmem:[%s9555_s3 + $0xb8] sm:$0xff] }
 0x267   :  { %5142 = vmatprep.subr.bf16.mxu0 %v5141_v10  ;;  %5174 = vmatprep.subr.bf16.mxu1 %v5173_v14  ;;  %v5161_v10 = vpack.c.bf16 %v1157_v5, %v1152_v4  ;;  %v5193_v14 = vpack.c.bf16 %v1317_v7, %v1312_v6  ;;  %v5241_v0 = vpack.c.bf16 %v3109_v56, %v3108_v55  ;;  %v3110_v4 = vld [vmem:[%s9555_s3 + $0x1b0] sm:$0xff]  ;;  %v3111_v5 = vld [vmem:[%s9555_s3 + $0x1b8] sm:$0xff] }
 0x268   :  { %2975 = vmatprep.mubr.f32.mxu0 %v5329_v32  ;;  %3045 = vmatprep.mubr.f32.mxu1 %v5330_v35  ;;  %v3056_v35 = vld [vmem:[%s9555_s3] sm:$0xff]  ;;  %v5243_v7 = vpack.c.bf16 %v3093_v1, %v3092_v63  ;;  %v5245_v12 = vpack.c.bf16 %v3111_v5, %v3110_v4  ;;  %v5247_v19 = vpack.c.bf16 %v3095_v13, %v3094_v11 }
 0x26a   :  { %5144 = vmatpush3.bf16.msra.mxu0 %v5143_v22  ;;  %5176 = vmatpush3.bf16.msra.mxu1 %v5175_v23  ;;  %v5165_v22 = vpack.c.bf16 %v1167_v17, %v1162_v16  ;;  %v1082_v23 = vld [vmem:[%s9553_s1 + $0x2050] sm:$0xff]  ;;  %v3112_v16 = vld [vmem:[%s9555_s3 + $0x1c0] sm:$0xff]  ;;  %v3113_v17 = vld [vmem:[%s9555_s3 + $0x1c8] sm:$0xff] }
 0x26b   :  { %5146 = vmatprep.subr.bf16.mxu0 %v5145_v24  ;;  %5178 = vmatprep.subr.bf16.mxu1 %v5177_v28  ;;  %v1087_v24 = vld [vmem:[%s9553_s1 + $0x2078] sm:$0xff]  ;;  %v3072_v28 = vld [vmem:[%s9555_s3 + $0x80] sm:$0xff] }
 0x26c   :  { %v5167_v32 = vpack.c.bf16 %v1087_v24, %v1082_v23  ;;  %v5201_v34 = vpack.c.bf16 %v3073_v29, %v3072_v28  ;;  %v3096_v23 = vld [vmem:[%s9555_s3 + $0x140] sm:$0xff]  ;;  %v5249_v24 = vpack.c.bf16 %v3113_v17, %v3112_v16  ;;  %v3114_v28 = vld [vmem:[%s9555_s3 + $0x1d0] sm:$0xff]  ;;  %v3115_v29 = vld [vmem:[%s9555_s3 + $0x1d8] sm:$0xff] }
 0x26e   :  { %5148 = vmatpush3.bf16.msra.mxu0 %v5147_v36  ;;  %5180 = vmatpush3.bf16.msra.mxu1 %v5179_v37  ;;  %v3057_v36 = vld [vmem:[%s9555_s3 + $0x8] sm:$0xff]  ;;  %v3088_v37 = vld [vmem:[%s9555_s3 + $0x100] sm:$0xff] }
 0x26f   :  { %5150 = vmatprep.subr.bf16.mxu0 %v5149_v38  ;;  %5182 = vmatprep.subr.bf16.mxu1 %v5181_v42  ;;  %v5233_v38 = vpack.c.bf16 %v3105_v31, %v3104_v30  ;;  %v3106_v42 = vld [vmem:[%s9555_s3 + $0x190] sm:$0xff]  ;;  %v5203_v44 = vpack.c.bf16 %v3057_v36, %v3056_v35  ;;  %v5235_v45 = vpack.c.bf16 %v3089_v39, %v3088_v37  ;;  %v3099_v37 = vld [vmem:[%s9555_s3 + $0x158] sm:$0xff]  ;;  %v3085_v39 = vld [vmem:[%s9555_s3 + $0xe8] sm:$0xff] }
 0x270   :  { %v5251_v31 = vpack.c.bf16 %v3097_v25, %v3096_v23  ;;  %v3098_v35 = vld [vmem:[%s9555_s3 + $0x150] sm:$0xff]  ;;  %v5253_v36 = vpack.c.bf16 %v3115_v29, %v3114_v28  ;;  %v3120_v23 = vld [vmem:[%s9555_s3 + $0x200] sm:$0xff] }
 0x272   :  { %5152 = vmatpush3.bf16.msra.mxu0 %v5151_v48  ;;  %5184 = vmatpush3.bf16.msra.mxu1 %v5183_v49  ;;  %v3059_v48 = vld [vmem:[%s9555_s3 + $0x18] sm:$0xff]  ;;  %v3090_v49 = vld [vmem:[%s9555_s3 + $0x110] sm:$0xff] }
 0x273   :  { %5154 = vmatprep.subr.bf16.mxu0 %v5153_v50  ;;  %5186 = vmatprep.subr.bf16.mxu1 %v5185_v54  ;;  %v5237_v50 = vpack.c.bf16 %v3107_v43, %v3106_v42  ;;  %v5331_v54 = vld [vmem:[%s9554_s0 + $0x60] sm:$0xff]  ;;  %v5207_v58 = vpack.c.bf16 %v3059_v48, %v3058_v47  ;;  %v5239_v59 = vpack.c.bf16 %v3091_v51, %v3090_v49  ;;  %v3101_v49 = vld [vmem:[%s9555_s3 + $0x168] sm:$0xff]  ;;  %v3087_v51 = vld [vmem:[%s9555_s3 + $0xf8] sm:$0xff] }
 0x274   :  { %v5255_v43 = vpack.c.bf16 %v3099_v37, %v3098_v35  ;;  %v3100_v47 = vld [vmem:[%s9555_s3 + $0x160] sm:$0xff]  ;;  %v5257_v48 = vpack.c.bf16 %v3117_v41, %v3116_v40 }
 0x275   :  { %v5259_v55 = vpack.c.bf16 %v3101_v49, %v3100_v47 }
 0x276   :  { %5156 = vmatpush3.bf16.msra.mxu0 %v5155_v60  ;;  %5188 = vmatpush3.bf16.msra.mxu1 %v5187_v61  ;;  %v5209_v60 = vpack.c.bf16 %v3077_v53, %v3076_v52  ;;  %v3060_v61 = vld [vmem:[%s9555_s3 + $0x20] sm:$0xff]  ;;  %v3118_v52 = vld [vmem:[%s9555_s3 + $0x1f0] sm:$0xff]  ;;  %v3119_v53 = vld [vmem:[%s9555_s3 + $0x1f8] sm:$0xff] }
 0x277   :  { %5158 = vmatprep.subr.bf16.mxu0 %v5157_v62  ;;  %5190 = vmatprep.subr.bf16.mxu1 %v5189_v2  ;;  %v3061_v62 = vld [vmem:[%s9555_s3 + $0x28] sm:$0xff]  ;;  %v3078_v2 = vld [vmem:[%s9555_s3 + $0xb0] sm:$0xff] }
 0x278   :  { %v5211_v6 = vpack.c.bf16 %v3061_v62, %v3060_v61  ;;  %v3103_v61 = vld [vmem:[%s9555_s3 + $0x178] sm:$0xff] }
 0x27a   :  { %5160 = vmatpush3.bf16.msra.mxu0 %v5159_v8  ;;  %5192 = vmatpush3.bf16.msra.mxu1 %v5191_v9  ;;  %v5213_v8 = vpack.c.bf16 %v3079_v3, %v3078_v2  ;;  %v3062_v9 = vld [vmem:[%s9555_s3 + $0x30] sm:$0xff]  ;;  %v1328_v3 = vld [vmem:[%s9556_s2] sm:$0x1f] }
 0x27b   :  { %5162 = vmatprep.subr.bf16.mxu0 %v5161_v10  ;;  %5194 = vmatprep.subr.bf16.mxu1 %v5193_v14  ;;  %v3063_v10 = vld [vmem:[%s9555_s3 + $0x38] sm:$0xff]  ;;  %v3080_v14 = vld [vmem:[%s9555_s3 + $0xc0] sm:$0xff] }
 0x27c   :  { %v5215_v18 = vpack.c.bf16 %v3063_v10, %v3062_v9 }
 0x27e   :  { %5164 = vmatpush3.bf16.msra.mxu0 %v5163_v20  ;;  %5196 = vmatpush3.bf16.msra.mxu1 %v5195_v21  ;;  %v5217_v20 = vpack.c.bf16 %v3081_v15, %v3080_v14  ;;  %v3064_v21 = vld [vmem:[%s9555_s3 + $0x40] sm:$0xff] }
 0x27f   :  { %5166 = vmatprep.subr.bf16.mxu0 %v5165_v22  ;;  %5198 = vmatprep.subr.bf16.mxu1 %v5197_v26  ;;  %v3065_v22 = vld [vmem:[%s9555_s3 + $0x48] sm:$0xff]  ;;  %v3082_v26 = vld [vmem:[%s9555_s3 + $0xd0] sm:$0xff] }
 0x280   :  { %v5219_v30 = vpack.c.bf16 %v3065_v22, %v3064_v21 }
 0x282   :  { %5168 = vmatpush3.bf16.msra.mxu0 %v5167_v32  ;;  %5200 = vmatpush3.bf16.msra.mxu1 %v5199_v33  ;;  %v5221_v32 = vpack.c.bf16 %v3083_v27, %v3082_v26  ;;  %v3066_v33 = vld [vmem:[%s9555_s3 + $0x50] sm:$0xff]  ;;  %v5334_v26 = vmov 0.0|0.0   ;;  %v5336_v27 = vmov 0.0  }
 0x283   :  { %5202 = vmatprep.subr.bf16.mxu0 %v5201_v34  ;;  %5234 = vmatprep.subr.bf16.mxu1 %v5233_v38  ;;  %v3067_v34 = vld [vmem:[%s9555_s3 + $0x58] sm:$0xff]  ;;  %v3084_v38 = vld [vmem:[%s9555_s3 + $0xe0] sm:$0xff] }
 0x284   :  { %v5223_v42 = vpack.c.bf16 %v3067_v34, %v3066_v33 }
 0x285   :  { %2976 = vmatmul.mubr.f32.vlgmr.msra.gmra.mrb[8].mxu0 %v5331_v54  ;;  %3046 = vmatmul.mubr.f32.vlgmr.msra.gmra.mrb[8].mxu1 %v5332_v57  ;;  %v3070_v57 = vld [vmem:[%s9555_s3 + $0x70] sm:$0xff] }
 0x286   :  { %5204 = vmatpush3.bf16.msra.mxu0 %v5203_v44  ;;  %5236 = vmatpush3.bf16.msra.mxu1 %v5235_v45  ;;  %v5225_v44 = vpack.c.bf16 %v3085_v39, %v3084_v38  ;;  %v3068_v45 = vld [vmem:[%s9555_s3 + $0x60] sm:$0xff] }
 0x287   :  { %5206 = vmatprep.subr.bf16.mxu0 %v5205_v46  ;;  %5238 = vmatprep.subr.bf16.mxu1 %v5237_v50  ;;  %v3069_v46 = vld [vmem:[%s9555_s3 + $0x68] sm:$0xff]  ;;  %v3086_v50 = vld [vmem:[%s9555_s3 + $0xf0] sm:$0xff] }
 0x288   :  { %v5227_v54 = vpack.c.bf16 %v3069_v46, %v3068_v45  ;;  %v5229_v56 = vpack.c.bf16 %v3087_v51, %v3086_v50 }
 0x28a   :  { %5208 = vmatpush3.bf16.msra.mxu0 %v5207_v58  ;;  %5240 = vmatpush3.bf16.msra.mxu1 %v5239_v59  ;;  %v3071_v58 = vld [vmem:[%s9555_s3 + $0x78] sm:$0xff]  ;;  %v5261_v59 = vpack.c.bf16 %v3119_v53, %v3118_v52 }
 0x28b   :  { %5210 = vmatprep.subr.bf16.mxu0 %v5209_v60  ;;  %5242 = vmatprep.subr.bf16.mxu1 %v5241_v0  ;;  %v3102_v60 = vld [vmem:[%s9555_s3 + $0x170] sm:$0xff]  ;;  %v5231_v62 = vpack.c.bf16 %v3071_v58, %v3070_v57  ;;  %v1330_v0 = vlaneseq }
 0x28c   :  { %v5263_v63 = vpack.c.bf16 %v3103_v61, %v3102_v60 }
 0x28d   :  { %v1331_v1 = vshrl.u32 %v1330_v0, 7 }
 0x28e   :  { %5212 = vmatpush3.bf16.msra.mxu0 %v5211_v6  ;;  %5244 = vmatpush3.bf16.msra.mxu1 %v5243_v7 }
 0x28f   :  { %5214 = vmatprep.subr.bf16.mxu0 %v5213_v8  ;;  %5246 = vmatprep.subr.bf16.mxu1 %v5245_v12  ;;  %v1332_v2 = vsub.s32 0, %v1331_v1  ;;  %v1340_v4 = vsub.s32 2, %v1331_v1  ;;  %v1336_v5 = vsub.s32 1, %v1331_v1  ;;  %v1344_v6 = vsub.s32 3, %v1331_v1 }
 0x290   :  { %v1348_v28 = vsub.s32 4, %v1331_v1  ;;  %v3532_v1 = vld [vmem:[%s9557_s4] ss:$0 sm:$0xff] }
 0x291   :  { %v1333_v7 = vrot.slane %v1328_v3, %v1332_v2  ;;  %v1341_v8 = vrot.slane %v1328_v3, %v1340_v4  ;;  %v1337_v9 = vrot.slane %v1328_v3, %v1336_v5  ;;  %v1345_v10 = vrot.slane %v1328_v3, %v1344_v6  ;;  %v3348_v6 = vld [vmem:[%s9558_s5] sm:$0xff] }
 0x292   :  { %5216 = vmatpush3.bf16.msra.mxu0 %v5215_v18  ;;  %5248 = vmatpush3.bf16.msra.mxu1 %v5247_v19 }
 0x293   :  { %5218 = vmatprep.subr.bf16.mxu0 %v5217_v20  ;;  %5250 = vmatprep.subr.bf16.mxu1 %v5249_v24  ;;  %v3121_v24 = vld [vmem:[%s9555_s3 + $0x208] sm:$0xf] }
 0x294   :  { %v5266_v25 = vpack.c.bf16 %v3121_v24, %v3120_v23  ;;  %v3538_v23 = vld [vmem:[%s9561_s8] ss:$0 sm:$0xff] }
 0x296   :  { %5220 = vmatpush3.bf16.msra.mxu0 %v5219_v30  ;;  %5252 = vmatpush3.bf16.msra.mxu1 %v5251_v31  ;;  %v1349_v30 = vrot.slane %v1328_v3, %v1348_v28 }
 0x297   :  { %5222 = vmatprep.subr.bf16.mxu0 %v5221_v32  ;;  %5254 = vmatprep.subr.bf16.mxu1 %v5253_v36 }
 0x29a   :  { %5224 = vmatpush3.bf16.msra.mxu0 %v5223_v42  ;;  %5256 = vmatpush3.bf16.msra.mxu1 %v5255_v43 }
 0x29b   :  { %5226 = vmatprep.subr.bf16.mxu0 %v5225_v44  ;;  %5258 = vmatprep.subr.bf16.mxu1 %v5257_v48 }
 0x29e   :  { %5228 = vmatpush3.bf16.msra.mxu0 %v5227_v54  ;;  %5260 = vmatpush3.bf16.msra.mxu1 %v5259_v55 }
 0x29f   :  { %5230 = vmatprep.subr.bf16.mxu0 %v5229_v56  ;;  %5262 = vmatprep.subr.bf16.mxu1 %v5261_v59 }
 0x2a2   :  { %5232 = vmatpush3.bf16.msra.mxu0 %v5231_v62  ;;  %5264 = vmatpush3.bf16.msra.mxu1 %v5263_v63 }
 0x2a3   :  { %5265 = vmatprep.subr.bf16.mxu0 %v5334_v26  ;;  %5269 = vmatprep.subr.bf16.mxu1 %v5334_v26 }
 0x2d8   :  { %v1918_v11 = vpop.f32.mrb[0].mxu0  ;;  %v2486_v13 = vpop.f32.mrb[0].mxu1 }
 0x2d9   :  { %v5277_v12 = vadd.f32 %v1918_v11, %v1333_v7  ;;  %v1920_v14 = vpop.f32.mrb[1].mxu0  ;;  %v5279_v15 = vadd.f32 %v2486_v13, %v1341_v8  ;;  %v2488_v17 = vpop.f32.mrb[1].mxu1  ;;  %v3349_v7 = vld [vmem:[%s9558_s5 + $0x8] sm:$0x3] }
 0x2da   :  { %v5278_v16 = vadd.f32 %v1920_v14, %v1337_v9  ;;  %v5280_v18 = vadd.f32 %v2488_v17, %v1345_v10  ;;  %v5270_v9 = vpack.c.bf16 %v3349_v7, %v3348_v6 }
 0x2db   :  { %v3051_v20 = vmax.f32 %v5277_v12, 0.0  ;;  %v3053_v21 = vmax.f32 %v5279_v15, 0.0  ;;  %v3436_v15 = vld [vmem:[%s9559_s7] sm:$0xff] }
 0x2dc   :  { %v3052_v19 = vmax.f32 %v5278_v16, 0.0  ;;  %v3054_v22 = vmax.f32 %v5280_v18, 0.0  ;;  %v3437_v16 = vld [vmem:[%s9559_s7 + $0x8] sm:$0x3]  ;;  %v3535_v18 = vld [vmem:[%s9560_s6] ss:$0 sm:$0xff] }
 0x2dd   :  { %v5274_v17 = vpack.c.bf16 %v3437_v16, %v3436_v15 }
 0x2de   :  { %3201 = vmatprep.mubr.f32.mxu0 %v3052_v19  ;;  %3271 = vmatprep.mubr.f32.mxu1 %v3054_v22 }
 0x2df   :  { %3202 = vmatmul.mubr.f32.vlgmr.msra.gmra.mrb[10].mxu0 %v3051_v20  ;;  %3272 = vmatmul.mubr.f32.vlgmr.msra.gmra.mrb[10].mxu1 %v3053_v21 }
 0x2e0   :  { %5268 = vmatpush3.bf16.msk.msra.mxu0 %vm5267_vm2, %v5266_v25  ;;  %3904 = vmatprep.mubr.msk.f32.mxu0 %vm5335_vm3, %v5336_v27 }
 0x2e1   :  { %3911 = vmatprep.mubr.msk.f32.mxu1 %vm5335_vm3, %v5336_v27  ;;  %5273 = vmatprep.subr.bf16.mxu0 %v5334_v26 }
 0x2e2   :  { %5272 = vmatpush3.bf16.msk.msra.mxu1 %vm5271_vm6, %v5270_v9 }
 0x2f8   :  { %v3573_v29 = vpop.f32.mrb[2].mxu0  ;;  %v3608_v32 = vpop.f32.mrb[2].mxu1 }
 0x2f9   :  { %v3574_v31 = vpop.f32.mrb[3].mxu0  ;;  %v3609_v34 = vpop.f32.mrb[3].mxu1 }
 0x2fa   :  { %v3575_v33 = vadd.f32 %v3574_v31, %v3573_v29  ;;  %v3610_v35 = vadd.f32 %v3609_v34, %v3608_v32 }
 0x2fc   :  { %v2558_v36 = vadd.f32 %v3575_v33, %v1349_v30 }
 0x2fe   :  { %v2628_v37 = vadd.f32 %v3610_v35, %v2558_v36 }
 0x318   :  { %v3643_v38 = vpop.f32.mrb[4].mxu0  ;;  %v3678_v40 = vpop.f32.mrb[4].mxu1 }
 0x319   :  { %v3644_v39 = vpop.f32.mrb[5].mxu0  ;;  %v3679_v42 = vpop.f32.mrb[5].mxu1 }
 0x31a   :  { %v3645_v41 = vadd.f32 %v3644_v39, %v3643_v38  ;;  %v3680_v43 = vadd.f32 %v3679_v42, %v3678_v40 }
 0x31c   :  { %v2698_v44 = vadd.f32 %v3645_v41, %v2628_v37 }
 0x31e   :  { %v2768_v45 = vadd.f32 %v3680_v43, %v2698_v44 }
 0x338   :  { %v3713_v46 = vpop.f32.mrb[6].mxu0  ;;  %v3748_v48 = vpop.f32.mrb[6].mxu1 }
 0x339   :  { %v3714_v47 = vpop.f32.mrb[7].mxu0  ;;  %v3749_v50 = vpop.f32.mrb[7].mxu1 }
 0x33a   :  { %v3715_v49 = vadd.f32 %v3714_v47, %v3713_v46  ;;  %v3750_v51 = vadd.f32 %v3749_v50, %v3748_v48 }
 0x33c   :  { %v2838_v52 = vadd.f32 %v3715_v49, %v2768_v45 }
 0x33e   :  { %v2908_v53 = vadd.f32 %v3750_v51, %v2838_v52 }
 0x358   :  { %v3783_v54 = vpop.f32.mrb[8].mxu0  ;;  %v3818_v56 = vpop.f32.mrb[8].mxu1 }
 0x359   :  { %v3784_v55 = vpop.f32.mrb[9].mxu0  ;;  %v3819_v58 = vpop.f32.mrb[9].mxu1 }
 0x35a   :  { %v3785_v57 = vadd.f32 %v3784_v55, %v3783_v54  ;;  %v3820_v59 = vadd.f32 %v3819_v58, %v3818_v56 }
 0x35c   :  { %v2978_v60 = vadd.f32 %v3785_v57, %v2908_v53 }
 0x35e   :  { %v3048_v61 = vadd.f32 %v3820_v59, %v2978_v60 }
 0x360   :  { %v3055_v62 = vmax.f32 %v3048_v61, 0.0 }
 0x362   :  { %3905 = vmatmul.mubr.msk.f32.vlgmr.msra.gmra.mrb[12].mxu0 %vm3129_vm4, %v3055_v62 }
 0x363   :  { %3918 = vmatprep.mubr.msk.f32.mxu0 %vm5335_vm3, %v5336_v27  ;;  %5276 = vmatpush3.bf16.msk.msra.mxu0 %vm5271_vm6, %v5274_v17 }
 0x3b2   :  { %v3853_v63 = vpop.f32.mrb[10].mxu0  ;;  %v3888_v0 = vpop.f32.mrb[10].mxu1 }
 0x3b3   :  { %v3854_v2 = vpop.f32.mrb[11].mxu0  ;;  %v3889_v4 = vpop.f32.mrb[11].mxu1 }
 0x3b4   :  { %v3855_v3 = vadd.f32 %v3854_v2, %v3853_v63  ;;  %v3890_v5 = vadd.f32 %v3889_v4, %v3888_v0 }
 0x3b6   :  { %v3204_v8 = vadd.f32 %v3855_v3, %v3532_v1 }
 0x3b8   :  { %v3274_v10 = vadd.f32 %v3890_v5, %v3204_v8 }
 0x435   :  { %v3343_v11 = vpop.f32.mrb[12].mxu0 }
 0x436   :  { %v3344_v12 = vadd.f32 %v3343_v11, %v3274_v10  ;;  %v3906_v13 = vpop.f32.mrb[13].mxu0 }
 0x438   :  { %v3347_v14 = vmax.f32 %v3344_v12, 0.0 }
 0x43a   :  { %3912 = vmatmul.mubr.msk.f32.vlgmr.msra.gmra.mrb[12].mxu1 %vm3357_vm7, %v3347_v14 }
 0x50d   :  { %v3431_v19 = vpop.f32.mrb[12].mxu1 }
 0x50e   :  { %v3432_v20 = vadd.f32 %v3535_v18, %v3431_v19  ;;  %v3913_v21 = vpop.f32.mrb[13].mxu1 }
 0x510   :  { %v3435_v22 = vmax.f32 %v3432_v20, 0.0 }
 0x512   :  { %3919 = vmatmul.mubr.msk.f32.vlgmr.msra.gmra.mrb[14].mxu0 %vm3357_vm7, %v3435_v22 }
 0x5e5   :  { %v3517_v24 = vpop.f32.mrb[14].mxu0 }
 0x5e6   :  { %v3518_v25 = vadd.f32 %v3538_v23, %v3517_v24  ;;  %v3920_v26 = vpop.f32.mrb[15].mxu0 }
 0x5e8   :  { %v3521_v27 = vsub.f32 0.0, %v3518_v25 }
 0x5ea   :  { %v3522_v28 = vmul.f32 1.442695, %v3521_v27 }
 0x5ec   :  { %5313 = vpow2.f32 %v3522_v28 }
 0x5f6   :  { %v5314_v29 = vpop.eup %5313 }
 0x5f7   :  { %v3524_v30 = vadd.f32 1.0, %v5314_v29 }
 0x5f9   :  { %5315 = vrcp.f32 %v3524_v30 }
 0x603   :  { %v5316_v31 = vpop.eup %5315 }
 0x604   :  { %3527 = vst [vmem:[%s9562_s9] sm:$0xff] %v5316_v31 }

</bundles_post_ra>
